<compile_context>
chip_gen: v5e
topology: v5e:2x2
jax: 0.10.0
libtpu: 0.0.40
codegen_flags: <defaults>
</compile_context>

<pallas_src>
import math
import functools

import jax
import jax.numpy as jnp
import numpy as np
from jax.experimental import pallas as pl
from jax.experimental.pallas import tpu as pltpu

LN_EPS = 1e-5


def _pad128(w):
    return ((w + 127) // 128) * 128


def _layernorm(x, gamma, beta):
    # x: [R, D], gamma/beta: [1, D]; biased variance, matching torch.nn.LayerNorm.
    # Single pass: var = E[x^2] - mean^2 (independent cross-lane reduces).
    mean = jnp.mean(x, axis=-1, keepdims=True)
    mean2 = jnp.mean(x * x, axis=-1, keepdims=True)
    var = mean2 - mean * mean
    return (x - mean) * jax.lax.rsqrt(var + LN_EPS) * gamma + beta


def decoder_stack_kernel(x_ref, wqkv_ref, wo_ref, w0_ref, w1_ref, vec_ref, o_ref,
                         *, h, d_k, d_v, d_ff, scale, q_off, k_off, v_off, vec_offs):
    """One grid step == (one batch block) x (one decoder layer)."""
    l = pl.program_id(1)
    BB, S, D = x_ref.shape
    R = BB * S

    # Layer 0 of each batch block: seed the resident output block. o_ref keeps
    # the same block index across the layer axis, so it stays in VMEM and is
    # written back to HBM exactly once per batch block.
    @pl.when(l == 0)
    def _():
        o_ref[...] = x_ref[...]

    xr = o_ref[...].reshape(R, D)                      # [R, D], rows = batch*seq

    # ---- per-layer small vectors: one packed DMA, 128-aligned static slices --
    b0 = vec_ref[:, vec_offs["b0"]:vec_offs["b0"] + d_ff]
    b1 = vec_ref[:, vec_offs["b1"]:vec_offs["b1"] + D]
    g0 = vec_ref[:, vec_offs["g0"]:vec_offs["g0"] + D]
    be0 = vec_ref[:, vec_offs["be0"]:vec_offs["be0"] + D]
    g1 = vec_ref[:, vec_offs["g1"]:vec_offs["g1"] + D]
    be1 = vec_ref[:, vec_offs["be1"]:vec_offs["be1"] + D]

    # ---- fused QKV projection (output width padded to a 128-lane multiple) ---
    qkv = jnp.dot(xr, wqkv_ref[...], preferred_element_type=jnp.float32)  # [R, C]
    qkv3 = qkv.reshape(BB, S, qkv.shape[-1])

    # ---- per-head attention (h static & small -> unrolled); per-head outputs
    # are stacked and pushed through ONE output-projection matmul. -------------
    a_heads = []
    for i in range(h):
        q_i = qkv3[:, :, q_off + i * d_k: q_off + (i + 1) * d_k]   # [BB,S,d_k]
        k_i = qkv3[:, :, k_off + i * d_k: k_off + (i + 1) * d_k]   # [BB,S,d_k]
        v_i = qkv3[:, :, v_off + i * d_v: v_off + (i + 1) * d_v]   # [BB,S,d_v]

        # q @ k.T as a batched contract-last dot_general (no materialized .T).
        s = scale * jnp.einsum('bsk,btk->bst', q_i, k_i,
                               preferred_element_type=jnp.float32)  # [BB,S,S]
        s = s - jnp.max(s, axis=-1, keepdims=True)
        e = jnp.exp(s)
        # exact reciprocal kept to stay inside the 1e-4 f32 parity tolerance
        # (approx=True -> EUP vrcp would be essentially free if tolerance allows).
        p = e * pl.reciprocal(jnp.sum(e, axis=-1, keepdims=True), approx=False)

        # Reference quirk: scores @ v.mT (contracts over d_v; requires d_v == S).
        a_heads.append(jnp.einsum('bsj,btj->bst', p, v_i,
                                  preferred_element_type=jnp.float32))  # [BB,S,S]

    # Fused head-output projection: single matmul with contraction depth h*d_v.
    a = jnp.concatenate(a_heads, axis=-1).reshape(R, h * d_v)            # [R, h*d_v]
    attn = jnp.dot(a, wo_ref[...], preferred_element_type=jnp.float32)   # [R, D]

    # ---- residual + LayerNorm 0 ---------------------------------------------
    ln0 = _layernorm(attn + xr, g0, be0)

    # ---- position-wise FFN (weights pre-transposed; no in-kernel .T) ---------
    ff = jnp.dot(ln0, w0_ref[...], preferred_element_type=jnp.float32) + b0
    ff = jnp.maximum(ff, 0.0)                          # relu
    ff = jnp.dot(ff, w1_ref[...], preferred_element_type=jnp.float32) + b1

    out = _layernorm(ff + ln0, g1, be1)                # [R, D]

    # Keep the activation resident for the next layer; the HBM writeback of this
    # block happens automatically only after the last layer of the batch block.
    o_ref[...] = out.reshape(BB, S, D)


def transformer_decoder(x, packed, meta, *, h, d_k, d_v, d_ff, batch_block=None):
    """Runs the whole n-layer decoder stack in a single pallas_call."""
    B, S, D = x.shape
    assert S == d_v, "reference quirk: scores @ v.mT requires d_v == seq_len"
    n_layers = packed["wqkv_t"].shape[0]
    BB = B if batch_block is None else batch_block
    assert B % BB == 0
    NB = B // BB
    scale = 1.0 / math.sqrt(d_k)

    kern = functools.partial(
        decoder_stack_kernel, h=h, d_k=d_k, d_v=d_v, d_ff=d_ff, scale=scale,
        q_off=meta["q_off"], k_off=meta["k_off"], v_off=meta["v_off"],
        vec_offs=meta["vec_offs"])

    def wspec(arr):
        # Per-layer weight block: leading layer dim is selected by the layer
        # grid axis and squeezed; the rest of the tensor is resident in full.
        nd = arr.ndim
        return pl.BlockSpec((pl.Squeezed(),) + tuple(arr.shape[1:]),
                            lambda b, l: (l,) + (0,) * (nd - 1))

    weight_names = ("wqkv_t", "wo_t", "w0_t", "w1_t", "vecs")

    return pl.pallas_call(
        kern,
        out_shape=jax.ShapeDtypeStruct((B, S, D), jnp.float32),
        grid=(NB, n_layers),
        in_specs=[pl.BlockSpec((BB, S, D), lambda b, l: (b, 0, 0))]
                 + [wspec(packed[name]) for name in weight_names],
        out_specs=pl.BlockSpec((BB, S, D), lambda b, l: (b, 0, 0)),
        compiler_params=pltpu.CompilerParams(
            # batch blocks are independent (megacore/TC parallel); the layer
            # axis carries the resident activation, so it must stay sequential.
            dimension_semantics=("parallel", "arbitrary"),
            vmem_limit_bytes=32 * 1024 * 1024,
        ),
    )(x, *[packed[name] for name in weight_names])


# ------------------------- parameter init (deterministic) -------------------------
def init_params(key, n, d_model, d_k, d_v, d_ff, h):
    # Same layouts as the PyTorch module (Linear weight = [out_features, in_features]).
    def lin(k, out_f, in_f):
        bound = 1.0 / math.sqrt(in_f)
        return jax.random.uniform(k, (out_f, in_f), jnp.float32, -bound, bound)

    layers = []
    for _ in range(n):
        key, *ks = jax.random.split(key, 9)
        p = {
            "wq": jnp.stack([lin(jax.random.fold_in(ks[0], i), d_k, d_model) for i in range(h)]),
            "wk": jnp.stack([lin(jax.random.fold_in(ks[1], i), d_k, d_model) for i in range(h)]),
            "wv": jnp.stack([lin(jax.random.fold_in(ks[2], i), d_v, d_model) for i in range(h)]),
            "wo": lin(ks[3], d_model, h * d_v),
            "w0": lin(ks[4], d_ff, d_model),
            "b0": jax.random.uniform(ks[5], (1, d_ff), jnp.float32,
                                     -1.0 / math.sqrt(d_model), 1.0 / math.sqrt(d_model)),
            "w1": lin(ks[6], d_model, d_ff),
            "b1": jax.random.uniform(ks[7], (1, d_model), jnp.float32,
                                     -1.0 / math.sqrt(d_ff), 1.0 / math.sqrt(d_ff)),
            "g0": jnp.ones((1, d_model), jnp.float32),
            "be0": jnp.zeros((1, d_model), jnp.float32),
            "g1": jnp.ones((1, d_model), jnp.float32),
            "be1": jnp.zeros((1, d_model), jnp.float32),
        }
        layers.append(p)
    return layers


def pack_params(layers, d_model, d_k, d_v, d_ff, h):
    """Stack per-layer weights on a leading layer axis, pre-transpose them, and
    lane-align/pack them for the kernel (all layout work happens once, outside)."""
    n = len(layers)
    D = d_model
    stack = lambda name: jnp.stack([p[name] for p in layers])

    # --- fused QKV: each of the q / k / v sections zero-padded to a 128-lane
    #     boundary so every section starts at a 128-aligned offset. ------------
    qw, kw, vw = _pad128(h * d_k), _pad128(h * d_k), _pad128(h * d_v)
    wq_t = jnp.transpose(stack("wq"), (0, 3, 1, 2)).reshape(n, D, h * d_k)
    wk_t = jnp.transpose(stack("wk"), (0, 3, 1, 2)).reshape(n, D, h * d_k)
    wv_t = jnp.transpose(stack("wv"), (0, 3, 1, 2)).reshape(n, D, h * d_v)
    wqkv_t = jnp.zeros((n, D, qw + kw + vw), jnp.float32)
    wqkv_t = wqkv_t.at[:, :, 0:h * d_k].set(wq_t)
    wqkv_t = wqkv_t.at[:, :, qw:qw + h * d_k].set(wk_t)
    wqkv_t = wqkv_t.at[:, :, qw + kw:qw + kw + h * d_v].set(wv_t)

    # --- fused head-output projection: [n, h*d_v, D] --------------------------
    wo_t = jnp.transpose(stack("wo"), (0, 2, 1))

    # --- all small per-layer vectors packed into ONE lane-aligned tensor ------
    widths = (("b0", d_ff), ("b1", D), ("g0", D), ("be0", D), ("g1", D), ("be1", D))
    vec_offs, cur = {}, 0
    for name, w in widths:
        vec_offs[name] = cur
        cur += _pad128(w)
    vecs = jnp.zeros((n, 1, cur), jnp.float32)
    for name, w in widths:
        vecs = vecs.at[:, :, vec_offs[name]:vec_offs[name] + w].set(stack(name))

    packed = {
        "wqkv_t": wqkv_t,                                 # [n, D, pad(h*dk)+pad(h*dk)+pad(h*dv)]
        "wo_t": wo_t,                                     # [n, h*d_v, D]
        "w0_t": jnp.transpose(stack("w0"), (0, 2, 1)),    # [n, D, d_ff]
        "w1_t": jnp.transpose(stack("w1"), (0, 2, 1)),    # [n, d_ff, D]
        "vecs": vecs,                                     # [n, 1, Vtot]
    }
    meta = {"q_off": 0, "k_off": qw, "v_off": qw + kw, "vec_offs": vec_offs}
    return packed, meta


# ------------------------- pure-JAX reference -------------------------
def ref_decoder(x, layers, *, h, d_k):
    def ln(v, g, b):
        m = jnp.mean(v, -1, keepdims=True)
        var = jnp.mean((v - m) ** 2, -1, keepdims=True)
        return (v - m) / jnp.sqrt(var + LN_EPS) * g + b

    for p in layers:
        heads = []
        for i in range(h):
            q = x @ p["wq"][i].T
            k = x @ p["wk"][i].T
            v = x @ p["wv"][i].T
            s = jnp.einsum("bsd,btd->bst", q, k) / math.sqrt(d_k)
            sc = jax.nn.softmax(s, axis=-1)
            heads.append(jnp.einsum("bsk,btk->bst", sc, v))   # scores @ v.mT
        attn = jnp.concatenate(heads, -1) @ p["wo"].T
        ln0 = ln(attn + x, p["g0"], p["be0"])
        ff = jnp.maximum(ln0 @ p["w0"].T + p["b0"], 0.0) @ p["w1"].T + p["b1"]
        x = ln(ff + ln0, p["g1"], p["be1"])
    return x


if __name__ == "__main__":
    # d_model=128 / d_ff=256 keep every matmul and the output store lane-dense.
    # B=32, batch_block=16 -> R = BB*S = 128 MXU rows per step and NB = 2 grid
    # batch blocks (even, so both v7x TensorCores are busy).
    n, d_model, d_k, d_v, d_ff, h = 2, 128, 32, 8, 256, 2
    B, S = 32, 8            # S must equal d_v (reference quirk, see note above)
    batch_block = 16

    key = jax.random.PRNGKey(0)
    kx, kp = jax.random.split(key)
    x = jax.random.normal(kx, (B, S, d_model), jnp.float32)
    layers = init_params(kp, n, d_model, d_k, d_v, d_ff, h)
    packed, meta = pack_params(layers, d_model, d_k, d_v, d_ff, h)

    out = transformer_decoder(x, packed, meta, h=h, d_k=d_k, d_v=d_v, d_ff=d_ff,
                              batch_block=batch_block)
    out = jax.block_until_ready(out)

    ref = ref_decoder(x, layers, h=h, d_k=d_k)
    np.testing.assert_allclose(np.asarray(out), np.asarray(ref), rtol=1e-4, atol=1e-4)

    print("KERNEL_OK")
</pallas_src>

<mosaic_0001>
module attributes {stable_mosaic.version = 11 : i64} {
  func.func @decoder_stack_kernel(%arg0: i32, %arg1: i32, %arg2: memref<16x8x128xf32, #tpu.memory_space<vmem>>, %arg3: memref<1x128x384xf32, #tpu.memory_space<vmem>>, %arg4: memref<1x16x128xf32, #tpu.memory_space<vmem>>, %arg5: memref<1x128x256xf32, #tpu.memory_space<vmem>>, %arg6: memref<1x256x128xf32, #tpu.memory_space<vmem>>, %arg7: memref<1x1x896xf32, #tpu.memory_space<vmem>>, %arg8: memref<16x8x128xf32, #tpu.memory_space<vmem>>) attributes {dimension_semantics = [#tpu.dimension_semantics<parallel>, #tpu.dimension_semantics<arbitrary>], iteration_bounds = array<i64: 2, 2>, scalar_prefetch = 0 : i64, scratch_operands = 0 : i64, tpu.core_type = #tpu.core_type<tc>, window_params = [{transform_indices = @transform_0, window_bounds = array<i64: 16, 8, 128>}, {transform_indices = @transform_1, window_bounds = array<i64: 1, 128, 384>}, {transform_indices = @transform_2, window_bounds = array<i64: 1, 16, 128>}, {transform_indices = @transform_3, window_bounds = array<i64: 1, 128, 256>}, {transform_indices = @transform_4, window_bounds = array<i64: 1, 256, 128>}, {transform_indices = @transform_5, window_bounds = array<i64: 1, 1, 896>}, {transform_indices = @transform_6, window_bounds = array<i64: 16, 8, 128>}]} {
    %c0_i32 = arith.constant 0 : i32
    %0 = arith.cmpi eq, %arg1, %c0_i32 : i32
    %1 = arith.extui %0 : i1 to i32
    %c0_i32_0 = arith.constant 0 : i32
    %2 = arith.cmpi ne, %1, %c0_i32_0 : i32
    scf.if %2 {
      %c0_55 = arith.constant 0 : index
      %c0_56 = arith.constant 0 : index
      %c0_57 = arith.constant 0 : index
      %120 = vector.load %arg2[%c0_55, %c0_56, %c0_57] : memref<16x8x128xf32, #tpu.memory_space<vmem>>, vector<16x8x128xf32>
      %c0_58 = arith.constant 0 : index
      %c0_59 = arith.constant 0 : index
      %c0_60 = arith.constant 0 : index
      %121 = vector.load %arg8[%c0_58, %c0_59, %c0_60] : memref<16x8x128xf32, #tpu.memory_space<vmem>>, vector<16x8x128xf32>
      tpu.vector_store %arg8[%c0_58, %c0_59, %c0_60], %120 {strides = array<i32>} : memref<16x8x128xf32, #tpu.memory_space<vmem>>, vector<16x8x128xf32>,
    } else {
    }
    %c0 = arith.constant 0 : index
    %c0_1 = arith.constant 0 : index
    %c0_2 = arith.constant 0 : index
    %3 = vector.load %arg8[%c0, %c0_1, %c0_2] : memref<16x8x128xf32, #tpu.memory_space<vmem>>, vector<16x8x128xf32>
    %4 = vector.shape_cast %3 : vector<16x8x128xf32> to vector<128x128xf32>
    %c0_3 = arith.constant 0 : index
    %c0_4 = arith.constant 0 : index
    %c0_5 = arith.constant 0 : index
    %5 = vector.load %arg7[%c0_3, %c0_4, %c0_5] : memref<1x1x896xf32, #tpu.memory_space<vmem>>, vector<1x1x256xf32>
    %6 = vector.shape_cast %5 : vector<1x1x256xf32> to vector<1x256xf32>
    %c0_6 = arith.constant 0 : index
    %c0_7 = arith.constant 0 : index
    %c256 = arith.constant 256 : index
    %7 = vector.load %arg7[%c0_6, %c0_7, %c256] : memref<1x1x896xf32, #tpu.memory_space<vmem>>, vector<1x1x128xf32>
    %8 = vector.shape_cast %7 : vector<1x1x128xf32> to vector<1x128xf32>
    %c0_8 = arith.constant 0 : index
    %c0_9 = arith.constant 0 : index
    %c384 = arith.constant 384 : index
    %9 = vector.load %arg7[%c0_8, %c0_9, %c384] : memref<1x1x896xf32, #tpu.memory_space<vmem>>, vector<1x1x128xf32>
    %10 = vector.shape_cast %9 : vector<1x1x128xf32> to vector<1x128xf32>
    %c0_10 = arith.constant 0 : index
    %c0_11 = arith.constant 0 : index
    %c512 = arith.constant 512 : index
    %11 = vector.load %arg7[%c0_10, %c0_11, %c512] : memref<1x1x896xf32, #tpu.memory_space<vmem>>, vector<1x1x128xf32>
    %12 = vector.shape_cast %11 : vector<1x1x128xf32> to vector<1x128xf32>
    %c0_12 = arith.constant 0 : index
    %c0_13 = arith.constant 0 : index
    %c640 = arith.constant 640 : index
    %13 = vector.load %arg7[%c0_12, %c0_13, %c640] : memref<1x1x896xf32, #tpu.memory_space<vmem>>, vector<1x1x128xf32>
    %14 = vector.shape_cast %13 : vector<1x1x128xf32> to vector<1x128xf32>
    %c0_14 = arith.constant 0 : index
    %c0_15 = arith.constant 0 : index
    %c768 = arith.constant 768 : index
    %15 = vector.load %arg7[%c0_14, %c0_15, %c768] : memref<1x1x896xf32, #tpu.memory_space<vmem>>, vector<1x1x128xf32>
    %16 = vector.shape_cast %15 : vector<1x1x128xf32> to vector<1x128xf32>
    %c0_16 = arith.constant 0 : index
    %c0_17 = arith.constant 0 : index
    %c0_18 = arith.constant 0 : index
    %17 = vector.load %arg3[%c0_16, %c0_17, %c0_18] : memref<1x128x384xf32, #tpu.memory_space<vmem>>, vector<1x128x384xf32>
    %18 = vector.shape_cast %17 : vector<1x128x384xf32> to vector<128x384xf32>
    %cst = arith.constant dense<0.000000e+00> : vector<128x384xf32>
    %19 = tpu.matmul %4, %18, %cst {dimension_numbers = #tpu.dot_dimension_numbers<[1], [0], [0], [1], [0, 0, 1, 1], [], []>} : vector<128x128xf32>, vector<128x384xf32>, vector<128x384xf32> -> vector<128x384xf32>
    %20 = vector.shape_cast %19 : vector<128x384xf32> to vector<16x8x384xf32>
    %21 = vector.extract_strided_slice %20 {offsets = [0, 0, 0], sizes = [16, 8, 32], strides = [1, 1, 1]} : vector<16x8x384xf32> to vector<16x8x32xf32>
    %22 = vector.extract_strided_slice %20 {offsets = [0, 0, 128], sizes = [16, 8, 32], strides = [1, 1, 1]} : vector<16x8x384xf32> to vector<16x8x32xf32>
    %23 = vector.extract_strided_slice %20 {offsets = [0, 0, 256], sizes = [16, 8, 8], strides = [1, 1, 1]} : vector<16x8x384xf32> to vector<16x8x8xf32>
    "tpu.trace_start"() <{level = 10 : i32, message = "bsk,btk->bst"}> : () -> ()
    %cst_19 = arith.constant dense<0.000000e+00> : vector<16x8x8xf32>
    %24 = tpu.matmul %21, %22, %cst_19 {dimension_numbers = #tpu.dot_dimension_numbers<[2], [2], [1], [1], [0, 0, 0, 1, 1, 1], [0], [0]>} : vector<16x8x32xf32>, vector<16x8x32xf32>, vector<16x8x8xf32> -> vector<16x8x8xf32>
    "tpu.trace_stop"() : () -> ()
    %cst_20 = arith.constant 0.176776692 : f32
    %25 = vector.broadcast %cst_20 : f32 to vector<16x8x8xf32>
    %26 = arith.mulf %25, %24 : vector<16x8x8xf32>
    %cst_21 = arith.constant dense<0xFF800000> : vector<16x8xf32>
    %27 = vector.multi_reduction <maximumf>, %26, %cst_21 [2] : vector<16x8x8xf32> to vector<16x8xf32>
    %28 = vector.shape_cast %27 : vector<16x8xf32> to vector<16x8x1xf32>
    %29 = vector.broadcast %28 : vector<16x8x1xf32> to vector<16x8x8xf32>
    %30 = arith.subf %26, %29 : vector<16x8x8xf32>
    %31 = math.exp %30 : vector<16x8x8xf32>
    %cst_22 = arith.constant dense<0.000000e+00> : vector<16x8xf32>
    %32 = vector.multi_reduction <add>, %31, %cst_22 [2] : vector<16x8x8xf32> to vector<16x8xf32>
    %33 = vector.shape_cast %32 : vector<16x8xf32> to vector<16x8x1xf32>
    %34 = tpu.reciprocal %33 : vector<16x8x1xf32> -> vector<16x8x1xf32>
    %35 = vector.broadcast %34 : vector<16x8x1xf32> to vector<16x8x8xf32>
    %36 = arith.mulf %31, %35 : vector<16x8x8xf32>
    "tpu.trace_start"() <{level = 10 : i32, message = "bsj,btj->bst"}> : () -> ()
    %cst_23 = arith.constant dense<0.000000e+00> : vector<16x8x8xf32>
    %37 = tpu.matmul %36, %23, %cst_23 {dimension_numbers = #tpu.dot_dimension_numbers<[2], [2], [1], [1], [0, 0, 0, 1, 1, 1], [0], [0]>} : vector<16x8x8xf32>, vector<16x8x8xf32>, vector<16x8x8xf32> -> vector<16x8x8xf32>
    "tpu.trace_stop"() : () -> ()
    %38 = vector.extract_strided_slice %20 {offsets = [0, 0, 32], sizes = [16, 8, 32], strides = [1, 1, 1]} : vector<16x8x384xf32> to vector<16x8x32xf32>
    %39 = vector.extract_strided_slice %20 {offsets = [0, 0, 160], sizes = [16, 8, 32], strides = [1, 1, 1]} : vector<16x8x384xf32> to vector<16x8x32xf32>
    %40 = vector.extract_strided_slice %20 {offsets = [0, 0, 264], sizes = [16, 8, 8], strides = [1, 1, 1]} : vector<16x8x384xf32> to vector<16x8x8xf32>
    "tpu.trace_start"() <{level = 10 : i32, message = "bsk,btk->bst"}> : () -> ()
    %cst_24 = arith.constant dense<0.000000e+00> : vector<16x8x8xf32>
    %41 = tpu.matmul %38, %39, %cst_24 {dimension_numbers = #tpu.dot_dimension_numbers<[2], [2], [1], [1], [0, 0, 0, 1, 1, 1], [0], [0]>} : vector<16x8x32xf32>, vector<16x8x32xf32>, vector<16x8x8xf32> -> vector<16x8x8xf32>
    "tpu.trace_stop"() : () -> ()
    %cst_25 = arith.constant 0.176776692 : f32
    %42 = vector.broadcast %cst_25 : f32 to vector<16x8x8xf32>
    %43 = arith.mulf %42, %41 : vector<16x8x8xf32>
    %cst_26 = arith.constant dense<0xFF800000> : vector<16x8xf32>
    %44 = vector.multi_reduction <maximumf>, %43, %cst_26 [2] : vector<16x8x8xf32> to vector<16x8xf32>
    %45 = vector.shape_cast %44 : vector<16x8xf32> to vector<16x8x1xf32>
    %46 = vector.broadcast %45 : vector<16x8x1xf32> to vector<16x8x8xf32>
    %47 = arith.subf %43, %46 : vector<16x8x8xf32>
    %48 = math.exp %47 : vector<16x8x8xf32>
    %cst_27 = arith.constant dense<0.000000e+00> : vector<16x8xf32>
    %49 = vector.multi_reduction <add>, %48, %cst_27 [2] : vector<16x8x8xf32> to vector<16x8xf32>
    %50 = vector.shape_cast %49 : vector<16x8xf32> to vector<16x8x1xf32>
    %51 = tpu.reciprocal %50 : vector<16x8x1xf32> -> vector<16x8x1xf32>
    %52 = vector.broadcast %51 : vector<16x8x1xf32> to vector<16x8x8xf32>
    %53 = arith.mulf %48, %52 : vector<16x8x8xf32>
    "tpu.trace_start"() <{level = 10 : i32, message = "bsj,btj->bst"}> : () -> ()
    %cst_28 = arith.constant dense<0.000000e+00> : vector<16x8x8xf32>
    %54 = tpu.matmul %53, %40, %cst_28 {dimension_numbers = #tpu.dot_dimension_numbers<[2], [2], [1], [1], [0, 0, 0, 1, 1, 1], [0], [0]>} : vector<16x8x8xf32>, vector<16x8x8xf32>, vector<16x8x8xf32> -> vector<16x8x8xf32>
    "tpu.trace_stop"() : () -> ()
    %55 = tpu.concatenate %37, %54 in 2 : vector<16x8x8xf32>, vector<16x8x8xf32> -> vector<16x8x16xf32>
    %56 = vector.shape_cast %55 : vector<16x8x16xf32> to vector<128x16xf32>
    %c0_29 = arith.constant 0 : index
    %c0_30 = arith.constant 0 : index
    %c0_31 = arith.constant 0 : index
    %57 = vector.load %arg4[%c0_29, %c0_30, %c0_31] : memref<1x16x128xf32, #tpu.memory_space<vmem>>, vector<1x16x128xf32>
    %58 = vector.shape_cast %57 : vector<1x16x128xf32> to vector<16x128xf32>
    %cst_32 = arith.constant dense<0.000000e+00> : vector<128x128xf32>
    %59 = tpu.matmul %56, %58, %cst_32 {dimension_numbers = #tpu.dot_dimension_numbers<[1], [0], [0], [1], [0, 0, 1, 1], [], []>} : vector<128x16xf32>, vector<16x128xf32>, vector<128x128xf32> -> vector<128x128xf32>
    %60 = arith.addf %59, %4 : vector<128x128xf32>
    %cst_33 = arith.constant dense<0.000000e+00> : vector<128xf32>
    %61 = vector.multi_reduction <add>, %60, %cst_33 [1] : vector<128x128xf32> to vector<128xf32>
    %62 = vector.shape_cast %61 : vector<128xf32> to vector<128x1xf32>
    %cst_34 = arith.constant 1.280000e+02 : f32
    %63 = vector.broadcast %cst_34 : f32 to vector<128x1xf32>
    %64 = arith.divf %62, %63 : vector<128x1xf32>
    %65 = arith.mulf %60, %60 : vector<128x128xf32>
    %cst_35 = arith.constant dense<0.000000e+00> : vector<128xf32>
    %66 = vector.multi_reduction <add>, %65, %cst_35 [1] : vector<128x128xf32> to vector<128xf32>
    %67 = vector.shape_cast %66 : vector<128xf32> to vector<128x1xf32>
    %cst_36 = arith.constant 1.280000e+02 : f32
    %68 = vector.broadcast %cst_36 : f32 to vector<128x1xf32>
    %69 = arith.divf %67, %68 : vector<128x1xf32>
    %70 = arith.mulf %64, %64 : vector<128x1xf32>
    %71 = arith.subf %69, %70 : vector<128x1xf32>
    %72 = vector.broadcast %64 : vector<128x1xf32> to vector<128x128xf32>
    %73 = arith.subf %60, %72 : vector<128x128xf32>
    %cst_37 = arith.constant 9.99999974E-6 : f32
    %74 = vector.broadcast %cst_37 : f32 to vector<128x1xf32>
    %75 = arith.addf %71, %74 : vector<128x1xf32>
    %76 = math.rsqrt %75 : vector<128x1xf32>
    %77 = vector.broadcast %76 : vector<128x1xf32> to vector<128x128xf32>
    %78 = arith.mulf %73, %77 : vector<128x128xf32>
    %79 = vector.broadcast %10 : vector<1x128xf32> to vector<128x128xf32>
    %80 = arith.mulf %78, %79 : vector<128x128xf32>
    %81 = vector.broadcast %12 : vector<1x128xf32> to vector<128x128xf32>
    %82 = arith.addf %80, %81 : vector<128x128xf32>
    %c0_38 = arith.constant 0 : index
    %c0_39 = arith.constant 0 : index
    %c0_40 = arith.constant 0 : index
    %83 = vector.load %arg5[%c0_38, %c0_39, %c0_40] : memref<1x128x256xf32, #tpu.memory_space<vmem>>, vector<1x128x256xf32>
    %84 = vector.shape_cast %83 : vector<1x128x256xf32> to vector<128x256xf32>
    %cst_41 = arith.constant dense<0.000000e+00> : vector<128x256xf32>
    %85 = tpu.matmul %82, %84, %cst_41 {dimension_numbers = #tpu.dot_dimension_numbers<[1], [0], [0], [1], [0, 0, 1, 1], [], []>} : vector<128x128xf32>, vector<128x256xf32>, vector<128x256xf32> -> vector<128x256xf32>
    %86 = vector.broadcast %6 : vector<1x256xf32> to vector<128x256xf32>
    %87 = arith.addf %85, %86 : vector<128x256xf32>
    %cst_42 = arith.constant 0.000000e+00 : f32
    %88 = vector.broadcast %cst_42 : f32 to vector<128x256xf32>
    %89 = arith.maximumf %87, %88 : vector<128x256xf32>
    %c0_43 = arith.constant 0 : index
    %c0_44 = arith.constant 0 : index
    %c0_45 = arith.constant 0 : index
    %90 = vector.load %arg6[%c0_43, %c0_44, %c0_45] : memref<1x256x128xf32, #tpu.memory_space<vmem>>, vector<1x256x128xf32>
    %91 = vector.shape_cast %90 : vector<1x256x128xf32> to vector<256x128xf32>
    %cst_46 = arith.constant dense<0.000000e+00> : vector<128x128xf32>
    %92 = tpu.matmul %89, %91, %cst_46 {dimension_numbers = #tpu.dot_dimension_numbers<[1], [0], [0], [1], [0, 0, 1, 1], [], []>} : vector<128x256xf32>, vector<256x128xf32>, vector<128x128xf32> -> vector<128x128xf32>
    %93 = vector.broadcast %8 : vector<1x128xf32> to vector<128x128xf32>
    %94 = arith.addf %92, %93 : vector<128x128xf32>
    %95 = arith.addf %94, %82 : vector<128x128xf32>
    %cst_47 = arith.constant dense<0.000000e+00> : vector<128xf32>
    %96 = vector.multi_reduction <add>, %95, %cst_47 [1] : vector<128x128xf32> to vector<128xf32>
    %97 = vector.shape_cast %96 : vector<128xf32> to vector<128x1xf32>
    %cst_48 = arith.constant 1.280000e+02 : f32
    %98 = vector.broadcast %cst_48 : f32 to vector<128x1xf32>
    %99 = arith.divf %97, %98 : vector<128x1xf32>
    %100 = arith.mulf %95, %95 : vector<128x128xf32>
    %cst_49 = arith.constant dense<0.000000e+00> : vector<128xf32>
    %101 = vector.multi_reduction <add>, %100, %cst_49 [1] : vector<128x128xf32> to vector<128xf32>
    %102 = vector.shape_cast %101 : vector<128xf32> to vector<128x1xf32>
    %cst_50 = arith.constant 1.280000e+02 : f32
    %103 = vector.broadcast %cst_50 : f32 to vector<128x1xf32>
    %104 = arith.divf %102, %103 : vector<128x1xf32>
    %105 = arith.mulf %99, %99 : vector<128x1xf32>
    %106 = arith.subf %104, %105 : vector<128x1xf32>
    %107 = vector.broadcast %99 : vector<128x1xf32> to vector<128x128xf32>
    %108 = arith.subf %95, %107 : vector<128x128xf32>
    %cst_51 = arith.constant 9.99999974E-6 : f32
    %109 = vector.broadcast %cst_51 : f32 to vector<128x1xf32>
    %110 = arith.addf %106, %109 : vector<128x1xf32>
    %111 = math.rsqrt %110 : vector<128x1xf32>
    %112 = vector.broadcast %111 : vector<128x1xf32> to vector<128x128xf32>
    %113 = arith.mulf %108, %112 : vector<128x128xf32>
    %114 = vector.broadcast %14 : vector<1x128xf32> to vector<128x128xf32>
    %115 = arith.mulf %113, %114 : vector<128x128xf32>
    %116 = vector.broadcast %16 : vector<1x128xf32> to vector<128x128xf32>
    %117 = arith.addf %115, %116 : vector<128x128xf32>
    %118 = vector.shape_cast %117 : vector<128x128xf32> to vector<16x8x128xf32>
    %c0_52 = arith.constant 0 : index
    %c0_53 = arith.constant 0 : index
    %c0_54 = arith.constant 0 : index
    %119 = vector.load %arg8[%c0_52, %c0_53, %c0_54] : memref<16x8x128xf32, #tpu.memory_space<vmem>>, vector<16x8x128xf32>
    tpu.vector_store %arg8[%c0_52, %c0_53, %c0_54], %118 {strides = array<i32>} : memref<16x8x128xf32, #tpu.memory_space<vmem>>, vector<16x8x128xf32>,
    return
  }
  func.func @transform_0(%arg0: i32, %arg1: i32) -> (i32, i32, i32) {
    %c0_i32 = arith.constant 0 : i32
    %c0_i32_0 = arith.constant 0 : i32
    %c0_i32_1 = arith.constant 0 : i32
    return %arg0, %c0_i32, %c0_i32_0 : i32, i32, i32
  }
  func.func @transform_1(%arg0: i32, %arg1: i32) -> (i32, i32, i32) {
    %c0_i32 = arith.constant 0 : i32
    %c0_i32_0 = arith.constant 0 : i32
    %c0_i32_1 = arith.constant 0 : i32
    return %arg1, %c0_i32, %c0_i32_0 : i32, i32, i32
  }
  func.func @transform_2(%arg0: i32, %arg1: i32) -> (i32, i32, i32) {
    %c0_i32 = arith.constant 0 : i32
    %c0_i32_0 = arith.constant 0 : i32
    %c0_i32_1 = arith.constant 0 : i32
    return %arg1, %c0_i32, %c0_i32_0 : i32, i32, i32
  }
  func.func @transform_3(%arg0: i32, %arg1: i32) -> (i32, i32, i32) {
    %c0_i32 = arith.constant 0 : i32
    %c0_i32_0 = arith.constant 0 : i32
    %c0_i32_1 = arith.constant 0 : i32
    return %arg1, %c0_i32, %c0_i32_0 : i32, i32, i32
  }
  func.func @transform_4(%arg0: i32, %arg1: i32) -> (i32, i32, i32) {
    %c0_i32 = arith.constant 0 : i32
    %c0_i32_0 = arith.constant 0 : i32
    %c0_i32_1 = arith.constant 0 : i32
    return %arg1, %c0_i32, %c0_i32_0 : i32, i32, i32
  }
  func.func @transform_5(%arg0: i32, %arg1: i32) -> (i32, i32, i32) {
    %c0_i32 = arith.constant 0 : i32
    %c0_i32_0 = arith.constant 0 : i32
    %c0_i32_1 = arith.constant 0 : i32
    return %arg1, %c0_i32, %c0_i32_0 : i32, i32, i32
  }
  func.func @transform_6(%arg0: i32, %arg1: i32) -> (i32, i32, i32) {
    %c0_i32 = arith.constant 0 : i32
    %c0_i32_0 = arith.constant 0 : i32
    %c0_i32_1 = arith.constant 0 : i32
    return %arg0, %c0_i32, %c0_i32_0 : i32, i32, i32
  }
}

</mosaic_0001>

<bundles_post_ra>
// kernel: tpu_custom_call.1
= control target key start
LH: loop header
LB: loop body
LE: loop exit
PB: predicated region body
PF: predicated region fallthrough
CT: control target
= control target key end

     0   :  { %s7909_s0 = inlined_call_operand.hbm [shape: f32[32,8,128], index: 0, kind: input, shape index: {}]   ;;  %s7910_s1 = inlined_call_operand.hbm [shape: f32[2,128,384], index: 1, kind: input, shape index: {}]   ;;  %s7911_s2 = inlined_call_operand.hbm [shape: f32[2,16,128], index: 2, kind: input, shape index: {}]   ;;  %s7912_s3 = inlined_call_operand.hbm [shape: f32[2,128,256], index: 3, kind: input, shape index: {}]   ;;  %s7913_s4 = inlined_call_operand.hbm [shape: f32[2,256,128], index: 4, kind: input, shape index: {}]   ;;  %s7914_s5 = inlined_call_operand.hbm [shape: f32[2,1,896], index: 5, kind: input, shape index: {}]   ;;  %s7915_s6 = inlined_call_operand.hbm [shape: f32[32,8,128], index: 6, kind: output, shape index: {}]  }
   0x1   :  { %7935 = sst [smem:[#allocation40_spill]] %s7909_s0 }
   0x2   :  { %7936 = sst [smem:[#allocation41_spill]] %s7910_s1 }
   0x3   :  { %7937 = sst [smem:[#allocation42_spill]] %s7912_s3 }
   0x4   :  { %7938 = sst [smem:[#allocation43_spill]] %s7913_s4 }
   0x5   :  { %7939 = sst [smem:[#allocation44_spill]] %s7915_s6 }
   0x6   :  { %11 = vsyncpa [#allocation3], 0 }
   0x7   :  { %13 = vsyncpa [#allocation3 + $0x1], 0 }
   0x8   :  { %14 = vsyncpa [#allocation6], 0 }
   0x9   :  { %16 = vsyncpa [#allocation6 + $0x1], 0 }
   0xa   :  { %17 = vsyncpa [#allocation9], 0 }
   0xb   :  { %19 = vsyncpa [#allocation9 + $0x1], 0 }
   0xc   :  { %20 = vsyncpa [#allocation12], 0 }
   0xd   :  { %22 = vsyncpa [#allocation12 + $0x1], 0 }
   0xe   :  { %23 = vsyncpa [#allocation4], 0 }
   0xf   :  { %25 = vsyncpa [#allocation4 + $0x1], 0  ;;  %s5795_s21 = smov 0   ;;  %s5797_s22 = smov 0  }
  0x10   :  { %s5799_s23 = smov 0   ;;  %s5801_s24 = smov 0  }
  0x11   :  { %s5803_s25 = smov 0   ;;  %s5805_s26 = smov 0  }
  0x12   :  { %s5807_s27 = smov 0   ;;  %s5809_s28 = smov 0  }
  0x13   :  { %s5811_s29 = smov 0   ;;  %s5813_s30 = smov 0  }
  0x14   :  { %s5815_s7 = smov 0  }
  0x15 LB: > { %7940 = sst [smem:[#allocation19_spill]] %s5715_s23  ;;  %p58_p0 = scmp.eq.s32.totalorder %s5747_s7, 0  ;;  %s5747_s7 = sphi %s5815_s7, %s31_s7   ;;  %s5743_s30 = sphi %s5813_s30, %s8011_s30   ;;  %s5739_s29 = sphi %s5811_s29, %s8017_s29   ;;  %s5735_s28 = sphi %s5809_s28, %s8009_s28   ;;  %s5731_s27 = sphi %s5807_s27, %s8016_s27   ;;  %s5727_s26 = sphi %s5805_s26, %s8008_s26   ;;  %s5723_s25 = sphi %s5803_s25, %s8015_s25   ;;  %s5719_s24 = sphi %s5801_s24, %s8014_s24   ;;  %s5715_s23 = sphi %s5799_s23, %s8006_s23   ;;  %s5711_s22 = sphi %s5797_s22, %s8013_s22   ;;  %s5707_s21 = sphi %s5795_s21, %s8012_s21  }
  0x16   : > { %7941 = sst [smem:[#allocation20_spill]] %s5719_s24  ;;  %p83_p1 = scmp.ne.s32.totalorder %s5715_s23, %s5711_s22 }
  0x17   : > { %7942 = sst [smem:[#allocation21_spill]] %s5727_s26  ;;  %p89_p2 = scmp.ne.s32.totalorder %s5711_s22, %s5707_s21 }
  0x18   : > { %7943 = sst [smem:[#allocation22_spill]] %s5731_s27  ;;  %p7917_p3 = scmp.lt.s32.totalorder %s5747_s7, 4 }
  0x19   : > { %7944 = sst [smem:[#allocation23_spill]] %s5735_s28  ;;  %p85_p4 = por %p83_p1, %p58_p0 }
  0x1a   : > { %7945 = sst [smem:[#allocation24_spill]] %s5743_s30  ;;  %s265_s9 = sand.u32 1, %s5747_s7  }
  0x1b   : > { %7946 = sst [smem:[#allocation25_spill]] %s5747_s7  ;;  %s5861_s10 = sand.u32 1, %s5715_s23  }
  0x1c   : > { %s5074_s11 = smul.u32 384, %s5861_s10  ;;  %p5866_p5 = pnand %p7917_p3, %p85_p4 }
  0x1d   : > { %s5075_s13 = smul.u32 384, %s5739_s29  ;;  %s7948_s1 = sld [smem:[#allocation41_spill]] }
  0x1e   : > { %s269_s17 = scalar_lea.vmem [#allocation5], %s5074_s11  ;;  %s5874_s20 = scalar_lea.sflag [#allocation6], %s265_s9 }
  0x1f   : > { %s277_s18 = sshll.u32 %s269_s17, 4  ;;  %s5749_s8 = smov 384   ;;  %s278_s18 = int_to_ptr.vmem [resolvable:$true] %s277_s18 }
  0x20   : > { %s5750_s6 = smov 24   ;;  %p4907_p6 = scmp.ge.s32.totalorder %s5747_s7, 1 }
  0x21   : > { %p370_p7 = scmp.lt.s32.totalorder %s5747_s7, 5  ;;  %s4901_s28 = sshll.u32 %s5861_s10, 8 }
  0x22   : > { %s5065_s11 = sshll.u32 %s5739_s29, 8  ;;  %s7950_s3 = sld [smem:[#allocation42_spill]] }
  0x23   : > { %s274_s16 = scalar_lea.hbm %s7948_s1, %s5075_s13  ;;  %p5882_p8 = pnand %p4907_p6, %p370_p7 }
  0x24   : > { %s275_s19 = sshll.u32 %s274_s16, 4  ;;  %s313_s13 = scalar_lea.vmem [#allocation8], %s4901_s28  ;;  %s276_s19 = int_to_ptr.hbm [resolvable:$true] %s275_s19 }
  0x25   : > { %5100 = dma.hbm_to_vmem [thread:$0]  (!%p5866_p5), %s276_s19, 6144, %s278_s18, %s5874_s20, %s5749_s8, %s5749_s8, %s5750_s6  }
  0x26   : > { %s321_s14 = sshll.u32 %s313_s13, 4  ;;  %s5890_s8 = scalar_lea.sflag [#allocation9], %s265_s9  ;;  %s322_s14 = int_to_ptr.vmem [resolvable:$true] %s321_s14 }
  0x27   : > { %s5751_s18 = smov 256   ;;  %s5752_s19 = smov 16  }
  0x28   : > { %s318_s17 = scalar_lea.hbm %s7950_s3, %s5065_s11  ;;  %s7951_s4 = sld [smem:[#allocation43_spill]] }
  0x29   : > { %s319_s6 = sshll.u32 %s318_s17, 4  ;;  %s335_s9 = scalar_lea.vmem [#allocation10], %s4901_s28  ;;  %s320_s6 = int_to_ptr.hbm [resolvable:$true] %s319_s6 }
  0x2a   : > { %5106 = dma.hbm_to_vmem [thread:$0]  (!%p5866_p5), %s320_s6, 4096, %s322_s14, %s5890_s8, %s5751_s18, %s5751_s18, %s5752_s19  }
  0x2b   : > { %s343_s1 = sshll.u32 %s335_s9, 4  ;;  %s5903_s3 = sadd.s32 4294967295, %s5747_s7   ;;  %s5900_s1 = int_to_ptr.vmem [resolvable:$true] %s343_s1 }
  0x2c   : > { %s4891_s14 = sadd.s32 4294967294, %s5747_s7   ;;  %s43_s6 = sadd.s32 1, %s5743_s30 }
  0x2d   : > { %s50_s28 = sadd.s32 1, %s5727_s26  ;;  %p57_p10 = scmp.ne.s32.totalorder %s5727_s26, %s5723_s25 }
  0x2e   : > { %s340_s16 = scalar_lea.hbm %s7951_s4, %s5065_s11  ;;  %s40_s11 = sadd.s32 1, %s5739_s29 }
  0x2f   : > { %s341_s17 = sshll.u32 %s340_s16, 4  ;;  %p41_p9 = scmp.ge.s32.totalorder %s40_s11, 2  ;;  %s5898_s17 = int_to_ptr.hbm [resolvable:$true] %s341_s17 }
  0x30   : > { %p63_p11 = scmp.ne.s32.totalorder %s5723_s25, %s5719_s24  ;;  %p5921_p12 = por %p58_p0, %p57_p10 }
  0x31   : > { %s8019_s11 = smov (%p41_p9, %s40_s11), 0  ;;  %s8021_s6 = smov (!%p41_p9, %s43_s6), %s5743_s30 }
  0x32   : > { %7952 = sst [smem:[#allocation26_spill]] %s8019_s11  ;;  %p64_p13 = scmp.eq.s32.totalorder %s5903_s3, 0 }
  0x33   : > { %p45_p1 = scmp.ge.s32.totalorder %s8021_s6, 2  ;;  %s73_s19 = ssub.s32 %s5739_s29, %s8019_s11 }
  0x34   : > { %p5931_p4 = por %p64_p13, %p63_p11  ;;  %p74_p6 = scmp.eq.s32.totalorder %s73_s19, 0 }
  0x35   : > { %s8023_s6 = smov (%p45_p1, %s8021_s6), 0  ;;  %s7957_s15 = sadd.s32 1, %s5715_s23 }
  0x36   : > { %s7954_s13 = scalar_select %p5931_p4, 1, 0 }
  0x37   : > { %7956 = sst [smem:[#allocation28_spill]] %s8023_s6  ;;  %s47_s9 = ssub.s32 %s5743_s30, %s8023_s6 }
  0x38   : > { %7955 = sst [smem:[#allocation27_spill]] %s7954_s13  ;;  %p5947_p0 = por %p89_p2, %p64_p13 }
  0x39   : > { %s5940_s16 = scalar_select %p74_p6, %s5715_s23, %s7957_s15  }
  0x3a   : > { %p48_p7 = scmp.eq.s32.totalorder %s47_s9, 0  ;;  %p217_p9 = scmp.eq.s32.totalorder %s5903_s3, 3 }
  0x3b   : > { %7958 = sst [smem:[#allocation29_spill]] %s5940_s16  ;;  %p223_p3 = scmp.eq.s32.totalorder %s4891_s14, 3 }
  0x3c   : > { %s243_s11 = sand.u32 1, %s5727_s26   ;;  %p5959_p1 = por %p217_p9, %p57_p10 }
  0x3d   : > { %s5954_s19 = scalar_select %p48_p7, %s5727_s26, %s50_s28  }
  0x3e   : > { %p5966_p2 = por %p223_p3, %p63_p11  ;;  %s4894_s15 = sshll.u32 %s243_s11, 7 }
  0x3f   : > { %7960 = sst [smem:[#allocation30_spill]] %s5954_s19  ;;  %s5063_s6 = sshll.u32 %s5743_s30, 7 }
  0x40   : > { %s7962_s21 = scalar_select %p5966_p2, 1, 0 }
  0x41   : > { %s7964_s0 = sld [smem:[#allocation40_spill]]  ;;  %s247_s23 = scalar_lea.vmem [#allocation2], %s4894_s15 }
  0x42   : > { %7963 = sst [smem:[#allocation31_spill]] %s7962_s21  ;;  %s255_s28 = sshll.u32 %s247_s23, 4  ;;  %s256_s28 = int_to_ptr.vmem [resolvable:$true] %s255_s28 }
  0x43   : > { %p7965_p3 = scmp.lt.s32.totalorder %s5747_s7, 4  ;;  %s4898_s30 = sshll.u32 %s5861_s10, 4 }
  0x44   : > { %s244_s26 = scalar_lea.sflag [#allocation3], %s243_s11  ;;  %s5753_s16 = smov 128  }
  0x45   : > { %p5095_p10 = pnand %p7965_p3, %p5921_p12  ;;  %s5064_s23 = sshll.u32 %s5739_s29, 4 }
  0x46   : > { %s5076_s11 = smul.u32 7, %s5861_s10 }
  0x47   : > { %s252_s14 = scalar_lea.hbm %s7964_s0, %s5063_s6  ;;  %s5754_s6 = smov 8  }
  0x48   : > { %s253_s19 = sshll.u32 %s252_s14, 4  ;;  %s296_s14 = scalar_lea.hbm %s7911_s2, %s5064_s23  ;;  %s254_s19 = int_to_ptr.hbm [resolvable:$true] %s253_s19 }
  0x49   : > { %5097 = dma.hbm_to_vmem [thread:$0]  (!%p5095_p10), %s254_s19, 2048, %s256_s28, %s244_s26, %s5753_s16, %s5753_s16, %s5754_s6  }
  0x4a   : > { %s291_s0 = scalar_lea.vmem [#allocation7], %s4898_s30  ;;  %s297_s24 = sshll.u32 %s296_s14, 4  ;;  %s298_s24 = int_to_ptr.hbm [resolvable:$true] %s297_s24 }
  0x4b   : > { %s299_s21 = sshll.u32 %s291_s0, 4  ;;  %s5077_s18 = smul.u32 7, %s5739_s29  ;;  %s300_s21 = int_to_ptr.vmem [resolvable:$true] %s299_s21 }
  0x4c   : > { %5103 = dma.hbm_to_vmem [thread:$0]  (!%p5866_p5), %s298_s24, 256, %s300_s21, %s5874_s20, %s5753_s16, %s5753_s16, %s5754_s6  }
  0x4d   : > { %5109 = dma.hbm_to_vmem [thread:$0]  (!%p5866_p5), %s5898_s17, 4096, %s5900_s1, %s5890_s8, %s5753_s16, %s5753_s16, %s5754_s6  }
  0x4e   : > { %s361_s19 = scalar_lea.hbm %s7914_s5, %s5077_s18  ;;  %s357_s28 = scalar_lea.vmem [#allocation11], %s5076_s11 }
  0x4f   : > { %s365_s15 = sshll.u32 %s357_s28, 4  ;;  %s363_s23 = sshll.u32 %s361_s19, 4  ;;  %s366_s15 = int_to_ptr.vmem [resolvable:$true] %s365_s15  ;;  %s364_s23 = int_to_ptr.hbm [resolvable:$true] %s363_s23 }
  0x50   : > { %s354_s30 = scalar_lea.sflag [#allocation12], %s5861_s10  ;;  %374 = sbr.rel (%p5882_p8) target bundleno = 2306 (0x902), region = 44 }
  0x51   : > { %5112 = dma.hbm_to_vmem [thread:$0]  (!%p5866_p5), %s364_s23, 112, %s366_s15, %s354_s30  }
  0x55   : > { %s6002_s1 = sand.u32 1, %s5723_s25  }
  0x56   : > { %s4908_s24 = sshll.u32 %s6002_s1, 7  ;;  %s377_s7 = scalar_lea.sflag [#allocation3], %s6002_s1 }
  0x57   : > { %s6006_s20 = scalar_lea.vmem [#allocation2], %s4908_s24 }
  0x58   : > { %5686 = dma.done.wait (%p5931_p4), %s377_s7, 2048  }
  0x59   : > { %5688 = vsyncadd (%p5931_p4), %s377_s7, 4294965248  ;;  %s386_s27 = sand.u32 1, %s5903_s3   ;;  %s388_s10 = sand.u32 1, %s5711_s22  }
  0x5a   : > { %s5078_s12 = smul.u32 384, %s388_s10  ;;  %s387_s8 = scalar_lea.sflag [#allocation6], %s386_s27 }
  0x5c   : > { %s6014_s17 = scalar_lea.vmem [#allocation5], %s5078_s12 }
  0x5d   : > { %5690 = dma.done.wait (%p5947_p0), %s387_s8, 6400  }
  0x5e   : > { %5692 = vsyncadd (%p5947_p0), %s387_s8, 4294960896  ;;  %s4909_s21 = sshll.u32 %s388_s10, 4  ;;  %s4910_s16 = sshll.u32 %s388_s10, 8 }
  0x5f   : > { %s6020_s6 = scalar_lea.vmem [#allocation7], %s4909_s21  ;;  %s407_s9 = scalar_lea.sflag [#allocation9], %s386_s27 }
  0x60   : > { %s6022_s14 = scalar_lea.vmem [#allocation8], %s4910_s16 }
  0x61   : > { %5694 = dma.done.wait (%p5947_p0), %s407_s9, 8192  }
  0x62   : > { %5696 = vsyncadd (%p5947_p0), %s407_s9, 4294959104  ;;  %s5079_s3 = smul.u32 7, %s388_s10  ;;  %s6028_s11 = scalar_lea.vmem [#allocation10], %s4910_s16 }
  0x63   : > { %s427_s18 = scalar_lea.sflag [#allocation12], %s388_s10 }
  0x64   : > { %s6030_s26 = scalar_lea.vmem [#allocation11], %s5079_s3 }
  0x65   : > { %5698 = dma.done.wait (%p5947_p0), %s427_s18, 112  }
  0x66   : > { %5700 = vsyncadd (%p5947_p0), %s427_s18, 4294967184  ;;  %s6036_s19 = scalar_lea.vmem [#allocation13], %s4908_s24  ;;  %s7967_s28 = sld [smem:[#allocation22_spill]] }
  0x6c   : > { %p4913_p5 = scmp.ne.s32.totalorder %s7967_s28, 0 }
  0x6e   : > { %490 = sbr.rel (%p4913_p5) target bundleno = 132 (0x84), region = 72 }
  0x73   : > { %v491_v0 = vld [vmem:[%s6006_s20] sm:$0xff]  ;;  %v492_v1 = vld [vmem:[%s6006_s20 + $0x8] sm:$0xff]  ;;  %v493_v2 = vld [vmem:[%s6006_s20 + $0x10] sm:$0xff] }
  0x74   : > { %507 = vst [vmem:[%s6036_s19] sm:$0xff] %v491_v0  ;;  %v494_v3 = vld [vmem:[%s6006_s20 + $0x18] sm:$0xff]  ;;  %v495_v4 = vld [vmem:[%s6006_s20 + $0x20] sm:$0xff]  ;;  %v496_v5 = vld [vmem:[%s6006_s20 + $0x28] sm:$0xff] }
  0x75   : > { %508 = vst [vmem:[%s6036_s19 + $0x8] sm:$0xff] %v492_v1  ;;  %v497_v6 = vld [vmem:[%s6006_s20 + $0x30] sm:$0xff]  ;;  %v498_v7 = vld [vmem:[%s6006_s20 + $0x38] sm:$0xff]  ;;  %v499_v8 = vld [vmem:[%s6006_s20 + $0x40] sm:$0xff] }
  0x76   : > { %509 = vst [vmem:[%s6036_s19 + $0x10] sm:$0xff] %v493_v2  ;;  %v500_v9 = vld [vmem:[%s6006_s20 + $0x48] sm:$0xff]  ;;  %v501_v10 = vld [vmem:[%s6006_s20 + $0x50] sm:$0xff]  ;;  %v502_v11 = vld [vmem:[%s6006_s20 + $0x58] sm:$0xff] }
  0x77   : > { %510 = vst [vmem:[%s6036_s19 + $0x18] sm:$0xff] %v494_v3  ;;  %v503_v12 = vld [vmem:[%s6006_s20 + $0x60] sm:$0xff]  ;;  %v504_v13 = vld [vmem:[%s6006_s20 + $0x68] sm:$0xff]  ;;  %v505_v14 = vld [vmem:[%s6006_s20 + $0x70] sm:$0xff] }
  0x78   : > { %511 = vst [vmem:[%s6036_s19 + $0x20] sm:$0xff] %v495_v4  ;;  %v506_v15 = vld [vmem:[%s6006_s20 + $0x78] sm:$0xff] }
  0x79   : > { %512 = vst [vmem:[%s6036_s19 + $0x28] sm:$0xff] %v496_v5 }
  0x7a   : > { %513 = vst [vmem:[%s6036_s19 + $0x30] sm:$0xff] %v497_v6 }
  0x7b   : > { %514 = vst [vmem:[%s6036_s19 + $0x38] sm:$0xff] %v498_v7 }
  0x7c   : > { %515 = vst [vmem:[%s6036_s19 + $0x40] sm:$0xff] %v499_v8 }
  0x7d   : > { %516 = vst [vmem:[%s6036_s19 + $0x48] sm:$0xff] %v500_v9 }
  0x7e   : > { %517 = vst [vmem:[%s6036_s19 + $0x50] sm:$0xff] %v501_v10 }
  0x7f   : > { %518 = vst [vmem:[%s6036_s19 + $0x58] sm:$0xff] %v502_v11 }
  0x80   : > { %519 = vst [vmem:[%s6036_s19 + $0x60] sm:$0xff] %v503_v12 }
  0x81   : > { %520 = vst [vmem:[%s6036_s19 + $0x68] sm:$0xff] %v504_v13 }
  0x82   : > { %521 = vst [vmem:[%s6036_s19 + $0x70] sm:$0xff] %v505_v14 }
  0x83   : > { %522 = vst [vmem:[%s6036_s19 + $0x78] sm:$0xff] %v506_v15 }
  0x84 PF: > { %v591_v16 = vld [vmem:[%s6014_s17 + $0x170] sm:$0xff]  ;;  %v588_v17 = vld [vmem:[%s6014_s17 + $0x158] sm:$0xff]  ;;  %v590_v18 = vld [vmem:[%s6014_s17 + $0x168] sm:$0xff]  ;;  %vm788_vm0 = vcmask 261120   ;;  %s5755_s4 = smov 96   ;;  %vm1221_vm1 = vcmask 64512  }
  0x85   : > { %658 = vmatpush.msra.mxu1 %v591_v16  ;;  %593 = vmatpush.msra.mxu0 %v590_v18  ;;  %v587_v19 = vld [vmem:[%s6014_s17 + $0x150] sm:$0xff]  ;;  %v585_v20 = vld [vmem:[%s6014_s17 + $0x140] sm:$0xff]  ;;  %v584_v21 = vld [vmem:[%s6014_s17 + $0x138] sm:$0xff]  ;;  %s5756_s15 = smov 120   ;;  %s5757_s23 = smov 8  }
  0x86   : > { %v582_v22 = vld [vmem:[%s6014_s17 + $0x128] sm:$0xff]  ;;  %v581_v23 = vld [vmem:[%s6014_s17 + $0x120] sm:$0xff]  ;;  %v579_v24 = vld [vmem:[%s6014_s17 + $0x110] sm:$0xff]  ;;  %s8000_s30 = sld [smem:[#allocation23_spill]]  ;;  %s4694_s10 = sshll.u32 %s6036_s19, 4  ;;  %s4695_s10 = int_to_ptr.vmem [resolvable:$true] %s4694_s10 }
  0x87   : > { %659 = vmatpush.msra.mxu1 %v588_v17  ;;  %594 = vmatpush.msra.mxu0 %v587_v19  ;;  %v578_v25 = vld [vmem:[%s6014_s17 + $0x108] sm:$0xff]  ;;  %v576_v26 = vld [vmem:[%s6014_s17 + $0xf8] sm:$0xff]  ;;  %v575_v27 = vld [vmem:[%s6014_s17 + $0xf0] sm:$0xff]  ;;  %s8001_s20 = sld [smem:[#allocation44_spill]]  ;;  %s4682_s8 = scalar_lea.sflag [#allocation4], %s6002_s1 }
  0x88   : > { %v573_v28 = vld [vmem:[%s6014_s17 + $0xe0] sm:$0xff]  ;;  %v572_v29 = vld [vmem:[%s6014_s17 + $0xd8] sm:$0xff]  ;;  %v570_v30 = vld [vmem:[%s6014_s17 + $0xc8] sm:$0xff] }
  0x89   : > { %660 = vmatpush.msra.mxu1 %v585_v20  ;;  %595 = vmatpush.msra.mxu0 %v584_v21  ;;  %v569_v31 = vld [vmem:[%s6014_s17 + $0xc0] sm:$0xff]  ;;  %v567_v32 = vld [vmem:[%s6014_s17 + $0xb0] sm:$0xff]  ;;  %v566_v33 = vld [vmem:[%s6014_s17 + $0xa8] sm:$0xff] }
  0x8a   : > { %v564_v34 = vld [vmem:[%s6014_s17 + $0x98] sm:$0xff]  ;;  %v563_v35 = vld [vmem:[%s6014_s17 + $0x90] sm:$0xff]  ;;  %v561_v36 = vld [vmem:[%s6014_s17 + $0x80] sm:$0xff] }
  0x8b   : > { %661 = vmatpush.msra.mxu1 %v582_v22  ;;  %596 = vmatpush.msra.mxu0 %v581_v23  ;;  %v560_v37 = vld [vmem:[%s6014_s17 + $0x78] sm:$0xff]  ;;  %v558_v38 = vld [vmem:[%s6014_s17 + $0x68] sm:$0xff]  ;;  %v557_v39 = vld [vmem:[%s6014_s17 + $0x60] sm:$0xff] }
  0x8c   : > { %v555_v40 = vld [vmem:[%s6014_s17 + $0x50] sm:$0xff]  ;;  %v554_v41 = vld [vmem:[%s6014_s17 + $0x48] sm:$0xff]  ;;  %v552_v42 = vld [vmem:[%s6014_s17 + $0x38] sm:$0xff]  ;;  %s5067_s0 = sshll.u32 %s8000_s30, 7 }
  0x8d   : > { %662 = vmatpush.msra.mxu1 %v579_v24  ;;  %597 = vmatpush.msra.mxu0 %v578_v25  ;;  %v551_v43 = vld [vmem:[%s6014_s17 + $0x30] sm:$0xff]  ;;  %v549_v44 = vld [vmem:[%s6014_s17 + $0x20] sm:$0xff]  ;;  %v548_v45 = vld [vmem:[%s6014_s17 + $0x18] sm:$0xff]  ;;  %s4693_s27 = scalar_lea.hbm %s8001_s20, %s5067_s0  ;;  %s5633_s9 = scalar_lea.hbm %s8001_s20, 256 }
  0x8e   : > { %v546_v46 = vld [vmem:[%s6014_s17 + $0x8] sm:$0xff]  ;;  %v545_v47 = vld [vmem:[%s6014_s17] sm:$0xff]  ;;  %v6109_v49 = vld [vmem:[%s6036_s19 + $0x8] sm:$0xff]  ;;  %s4696_s12 = sshll.u32 %s4693_s27, 4  ;;  %s4697_s12 = int_to_ptr.hbm [resolvable:$true] %s4696_s12 }
  0x8f   : > { %663 = vmatpush.msra.mxu1 %v576_v26  ;;  %598 = vmatpush.msra.mxu0 %v575_v27  ;;  %v6104_v48 = vld [vmem:[%s6036_s19] sm:$0xff]  ;;  %v6114_v50 = vld [vmem:[%s6036_s19 + $0x10] sm:$0xff]  ;;  %v6119_v51 = vld [vmem:[%s6036_s19 + $0x18] sm:$0xff] }
  0x90   : > { %v6124_v52 = vld [vmem:[%s6036_s19 + $0x20] sm:$0xff]  ;;  %v6129_v53 = vld [vmem:[%s6036_s19 + $0x28] sm:$0xff]  ;;  %v6134_v54 = vld [vmem:[%s6036_s19 + $0x30] sm:$0xff] }
  0x91   : > { %664 = vmatpush.msra.mxu1 %v573_v28  ;;  %599 = vmatpush.msra.mxu0 %v572_v29  ;;  %v6139_v55 = vld [vmem:[%s6036_s19 + $0x38] sm:$0xff]  ;;  %v6144_v56 = vld [vmem:[%s6036_s19 + $0x40] sm:$0xff]  ;;  %v6149_v57 = vld [vmem:[%s6036_s19 + $0x48] sm:$0xff] }
  0x92   : > { %v6154_v58 = vld [vmem:[%s6036_s19 + $0x50] sm:$0xff]  ;;  %v6159_v59 = vld [vmem:[%s6036_s19 + $0x58] sm:$0xff]  ;;  %v6164_v60 = vld [vmem:[%s6036_s19 + $0x60] sm:$0xff] }
  0x93   : > { %665 = vmatpush.msra.mxu1 %v570_v30  ;;  %600 = vmatpush.msra.mxu0 %v569_v31  ;;  %v6169_v61 = vld [vmem:[%s6036_s19 + $0x68] sm:$0xff]  ;;  %v6174_v62 = vld [vmem:[%s6036_s19 + $0x70] sm:$0xff]  ;;  %v6179_v63 = vld [vmem:[%s6036_s19 + $0x78] sm:$0xff] }
  0x95   : > { %666 = vmatpush.msra.mxu1 %v567_v32  ;;  %601 = vmatpush.msra.mxu0 %v566_v33 }
  0x97   : > { %667 = vmatpush.msra.mxu1 %v564_v34  ;;  %602 = vmatpush.msra.mxu0 %v563_v35 }
  0x99   : > { %668 = vmatpush.msra.mxu1 %v561_v36  ;;  %603 = vmatpush.msra.mxu0 %v560_v37 }
  0x9b   : > { %669 = vmatpush.msra.mxu1 %v558_v38  ;;  %604 = vmatpush.msra.mxu0 %v557_v39 }
  0x9d   : > { %670 = vmatpush.msra.mxu1 %v555_v40  ;;  %605 = vmatpush.msra.mxu0 %v554_v41  ;;  %v592_v41 = vld [vmem:[%s6014_s17 + $0x178] sm:$0xff] }
  0x9e   : > { %723 = vmatpush.msra.mxu2 %v592_v41  ;;  %v559_v41 = vld [vmem:[%s6014_s17 + $0x70] sm:$0xff] }
  0x9f   : > { %671 = vmatpush.msra.mxu1 %v552_v42  ;;  %606 = vmatpush.msra.mxu0 %v551_v43  ;;  %v589_v42 = vld [vmem:[%s6014_s17 + $0x160] sm:$0xff] }
  0xa0   : > { %724 = vmatpush.msra.mxu2 %v589_v42  ;;  %v556_v42 = vld [vmem:[%s6014_s17 + $0x58] sm:$0xff] }
  0xa1   : > { %672 = vmatpush.msra.mxu1 %v549_v44  ;;  %607 = vmatpush.msra.mxu0 %v548_v45  ;;  %v586_v45 = vld [vmem:[%s6014_s17 + $0x148] sm:$0xff] }
  0xa2   : > { %725 = vmatpush.msra.mxu2 %v586_v45 }
  0xa3   : > { %673 = vmatpush.msra.mxu1 %v546_v46  ;;  %608 = vmatpush.msra.mxu0 %v545_v47  ;;  %v583_v46 = vld [vmem:[%s6014_s17 + $0x130] sm:$0xff] }
  0xa4   : > { %674 = vmatmul.f32.vlgmr.msra.gmra.mxu1 %v6104_v48  ;;  %609 = vmatmul.f32.vlgmr.msra.gmra.mxu0 %v6104_v48 }
  0xa5   : > { %726 = vmatpush.msra.mxu2 %v583_v46 }
  0xac   : > { %677 = vmatmul.f32.gmra.mxu1 %v6109_v49  ;;  %612 = vmatmul.f32.gmra.mxu0 %v6109_v49 }
  0xb4   : > { %680 = vmatmul.f32.gmra.mxu1 %v6114_v50  ;;  %615 = vmatmul.f32.gmra.mxu0 %v6114_v50 }
  0xbc   : > { %683 = vmatmul.f32.gmra.mxu1 %v6119_v51  ;;  %618 = vmatmul.f32.gmra.mxu0 %v6119_v51 }
  0xc4   : > { %686 = vmatmul.f32.gmra.mxu1 %v6124_v52  ;;  %621 = vmatmul.f32.gmra.mxu0 %v6124_v52 }
  0xcc   : > { %689 = vmatmul.f32.gmra.mxu1 %v6129_v53  ;;  %624 = vmatmul.f32.gmra.mxu0 %v6129_v53 }
  0xd4   : > { %692 = vmatmul.f32.gmra.mxu1 %v6134_v54  ;;  %627 = vmatmul.f32.gmra.mxu0 %v6134_v54 }
  0xdc   : > { %695 = vmatmul.f32.gmra.mxu1 %v6139_v55  ;;  %630 = vmatmul.f32.gmra.mxu0 %v6139_v55 }
  0xe4   : > { %698 = vmatmul.f32.gmra.mxu1 %v6144_v56  ;;  %633 = vmatmul.f32.gmra.mxu0 %v6144_v56 }
  0xec   : > { %701 = vmatmul.f32.gmra.mxu1 %v6149_v57  ;;  %636 = vmatmul.f32.gmra.mxu0 %v6149_v57 }
  0xf4   : > { %704 = vmatmul.f32.gmra.mxu1 %v6154_v58  ;;  %639 = vmatmul.f32.gmra.mxu0 %v6154_v58 }
  0xfc   : > { %707 = vmatmul.f32.gmra.mxu1 %v6159_v59  ;;  %642 = vmatmul.f32.gmra.mxu0 %v6159_v59 }
 0x104   : > { %710 = vmatmul.f32.gmra.mxu1 %v6164_v60  ;;  %645 = vmatmul.f32.gmra.mxu0 %v6164_v60 }
 0x10c   : > { %713 = vmatmul.f32.gmra.mxu1 %v6169_v61  ;;  %648 = vmatmul.f32.gmra.mxu0 %v6169_v61 }
 0x114   : > { %716 = vmatmul.f32.gmra.mxu1 %v6174_v62  ;;  %651 = vmatmul.f32.gmra.mxu0 %v6174_v62 }
 0x11c   : > { %719 = vmatmul.f32.gmra.mxu1 %v6179_v63  ;;  %654 = vmatmul.f32.gmra.mxu0 %v6179_v63 }
 0x121   : > { %v675_v0 = vpop.f32.mrf.mxu1  ;;  %v610_v1 = vpop.f32.mrf.mxu0 }
 0x122   : > { %2024 = vrot.lane.b32.xlu2 %v675_v0, %s5755_s4  ;;  %4914 = vmatpush.xpose.msk.msra.mxu3 %vm788_vm0, %v675_v0  ;;  %v580_v0 = vld [vmem:[%s6014_s17 + $0x118] sm:$0xff] }
 0x123   : > { %2022 = vrot.lane.b32.xlu0 %v610_v1, %s5755_s4  ;;  %727 = vmatpush.msra.mxu2 %v580_v0  ;;  %v547_v0 = vld [vmem:[%s6014_s17 + $0x10] sm:$0xff] }
 0x125   : > { %4915 = vmatmul.msk.f32.vlgmr.msra.gmra.mxu3 %vm788_vm0, %v610_v1  ;;  %v577_v1 = vld [vmem:[%s6014_s17 + $0x100] sm:$0xff] }
 0x126   : > { %728 = vmatpush.msra.mxu2 %v577_v1 }
 0x129   : > { %v6187_v2 = vpop.f32.mrf.mxu1  ;;  %v6189_v3 = vpop.f32.mrf.mxu0 }
 0x12a   : > { %4916 = vmatpush.xpose.msk.msrb.mxu3 %vm788_vm0, %v6187_v2 }
 0x12d   : > { %4917 = vmatmul.msk.f32.vlgmr.msrb.gmra.mxu3 %vm788_vm0, %v6189_v3 }
 0x131   : > { %v681_v4 = vpop.f32.mrf.mxu1  ;;  %v616_v5 = vpop.f32.mrf.mxu0 }
 0x132   : > { %2080 = vrot.lane.b32.xlu1 %v681_v4, %s5755_s4  ;;  %4918 = vmatpush.xpose.msk.msra.mxu3 %vm788_vm0, %v681_v4 }
 0x133   : > { %2078 = vrot.lane.b32.xlu2 %v616_v5, %s5755_s4 }
 0x135   : > { %4919 = vmatmul.msk.f32.vlgmr.msra.gmra.mxu3 %vm788_vm0, %v616_v5 }
 0x139   : > { %v6199_v6 = vpop.f32.mrf.mxu1  ;;  %v6201_v7 = vpop.f32.mrf.mxu0 }
 0x13a   : > { %4920 = vmatpush.xpose.msk.msrb.mxu3 %vm788_vm0, %v6199_v6 }
 0x13d   : > { %4921 = vmatmul.msk.f32.vlgmr.msrb.gmra.mxu3 %vm788_vm0, %v6201_v7 }
 0x141   : > { %v6207_v8 = vpop.f32.mrf.mxu1  ;;  %v6209_v9 = vpop.f32.mrf.mxu0 }
 0x142   : > { %4922 = vmatpush.xpose.msk.msra.mxu3 %vm788_vm0, %v6207_v8 }
 0x145   : > { %4923 = vmatmul.msk.f32.vlgmr.msra.gmra.mxu3 %vm788_vm0, %v6209_v9 }
 0x149   : > { %v6215_v10 = vpop.f32.mrf.mxu1  ;;  %v6217_v11 = vpop.f32.mrf.mxu0 }
 0x14a   : > { %4924 = vmatpush.xpose.msk.msrb.mxu3 %vm788_vm0, %v6215_v10 }
 0x14d   : > { %4925 = vmatmul.msk.f32.vlgmr.msrb.gmra.mxu3 %vm788_vm0, %v6217_v11 }
 0x151   : > { %v6223_v12 = vpop.f32.mrf.mxu1  ;;  %v6225_v13 = vpop.f32.mrf.mxu0 }
 0x152   : > { %4926 = vmatpush.xpose.msk.msra.mxu3 %vm788_vm0, %v6223_v12 }
 0x155   : > { %4927 = vmatmul.msk.f32.vlgmr.msra.gmra.mxu3 %vm788_vm0, %v6225_v13 }
 0x159   : > { %v6231_v14 = vpop.f32.mrf.mxu1  ;;  %v6233_v15 = vpop.f32.mrf.mxu0 }
 0x15a   : > { %4928 = vmatpush.xpose.msk.msrb.mxu3 %vm788_vm0, %v6231_v14 }
 0x15d   : > { %4929 = vmatmul.msk.f32.vlgmr.msrb.gmra.mxu3 %vm788_vm0, %v6233_v15 }
 0x161   : > { %v6239_v16 = vpop.f32.mrf.mxu1  ;;  %v6241_v17 = vpop.f32.mrf.mxu0 }
 0x162   : > { %4930 = vmatpush.xpose.msk.msra.mxu3 %vm788_vm0, %v6239_v16 }
 0x165   : > { %4931 = vmatmul.msk.f32.vlgmr.msra.gmra.mxu3 %vm788_vm0, %v6241_v17 }
 0x169   : > { %v6247_v18 = vpop.f32.mrf.mxu1  ;;  %v6249_v19 = vpop.f32.mrf.mxu0 }
 0x16a   : > { %4932 = vmatpush.xpose.msk.msrb.mxu3 %vm788_vm0, %v6247_v18 }
 0x16d   : > { %4933 = vmatmul.msk.f32.vlgmr.msrb.gmra.mxu3 %vm788_vm0, %v6249_v19 }
 0x171   : > { %v6255_v20 = vpop.f32.mrf.mxu1  ;;  %v6257_v21 = vpop.f32.mrf.mxu0 }
 0x172   : > { %4934 = vmatpush.xpose.msk.msra.mxu3 %vm788_vm0, %v6255_v20 }
 0x175   : > { %4935 = vmatmul.msk.f32.vlgmr.msra.gmra.mxu3 %vm788_vm0, %v6257_v21 }
 0x179   : > { %v6263_v22 = vpop.f32.mrf.mxu1  ;;  %v6265_v23 = vpop.f32.mrf.mxu0 }
 0x17a   : > { %4936 = vmatpush.xpose.msk.msrb.mxu3 %vm788_vm0, %v6263_v22 }
 0x17d   : > { %4937 = vmatmul.msk.f32.vlgmr.msrb.gmra.mxu3 %vm788_vm0, %v6265_v23 }
 0x181   : > { %v6271_v24 = vpop.f32.mrf.mxu1  ;;  %v6273_v25 = vpop.f32.mrf.mxu0 }
 0x182   : > { %4938 = vmatpush.xpose.msk.msra.mxu3 %vm788_vm0, %v6271_v24 }
 0x185   : > { %4939 = vmatmul.msk.f32.vlgmr.msra.gmra.mxu3 %vm788_vm0, %v6273_v25 }
 0x189   : > { %v6279_v26 = vpop.f32.mrf.mxu1  ;;  %v6281_v27 = vpop.f32.mrf.mxu0 }
 0x18a   : > { %4940 = vmatpush.xpose.msk.msrb.mxu3 %vm788_vm0, %v6279_v26 }
 0x18d   : > { %4941 = vmatmul.msk.f32.vlgmr.msrb.gmra.mxu3 %vm788_vm0, %v6281_v27 }
 0x191   : > { %v6287_v28 = vpop.f32.mrf.mxu1  ;;  %v6289_v29 = vpop.f32.mrf.mxu0 }
 0x192   : > { %4942 = vmatpush.xpose.msk.msra.mxu3 %vm788_vm0, %v6287_v28 }
 0x195   : > { %4943 = vmatmul.msk.f32.vlgmr.msra.gmra.mxu3 %vm788_vm0, %v6289_v29 }
 0x199   : > { %v6295_v30 = vpop.f32.mrf.mxu1  ;;  %v6299_v31 = vpop.f32.mrf.mxu0 }
 0x19a   : > { %4944 = vmatpush.xpose.msk.msrb.mxu3 %vm788_vm0, %v6295_v30 }
 0x19d   : > { %4945 = vmatmul.msk.f32.vlgmr.msrb.gmra.mxu3 %vm788_vm0, %v6299_v31 }
 0x1a8   : > { %v812_v32 = vpop.f32.mrf.mxu3 }
 0x1a9   : > { %v6303_v33 = vmul.f32 0.17677669, %v812_v32  ;;  %v574_v32 = vld [vmem:[%s6014_s17 + $0xe8] sm:$0xff] }
 0x1aa   : > { %729 = vmatpush.msra.mxu2 %v574_v32 }
 0x1ab   : > { %v1222_v34 = vsel %vm1221_vm1, %v6303_v33, -inf }
 0x1ac   : > { %1223 = vmax.xlane.f32.xlu0 %v1222_v34  ;;  %v571_v34 = vld [vmem:[%s6014_s17 + $0xd0] sm:$0xff] }
 0x1ad   : > { %730 = vmatpush.msra.mxu2 %v571_v34 }
 0x1b0   : > { %v838_v35 = vpop.f32.mrf.mxu3 }
 0x1b1   : > { %v6307_v36 = vmul.f32 0.17677669, %v838_v35 }
 0x1b3   : > { %v1225_v37 = vsel %vm1221_vm1, %v6307_v36, -inf }
 0x1b4   : > { %1226 = vmax.xlane.f32.xlu0 %v1225_v37  ;;  %v568_v37 = vld [vmem:[%s6014_s17 + $0xb8] sm:$0xff] }
 0x1b5   : > { %731 = vmatpush.msra.mxu2 %v568_v37 }
 0x1b8   : > { %v864_v38 = vpop.f32.mrf.mxu3 }
 0x1b9   : > { %v6311_v39 = vmul.f32 0.17677669, %v864_v38  ;;  %v565_v38 = vld [vmem:[%s6014_s17 + $0xa0] sm:$0xff] }
 0x1ba   : > { %732 = vmatpush.msra.mxu2 %v565_v38 }
 0x1bb   : > { %v1228_v40 = vsel %vm1221_vm1, %v6311_v39, -inf }
 0x1bc   : > { %1229 = vmax.xlane.f32.xlu1 %v1228_v40  ;;  %v562_v40 = vld [vmem:[%s6014_s17 + $0x88] sm:$0xff] }
 0x1bd   : > { %733 = vmatpush.msra.mxu2 %v562_v40 }
 0x1bf   : > { %734 = vmatpush.msra.mxu2 %v559_v41 }
 0x1c0   : > { %v890_v43 = vpop.f32.mrf.mxu3 }
 0x1c1   : > { %v6317_v44 = vmul.f32 0.17677669, %v890_v43  ;;  %v553_v43 = vld [vmem:[%s6014_s17 + $0x40] sm:$0xff]  ;;  %735 = vmatpush.msra.mxu2 %v556_v42 }
 0x1c3   : > { %v1231_v47 = vsel %vm1221_vm1, %v6317_v44, -inf  ;;  %736 = vmatpush.msra.mxu2 %v553_v43 }
 0x1c4   : > { %1232 = vmax.xlane.f32.xlu2 %v1231_v47  ;;  %v550_v47 = vld [vmem:[%s6014_s17 + $0x28] sm:$0xff]  ;;  %s5627_s17 = sshra.s32 %s4697_s12, 4  ;;  %s5628_s17 = int_to_ptr.hbm [resolvable:$true] %s5627_s17 }
 0x1c5   : > { %737 = vmatpush.msra.mxu2 %v550_v47  ;;  %s5629_s21 = scalar_lea.hbm %s5628_s17, 128  ;;  %p5634_p13 = scmp.lt.s32.totalorder %s5628_s17, %s8001_s20 }
 0x1c6   : > { %p5630_p8 = scmp.ne.s32.totalorder %s5628_s17, %s5629_s21  ;;  %p5635_p4 = scmp.lt.s32.totalorder %s5633_s9, %s5629_s21 }
 0x1c7   : > { %738 = vmatpush.msra.mxu2 %v547_v0 }
 0x1c8   : > { %2052 = vrot.lane.b32.xlu0 %v6187_v2, %s5755_s4  ;;  %v916_v4 = vpop.f32.mrf.mxu3  ;;  %739 = vmatmul.f32.vlgmr.msra.gmra.mxu2 %v6104_v48  ;;  %p5631_p11 = pnand %p5630_p8, %p5959_p1  ;;  %p5636_p6 = por %p5635_p4, %p5634_p13 }
 0x1c9   : > { %v6327_v5 = vmul.f32 0.17677669, %v916_v4 }
 0x1ca   : > { %p5632_p12 = pneg %p5631_p11 }
 0x1cb   : > { %v1234_v35 = vsel %vm1221_vm1, %v6327_v5, -inf }
 0x1cc   : > { %1235 = vmax.xlane.f32.xlu1 %v1234_v35  ;;  %p5637_p0 = pnand %p5636_p6, %p5632_p12 }
 0x1d0   : > { %v942_v2 = vpop.f32.mrf.mxu3  ;;  %742 = vmatmul.f32.gmra.mxu2 %v6109_v49 }
 0x1d1   : > { %v6355_v40 = vmul.f32 0.17677669, %v942_v2 }
 0x1d3   : > { %v1237_v42 = vsel %vm1221_vm1, %v6355_v40, -inf }
 0x1d8   : > { %v968_v45 = vpop.f32.mrf.mxu3  ;;  %745 = vmatmul.f32.gmra.mxu2 %v6114_v50 }
 0x1d9   : > { %v6339_v46 = vmul.f32 0.17677669, %v968_v45 }
 0x1db   : > { %v1240_v1 = vsel %vm1221_vm1, %v6339_v46, -inf }
 0x1dc   : > { %1241 = vmax.xlane.f32.xlu2 %v1240_v1 }
 0x1e0   : > { %v994_v4 = vpop.f32.mrf.mxu3  ;;  %748 = vmatmul.f32.gmra.mxu2 %v6119_v51 }
 0x1e1   : > { %v6346_v32 = vmul.f32 0.17677669, %v994_v4 }
 0x1e3   : > { %v1243_v34 = vsel %vm1221_vm1, %v6346_v32, -inf }
 0x1e4   : > { %1244 = vmax.xlane.f32.xlu2 %v1243_v34 }
 0x1e8   : > { %v1020_v35 = vpop.f32.mrf.mxu3  ;;  %751 = vmatmul.f32.gmra.mxu2 %v6124_v52 }
 0x1e9   : > { %v6351_v37 = vmul.f32 0.17677669, %v1020_v35 }
 0x1eb   : > { %v1246_v38 = vsel %vm1221_vm1, %v6351_v37, -inf }
 0x1ec   : > { %1247 = vmax.xlane.f32.xlu1 %v1246_v38  ;;  %v6385_v38 = vpop.permute.xlu0 %2022 }
 0x1ed   : > { %7968 = vst [vmem:[#allocation32_spill] sm:$0xff] %v6385_v38 }
 0x1f0   : > { %v1046_v48 = vpop.f32.mrf.mxu3  ;;  %754 = vmatmul.f32.gmra.mxu2 %v6129_v53 }
 0x1f1   : > { %v6358_v41 = vmul.f32 0.17677669, %v1046_v48 }
 0x1f2   : > { %1238 = vmax.xlane.f32.xlu0 %v1237_v42 }
 0x1f3   : > { %v1249_v49 = vsel %vm1221_vm1, %v6358_v41, -inf }
 0x1f4   : > { %1250 = vmax.xlane.f32.xlu1 %v1249_v49 }
 0x1f8   : > { %v1072_v43 = vpop.f32.mrf.mxu3  ;;  %757 = vmatmul.f32.gmra.mxu2 %v6134_v54 }
 0x1f9   : > { %v6365_v45 = vmul.f32 0.17677669, %v1072_v43 }
 0x1fb   : > { %v1252_v2 = vsel %vm1221_vm1, %v6365_v45, -inf }
 0x1fc   : > { %1253 = vmax.xlane.f32.xlu0 %v1252_v2 }
 0x200   : > { %v1098_v50 = vpop.f32.mrf.mxu3  ;;  %760 = vmatmul.f32.gmra.mxu2 %v6139_v55 }
 0x201   : > { %v6370_v47 = vmul.f32 0.17677669, %v1098_v50 }
 0x203   : > { %v1255_v0 = vsel %vm1221_vm1, %v6370_v47, -inf }
 0x204   : > { %1256 = vmax.xlane.f32.xlu0 %v1255_v0  ;;  %v6398_v0 = vpop.permute.xlu2 %2024 }
 0x208   : > { %v1124_v1 = vpop.f32.mrf.mxu3  ;;  %763 = vmatmul.f32.gmra.mxu2 %v6144_v56 }
 0x209   : > { %v6375_v51 = vmul.f32 0.17677669, %v1124_v1  ;;  %v6400_v1 = vpop.permute.xlu1 %2080 }
 0x20b   : > { %v1258_v4 = vsel %vm1221_vm1, %v6375_v51, -inf }
 0x20c   : > { %1259 = vmax.xlane.f32.xlu2 %v1258_v4 }
 0x210   : > { %v1150_v34 = vpop.f32.mrf.mxu3  ;;  %766 = vmatmul.f32.gmra.mxu2 %v6149_v57 }
 0x211   : > { %v6380_v52 = vmul.f32 0.17677669, %v1150_v34 }
 0x213   : > { %v1261_v35 = vsel %vm1221_vm1, %v6380_v52, -inf }
 0x214   : > { %1262 = vmax.xlane.f32.xlu2 %v1261_v35 }
 0x218   : > { %v1176_v53 = vpop.f32.mrf.mxu3  ;;  %769 = vmatmul.f32.gmra.mxu2 %v6154_v58 }
 0x219   : > { %v6387_v48 = vmul.f32 0.17677669, %v1176_v53  ;;  %v6408_v53 = vpop.permute.xlu2 %2078 }
 0x21a   : > { %7969 = vst [vmem:[#allocation33_spill] sm:$0xff] %v6408_v53 }
 0x21b   : > { %v1264_v42 = vsel %vm1221_vm1, %v6387_v48, -inf }
 0x21c   : > { %1265 = vmax.xlane.f32.xlu1 %v1264_v42 }
 0x21f   : > { %v1224_v54 = vpop.xlane.xlu0 %1223 }
 0x220   : > { %v1270_v49 = vsub.f32 %v6303_v33, %v1224_v54  ;;  %v1202_v43 = vpop.f32.mrf.mxu3  ;;  %772 = vmatmul.f32.gmra.mxu2 %v6159_v59 }
 0x221   : > { %v6393_v2 = vmul.f32 0.17677669, %v1202_v43 }
 0x222   : > { %v1286_v50 = vmul.f32 1.442695, %v1270_v49 }
 0x223   : > { %v1267_v55 = vsel %vm1221_vm1, %v6393_v2, -inf }
 0x224   : > { %5223 = vpow2.f32 %v1286_v50  ;;  %1268 = vmax.xlane.f32.xlu0 %v1267_v55 }
 0x227   : > { %v1227_v4 = vpop.xlane.xlu0 %1226 }
 0x228   : > { %v1271_v56 = vsub.f32 %v6307_v36, %v1227_v4  ;;  %775 = vmatmul.f32.gmra.mxu2 %v6164_v60 }
 0x22a   : > { %v6403_v34 = vpop.eup %5223  ;;  %v1288_v33 = vmul.f32 1.442695, %v1271_v56 }
 0x22b   : > { %v1318_v35 = vsel %vm1221_vm1, %v6403_v34, 0.0 }
 0x22c   : > { %5225 = vpow2.f32 %v1288_v33  ;;  %1319 = vadd.xlane.f32.xlu1 %v1318_v35 }
 0x22f   : > { %v1230_v57 = vpop.xlane.xlu1 %1229 }
 0x230   : > { %v1272_v42 = vsub.f32 %v6311_v39, %v1230_v57  ;;  %778 = vmatmul.f32.gmra.mxu2 %v6169_v61 }
 0x232   : > { %v6411_v54 = vpop.eup %5225  ;;  %v1290_v49 = vmul.f32 1.442695, %v1272_v42 }
 0x233   : > { %v1321_v36 = vsel %vm1221_vm1, %v6411_v54, 0.0 }
 0x234   : > { %5227 = vpow2.f32 %v1290_v49  ;;  %1322 = vadd.xlane.f32.xlu2 %v1321_v36 }
 0x237   : > { %v1233_v43 = vpop.xlane.xlu2 %1232 }
 0x238   : > { %v1273_v50 = vsub.f32 %v6317_v44, %v1233_v43  ;;  %781 = vmatmul.f32.gmra.mxu2 %v6174_v62 }
 0x23a   : > { %v6417_v55 = vpop.eup %5227  ;;  %v1292_v58 = vmul.f32 1.442695, %v1273_v50 }
 0x23b   : > { %v1324_v4 = vsel %vm1221_vm1, %v6417_v55, 0.0 }
 0x23c   : > { %5229 = vpow2.f32 %v1292_v58  ;;  %1325 = vadd.xlane.f32.xlu0 %v1324_v4  ;;  %v6440_v58 = vpop.permute.xlu0 %2052 }
 0x23f   : > { %v1236_v39 = vpop.xlane.xlu1 %1235 }
 0x240   : > { %v1274_v56 = vsub.f32 %v6327_v5, %v1236_v39  ;;  %784 = vmatmul.f32.gmra.mxu2 %v6179_v63 }
 0x242   : > { %v6423_v33 = vpop.eup %5229  ;;  %v1294_v35 = vmul.f32 1.442695, %v1274_v56 }
 0x243   : > { %v1327_v59 = vsel %vm1221_vm1, %v6423_v33, 0.0 }
 0x244   : > { %5231 = vpow2.f32 %v1294_v35  ;;  %1328 = vadd.xlane.f32.xlu2 %v1327_v59 }
 0x24a   : > { %v6428_v44 = vpop.eup %5231 }
 0x24b   : > { %v1330_v57 = vsel %vm1221_vm1, %v6428_v44, 0.0  ;;  %v6443_v4 = vpop.f32.mrf.mxu2 }
 0x24c   : > { %1331 = vadd.xlane.f32.xlu1 %v1330_v57  ;;  %4946 = vmatpush.xpose.msk.msra.mxu3 %vm1221_vm1, %v6443_v4 }
 0x24f   : > { %v1242_v60 = vpop.xlane.xlu2 %1241 }
 0x250   : > { %v1276_v5 = vsub.f32 %v6339_v46, %v1242_v60 }
 0x252   : > { %v1298_v42 = vmul.f32 1.442695, %v1276_v5 }
 0x253   : > { %v6453_v60 = vpop.f32.mrf.mxu2 }
 0x254   : > { %5233 = vpow2.f32 %v1298_v42  ;;  %4948 = vmatpush.xpose.msk.msrb.mxu3 %vm1221_vm1, %v6453_v60 }
 0x257   : > { %v1245_v49 = vpop.xlane.xlu2 %1244 }
 0x258   : > { %v1277_v36 = vsub.f32 %v6346_v32, %v1245_v49 }
 0x25a   : > { %v6436_v43 = vpop.eup %5233  ;;  %v1300_v61 = vmul.f32 1.442695, %v1277_v36 }
 0x25b   : > { %v1336_v50 = vsel %vm1221_vm1, %v6436_v43, 0.0 }
 0x25c   : > { %5235 = vpow2.f32 %v1300_v61  ;;  %1337 = vadd.xlane.f32.xlu0 %v1336_v50 }
 0x25f   : > { %v1248_v62 = vpop.xlane.xlu1 %1247 }
 0x260   : > { %v1278_v46 = vsub.f32 %v6351_v37, %v1248_v62 }
 0x262   : > { %v6447_v63 = vpop.eup %5235  ;;  %v1302_v32 = vmul.f32 1.442695, %v1278_v46 }
 0x263   : > { %v1339_v39 = vsel %vm1221_vm1, %v6447_v63, 0.0 }
 0x264   : > { %5237 = vpow2.f32 %v1302_v32  ;;  %1340 = vadd.xlane.f32.xlu0 %v1339_v39 }
 0x265   : > { %v1239_v56 = vpop.xlane.xlu0 %1238 }
 0x266   : > { %v1275_v35 = vsub.f32 %v6355_v40, %v1239_v56 }
 0x267   : > { %v1251_v59 = vpop.xlane.xlu1 %1250 }
 0x268   : > { %v1296_v57 = vmul.f32 1.442695, %v1275_v35  ;;  %v1279_v37 = vsub.f32 %v6358_v41, %v1251_v59  ;;  %v6464_v41 = vpop.f32.mrf.mxu2 }
 0x26a   : > { %v6457_v5 = vpop.eup %5237  ;;  %5239 = vpow2.f32 %v1296_v57  ;;  %v1304_v42 = vmul.f32 1.442695, %v1279_v37 }
 0x26b   : > { %v1342_v49 = vsel %vm1221_vm1, %v6457_v5, 0.0 }
 0x26c   : > { %5241 = vpow2.f32 %v1304_v42  ;;  %1343 = vadd.xlane.f32.xlu2 %v1342_v49 }
 0x26f   : > { %v1254_v36 = vpop.xlane.xlu0 %1253 }
 0x270   : > { %v6461_v40 = vpop.eup %5239  ;;  %v1280_v61 = vsub.f32 %v6365_v45, %v1254_v36  ;;  %v6473_v35 = vpop.f32.mrf.mxu2 }
 0x271   : > { %v1333_v50 = vsel %vm1221_vm1, %v6461_v40, 0.0 }
 0x272   : > { %v6468_v62 = vpop.eup %5241  ;;  %v1306_v46 = vmul.f32 1.442695, %v1280_v61  ;;  %1334 = vadd.xlane.f32.xlu1 %v1333_v50 }
 0x273   : > { %v1345_v32 = vsel %vm1221_vm1, %v6468_v62, 0.0 }
 0x274   : > { %5243 = vpow2.f32 %v1306_v46  ;;  %1346 = vadd.xlane.f32.xlu2 %v1345_v32 }
 0x277   : > { %v1257_v39 = vpop.xlane.xlu0 %1256 }
 0x278   : > { %v1281_v56 = vsub.f32 %v6370_v47, %v1257_v39  ;;  %v6480_v49 = vpop.f32.mrf.mxu2 }
 0x279   : > { %7970 = vst [vmem:[#allocation34_spill] sm:$0xff] %v6480_v49  ;;  %4954 = vmatpush.xpose.msk.msrb.mxu0 %vm1221_vm1, %v6480_v49 }
 0x27a   : > { %v6475_v45 = vpop.eup %5243  ;;  %v1308_v59 = vmul.f32 1.442695, %v1281_v56 }
 0x27b   : > { %v1348_v57 = vsel %vm1221_vm1, %v6475_v45, 0.0 }
 0x27c   : > { %5245 = vpow2.f32 %v1308_v59  ;;  %1349 = vadd.xlane.f32.xlu1 %v1348_v57 }
 0x27f   : > { %v1260_v37 = vpop.xlane.xlu2 %1259 }
 0x280   : > { %v1282_v42 = vsub.f32 %v6375_v51, %v1260_v37  ;;  %v6493_v59 = vpop.f32.mrf.mxu2 }
 0x281   : > { %7972 = vst [vmem:[#allocation36_spill] sm:$0xff] %v6493_v59  ;;  %4956 = vmatpush.xpose.msk.msrb.mxu1 %vm1221_vm1, %v6493_v59 }
 0x282   : > { %v6484_v36 = vpop.eup %5245  ;;  %v1310_v47 = vmul.f32 1.442695, %v1282_v42 }
 0x283   : > { %v1351_v61 = vsel %vm1221_vm1, %v6484_v36, 0.0 }
 0x284   : > { %5247 = vpow2.f32 %v1310_v47  ;;  %1352 = vadd.xlane.f32.xlu1 %v1351_v61 }
 0x287   : > { %v1263_v50 = vpop.xlane.xlu2 %1262 }
 0x288   : > { %v1283_v46 = vsub.f32 %v6380_v52, %v1263_v50 }
 0x28a   : > { %v6489_v32 = vpop.eup %5247  ;;  %v1312_v39 = vmul.f32 1.442695, %v1283_v46 }
 0x28b   : > { %7971 = vst [vmem:[#allocation35_spill] sm:$0xff] %v6489_v32  ;;  %v1354_v51 = vsel %vm1221_vm1, %v6489_v32, 0.0 }
 0x28c   : > { %5249 = vpow2.f32 %v1312_v39  ;;  %1355 = vadd.xlane.f32.xlu0 %v1354_v51 }
 0x28f   : > { %v1266_v56 = vpop.xlane.xlu1 %1265 }
 0x290   : > { %v1284_v57 = vsub.f32 %v6387_v48, %v1266_v56  ;;  %v6509_v56 = vpop.f32.mrf.mxu2 }
 0x291   : > { %4958 = vmatpush.xpose.msk.msrb.mxu2 %vm1221_vm1, %v6509_v56 }
 0x292   : > { %v6498_v37 = vpop.eup %5249  ;;  %v1314_v42 = vmul.f32 1.442695, %v1284_v57 }
 0x293   : > { %7973 = vst [vmem:[#allocation37_spill] sm:$0xff] %v6498_v37  ;;  %v1357_v52 = vsel %vm1221_vm1, %v6498_v37, 0.0 }
 0x294   : > { %5251 = vpow2.f32 %v1314_v42  ;;  %1358 = vadd.xlane.f32.xlu0 %v1357_v52 }
 0x297   : > { %v1269_v47 = vpop.xlane.xlu0 %1268 }
 0x298   : > { %v1285_v61 = vsub.f32 %v6393_v2, %v1269_v47 }
 0x29a   : > { %v6503_v50 = vpop.eup %5251  ;;  %v1316_v46 = vmul.f32 1.442695, %v1285_v61  ;;  %v6517_v61 = vpop.f32.mrf.mxu2 }
 0x29b   : > { %7974 = vst [vmem:[#allocation38_spill] sm:$0xff] %v6503_v50  ;;  %v1360_v48 = vsel %vm1221_vm1, %v6503_v50, 0.0 }
 0x29c   : > { %5253 = vpow2.f32 %v1316_v46  ;;  %1361 = vadd.xlane.f32.xlu2 %v1360_v48 }
 0x29f   : > { %v1320_v39 = vpop.xlane.xlu1 %1319 }
 0x2a0   : > { %5255 = vrcp.f32 %v1320_v39  ;;  %v1377_v48 = vand.u32 2147483648, %v1320_v39  ;;  %v1375_v53 = vand.u32 2147483647, %v1320_v39  ;;  %vm1371_vm3 = vweird.f32 %v1320_v39 }
 0x2a2   : > { %v6507_v51 = vpop.eup %5253  ;;  %vm1376_vm5 = vcmp.eq.f32.partialorder %v1375_v53, 8.507059e+37  ;;  %v6522_v49 = vpop.f32.mrf.mxu2 }
 0x2a3   : > { %7975 = vst [vmem:[#allocation39_spill] sm:$0xff] %v6507_v51  ;;  %v1363_v57 = vsel %vm1221_vm1, %v6507_v51, 0.0  ;;  %4962 = vmatpush.xpose.msk.msra.mxu0 %vm1221_vm1, %v6522_v49 }
 0x2a4   : > { %1364 = vadd.xlane.f32.xlu1 %v1363_v57  ;;  %v1378_v57 = vor.u32 1.1754944e-38, %v1377_v48 }
 0x2a6   : > { %v5256_v2 = vpop.eup %5255 }
 0x2a7   : > { %v1367_v42 = vmul.f32 %v5256_v2, %v1320_v39  ;;  %v1323_v52 = vpop.xlane.xlu2 %1322  ;;  %vm1372_vm2 = vweird.f32 %v5256_v2 }
 0x2a8   : > { %5257 = vrcp.f32 %v1323_v52  ;;  %2106 = vrot.lane.b32.xlu0 %v6201_v7, %s5755_s4  ;;  %vm1373_vm4 = vmor %vm1371_vm3, %vm1372_vm2  ;;  %v1391_v39 = vand.u32 2147483648, %v1323_v52  ;;  %vm1385_vm7 = vweird.f32 %v1323_v52 }
 0x2a9   : > { %v1368_v47 = vsub.f32 1.0, %v1367_v42 }
 0x2ab   : > { %v1369_v46 = vmul.f32 %v5256_v2, %v1368_v47 }
 0x2ad   : > { %v1370_v50 = vadd.f32 %v5256_v2, %v1369_v46 }
 0x2ae   : > { %v5258_v51 = vpop.eup %5257 }
 0x2af   : > { %v1374_v38 = vsel %vm1373_vm4, %v5256_v2, %v1370_v50  ;;  %v1381_v37 = vmul.f32 %v5258_v51, %v1323_v52  ;;  %v1326_v32 = vpop.xlane.xlu0 %1325  ;;  %vm1386_vm6 = vweird.f32 %v5258_v51  ;;  %v1389_v50 = vand.u32 2147483647, %v1323_v52 }
 0x2b0   : > { %5259 = vrcp.f32 %v1326_v32  ;;  %2192 = vrot.lane.b32.xlu0 %v6223_v12, %s5755_s4  ;;  %v1379_v42 = vsel %vm1376_vm5, %v1378_v57, %v1374_v38  ;;  %vm1387_vm8 = vmor %vm1385_vm7, %vm1386_vm6  ;;  %v1405_v57 = vand.u32 2147483648, %v1326_v32  ;;  %vm1399_vm11 = vweird.f32 %v1326_v32 }
 0x2b1   : > { %v1382_v7 = vsub.f32 1.0, %v1381_v37  ;;  %v1590_v47 = vmul.f32 %v6403_v34, %v1379_v42  ;;  %v1392_v34 = vor.u32 1.1754944e-38, %v1391_v39  ;;  %vm1390_vm9 = vcmp.eq.f32.partialorder %v1389_v50, 8.507059e+37 }
 0x2b3   : > { %v1383_v59 = vmul.f32 %v5258_v51, %v1382_v7  ;;  %4947 = vmatmul.msk.f32.vlgmr.msra.gmra.mxu3 %vm1221_vm1, %v1590_v47  ;;  %v1403_v7 = vand.u32 2147483647, %v1326_v32 }
 0x2b4   : > { %2050 = vrot.lane.b32.xlu2 %v6189_v3, %s5755_s4  ;;  %4950 = vmatpush.xpose.msk.msra.mxu3 %vm1221_vm1, %v6464_v41 }
 0x2b5   : > { %v1384_v53 = vadd.f32 %v5258_v51, %v1383_v59  ;;  %v6534_v59 = vpop.f32.mrf.mxu2  ;;  %vm1404_vm13 = vcmp.eq.f32.partialorder %v1403_v7, 8.507059e+37 }
 0x2b6   : > { %v5260_v12 = vpop.eup %5259  ;;  %4964 = vmatpush.xpose.msk.msra.mxu1 %vm1221_vm1, %v6534_v59 }
 0x2b7   : > { %v1388_v38 = vsel %vm1387_vm8, %v5258_v51, %v1384_v53  ;;  %v1395_v37 = vmul.f32 %v5260_v12, %v1326_v32  ;;  %v1329_v2 = vpop.xlane.xlu2 %1328  ;;  %vm1400_vm10 = vweird.f32 %v5260_v12 }
 0x2b8   : > { %5261 = vrcp.f32 %v1329_v2  ;;  %2162 = vrot.lane.b32.xlu0 %v6217_v11, %s5755_s4  ;;  %v1393_v48 = vsel %vm1390_vm9, %v1392_v34, %v1388_v38  ;;  %vm1401_vm12 = vmor %vm1399_vm11, %vm1400_vm10  ;;  %v1419_v53 = vand.u32 2147483648, %v1329_v2  ;;  %vm1413_vm15 = vweird.f32 %v1329_v2 }
 0x2b9   : > { %v1396_v46 = vsub.f32 1.0, %v1395_v37  ;;  %v1591_v3 = vmul.f32 %v6411_v54, %v1393_v48  ;;  %v1406_v54 = vor.u32 1.1754944e-38, %v1405_v57 }
 0x2bb   : > { %v1397_v52 = vmul.f32 %v5260_v12, %v1396_v46  ;;  %4949 = vmatmul.msk.f32.vlgmr.msrb.gmra.mxu3 %vm1221_vm1, %v1591_v3 }
 0x2bc   : > { %2136 = vrot.lane.b32.xlu2 %v6207_v8, %s5755_s4  ;;  %4952 = vmatpush.xpose.msk.msrb.mxu3 %vm1221_vm1, %v6473_v35 }
 0x2bd   : > { %v1398_v51 = vadd.f32 %v5260_v12, %v1397_v52  ;;  %2108 = vrot.lane.b32.xlu1 %v6199_v6, %s5755_s4  ;;  %v6548_v38 = vpop.f32.mrf.mxu2  ;;  %v1417_v6 = vand.u32 2147483647, %v1329_v2 }
 0x2be   : > { %v5262_v11 = vpop.eup %5261  ;;  %4966 = vmatpush.xpose.msk.msra.mxu2 %vm1221_vm1, %v6548_v38 }
 0x2bf   : > { %v1402_v42 = vsel %vm1401_vm12, %v5260_v12, %v1398_v51  ;;  %v1409_v47 = vmul.f32 %v5262_v11, %v1329_v2  ;;  %v1332_v39 = vpop.xlane.xlu1 %1331  ;;  %vm1414_vm14 = vweird.f32 %v5262_v11  ;;  %vm1418_vm3 = vcmp.eq.f32.partialorder %v1417_v6, 8.507059e+37 }
 0x2c0   : > { %5263 = vrcp.f32 %v1332_v39  ;;  %2304 = vrot.lane.b32.xlu0 %v6255_v20, %s5755_s4  ;;  %v1407_v8 = vsel %vm1404_vm13, %v1406_v54, %v1402_v42  ;;  %vm1415_vm2 = vmor %vm1413_vm15, %vm1414_vm14  ;;  %v1433_v2 = vand.u32 2147483648, %v1332_v39  ;;  %v1431_v52 = vand.u32 2147483647, %v1332_v39 }
 0x2c1   : > { %v1410_v50 = vsub.f32 1.0, %v1409_v47  ;;  %v1592_v32 = vmul.f32 %v6417_v55, %v1407_v8  ;;  %v1420_v55 = vor.u32 1.1754944e-38, %v1419_v53  ;;  %vm1427_vm5 = vweird.f32 %v1332_v39 }
 0x2c2   : > { %vm1432_vm7 = vcmp.eq.f32.partialorder %v1431_v52, 8.507059e+37 }
 0x2c3   : > { %v1411_v34 = vmul.f32 %v5262_v11, %v1410_v50  ;;  %4951 = vmatmul.msk.f32.vlgmr.msra.gmra.mxu3 %vm1221_vm1, %v1592_v32 }
 0x2c4   : > { %2190 = vrot.lane.b32.xlu2 %v6225_v13, %s5755_s4  ;;  %4960 = vmatpush.xpose.msk.msra.mxu3 %vm1221_vm1, %v6517_v61 }
 0x2c5   : > { %v1412_v12 = vadd.f32 %v5262_v11, %v1411_v34  ;;  %2134 = vrot.lane.b32.xlu1 %v6209_v9, %s5755_s4  ;;  %v6562_v3 = vpop.f32.mrf.mxu2 }
 0x2c6   : > { %v5264_v20 = vpop.eup %5263 }
 0x2c7   : > { %v1416_v37 = vsel %vm1415_vm2, %v5262_v11, %v1412_v12  ;;  %v1423_v46 = vmul.f32 %v5264_v20, %v1332_v39  ;;  %vm1428_vm4 = vweird.f32 %v5264_v20 }
 0x2c8   : > { %2276 = vrot.lane.b32.xlu0 %v6247_v18, %s5755_s4  ;;  %v1421_v48 = vsel %vm1418_vm3, %v1420_v55, %v1416_v37  ;;  %vm1429_vm6 = vmor %vm1427_vm5, %vm1428_vm4 }
 0x2c9   : > { %v1424_v57 = vsub.f32 1.0, %v1423_v46  ;;  %v1593_v13 = vmul.f32 %v6423_v33, %v1421_v48  ;;  %v1434_v33 = vor.u32 1.1754944e-38, %v1433_v2 }
 0x2cb   : > { %v1425_v9 = vmul.f32 %v5264_v20, %v1424_v57  ;;  %4953 = vmatmul.msk.f32.vlgmr.msrb.gmra.mxu3 %vm1221_vm1, %v1593_v13 }
 0x2cc   : > { %2220 = vrot.lane.b32.xlu2 %v6231_v14, %s5755_s4  ;;  %4968 = vmatpush.xpose.msk.msrb.mxu3 %vm1221_vm1, %v6562_v3 }
 0x2cd   : > { %2164 = vrot.lane.b32.xlu1 %v6215_v10, %s5755_s4  ;;  %v1426_v18 = vadd.f32 %v5264_v20, %v1425_v9  ;;  %v6574_v54 = vpop.f32.mrf.mxu2 }
 0x2cf   : > { %v1338_v7 = vpop.xlane.xlu0 %1337  ;;  %v1430_v51 = vsel %vm1429_vm6, %v5264_v20, %v1426_v18 }
 0x2d0   : > { %5265 = vrcp.f32 %v1338_v7  ;;  %2332 = vrot.lane.b32.xlu0 %v6263_v22, %s5755_s4  ;;  %v1435_v11 = vsel %vm1432_vm7, %v1434_v33, %v1430_v51  ;;  %v1461_v39 = vand.u32 2147483648, %v1338_v7  ;;  %vm1455_vm9 = vweird.f32 %v1338_v7 }
 0x2d1   : > { %v1594_v14 = vmul.f32 %v6428_v44, %v1435_v11 }
 0x2d2   : > { %v1462_v32 = vor.u32 1.1754944e-38, %v1461_v39 }
 0x2d3   : > { %4955 = vmatmul.msk.f32.vlgmr.msrb.gmra.mxu0 %vm1221_vm1, %v1594_v14 }
 0x2d4   : > { %2248 = vrot.lane.b32.xlu2 %v6239_v16, %s5755_s4  ;;  %4970 = vmatpush.xpose.msk.msrb.mxu0 %vm1221_vm1, %v6574_v54  ;;  %v1459_v16 = vand.u32 2147483647, %v1338_v7 }
 0x2d5   : > { %2218 = vrot.lane.b32.xlu1 %v6233_v15, %s5755_s4  ;;  %v6585_v8 = vpop.f32.mrf.mxu2 }
 0x2d6   : > { %v5266_v10 = vpop.eup %5265  ;;  %vm1460_vm11 = vcmp.eq.f32.partialorder %v1459_v16, 8.507059e+37 }
 0x2d7   : > { %v1451_v42 = vmul.f32 %v5266_v10, %v1338_v7  ;;  %v1341_v47 = vpop.xlane.xlu0 %1340  ;;  %vm1456_vm8 = vweird.f32 %v5266_v10 }
 0x2d8   : > { %5267 = vrcp.f32 %v1341_v47  ;;  %2358 = vrot.lane.b32.xlu0 %v6273_v25, %s5755_s4  ;;  %vm1457_vm10 = vmor %vm1455_vm9, %vm1456_vm8  ;;  %v1475_v55 = vand.u32 2147483648, %v1341_v47  ;;  %v1473_v37 = vand.u32 2147483647, %v1341_v47  ;;  %vm1469_vm13 = vweird.f32 %v1341_v47 }
 0x2d9   : > { %v1452_v22 = vsub.f32 1.0, %v1451_v42 }
 0x2da   : > { %v1476_v57 = vor.u32 1.1754944e-38, %v1475_v55  ;;  %vm1474_vm15 = vcmp.eq.f32.partialorder %v1473_v37, 8.507059e+37 }
 0x2db   : > { %v1453_v44 = vmul.f32 %v5266_v10, %v1452_v22 }
 0x2dc   : > { %2246 = vrot.lane.b32.xlu2 %v6241_v17, %s5755_s4 }
 0x2dd   : > { %2302 = vrot.lane.b32.xlu1 %v6257_v21, %s5755_s4  ;;  %v1454_v15 = vadd.f32 %v5266_v10, %v1453_v44  ;;  %v6594_v21 = vpop.f32.mrf.mxu2 }
 0x2de   : > { %v5268_v50 = vpop.eup %5267 }
 0x2df   : > { %v1465_v53 = vmul.f32 %v5268_v50, %v1341_v47  ;;  %v1344_v25 = vpop.xlane.xlu2 %1343  ;;  %v1458_v34 = vsel %vm1457_vm10, %v5266_v10, %v1454_v15  ;;  %vm1470_vm12 = vweird.f32 %v5268_v50 }
 0x2e0   : > { %5269 = vrcp.f32 %v1344_v25  ;;  %2388 = vrot.lane.b32.xlu0 %v6279_v26, %s5755_s4  ;;  %v1463_v12 = vsel %vm1460_vm11, %v1462_v32, %v1458_v34  ;;  %vm1471_vm14 = vmor %vm1469_vm13, %vm1470_vm12  ;;  %v1489_v18 = vand.u32 2147483648, %v1344_v25  ;;  %v1487_v7 = vand.u32 2147483647, %v1344_v25 }
 0x2e1   : > { %v1466_v6 = vsub.f32 1.0, %v1465_v53  ;;  %v1596_v17 = vmul.f32 %v6436_v43, %v1463_v12  ;;  %vm1483_vm3 = vweird.f32 %v1344_v25 }
 0x2e2   : > { %v1490_v10 = vor.u32 1.1754944e-38, %v1489_v18  ;;  %vm1488_vm5 = vcmp.eq.f32.partialorder %v1487_v7, 8.507059e+37 }
 0x2e3   : > { %v1467_v20 = vmul.f32 %v5268_v50, %v1466_v6  ;;  %4959 = vmatmul.msk.f32.vlgmr.msrb.gmra.mxu2 %vm1221_vm1, %v1596_v17 }
 0x2e4   : > { %2330 = vrot.lane.b32.xlu2 %v6265_v23, %s5755_s4  ;;  %4974 = vmatpush.xpose.msk.msrb.mxu2 %vm1221_vm1, %v6594_v21 }
 0x2e5   : > { %v1468_v46 = vadd.f32 %v5268_v50, %v1467_v20  ;;  %v1335_v48 = vpop.xlane.xlu1 %1334  ;;  %2274 = vrot.lane.b32.xlu1 %v6249_v19, %s5755_s4 }
 0x2e6   : > { %v5270_v26 = vpop.eup %5269  ;;  %5271 = vrcp.f32 %v1335_v48  ;;  %vm1441_vm7 = vweird.f32 %v1335_v48 }
 0x2e7   : > { %v1472_v43 = vsel %vm1471_vm14, %v5268_v50, %v1468_v46  ;;  %v1479_v13 = vmul.f32 %v5270_v26, %v1344_v25  ;;  %v6603_v2 = vpop.xlane.xlu2 %1346  ;;  %vm1484_vm2 = vweird.f32 %v5270_v26 }
 0x2e8   : > { %5273 = vrcp.f32 %v6603_v2  ;;  %2442 = vrot.lane.b32.xlu0 %v6299_v31, %s5755_s4  ;;  %v1477_v9 = vsel %vm1474_vm15, %v1476_v57, %v1472_v43  ;;  %vm6614_vm4 = vmor %vm1483_vm3, %vm1484_vm2  ;;  %v1503_v34 = vand.u32 2147483648, %v6603_v2  ;;  %vm1497_vm11 = vweird.f32 %v6603_v2 }
 0x2e9   : > { %v1480_v23 = vsub.f32 1.0, %v1479_v13  ;;  %v1597_v19 = vmul.f32 %v6447_v63, %v1477_v9  ;;  %v1501_v12 = vand.u32 2147483647, %v6603_v2 }
 0x2ea   : > { %v1504_v55 = vor.u32 1.1754944e-38, %v1503_v34 }
 0x2eb   : > { %v1481_v52 = vmul.f32 %v5270_v26, %v1480_v23  ;;  %4961 = vmatmul.msk.f32.vlgmr.msra.gmra.mxu3 %vm1221_vm1, %v1597_v19  ;;  %vm1502_vm13 = vcmp.eq.f32.partialorder %v1501_v12, 8.507059e+37 }
 0x2ec   : > { %v5272_v33 = vpop.eup %5271  ;;  %2416 = vrot.lane.b32.xlu2 %v6287_v28, %s5755_s4  ;;  %v1447_v28 = vand.u32 2147483648, %v1335_v48 }
 0x2ed   : > { %v1482_v51 = vadd.f32 %v5270_v26, %v1481_v52  ;;  %v1437_v11 = vmul.f32 %v5272_v33, %v1335_v48  ;;  %2360 = vrot.lane.b32.xlu1 %v6271_v24, %s5755_s4  ;;  %v1445_v24 = vand.u32 2147483647, %v1335_v48  ;;  %vm1442_vm6 = vweird.f32 %v5272_v33 }
 0x2ee   : > { %v5274_v31 = vpop.eup %5273  ;;  %vm1443_vm8 = vmor %vm1441_vm7, %vm1442_vm6  ;;  %v1448_v53 = vor.u32 1.1754944e-38, %v1447_v28 }
 0x2ef   : > { %v1486_v63 = vsel %vm6614_vm4, %v5270_v26, %v1482_v51  ;;  %v1438_v42 = vsub.f32 1.0, %v1437_v11  ;;  %v1493_v47 = vmul.f32 %v5274_v31, %v6603_v2  ;;  %v1350_v22 = vpop.xlane.xlu1 %1349  ;;  %vm1498_vm9 = vweird.f32 %v5274_v31  ;;  %v6656_v11 = vpop.f32.mrf.mxu2 }
 0x2f0   : > { %5275 = vrcp.f32 %v1350_v22  ;;  %2870 = vrot.lane.b32.xlu0 %v6443_v4, %s5756_s15  ;;  %v1491_v16 = vsel %vm1488_vm5, %v1490_v10, %v1486_v63  ;;  %vm1446_vm10 = vcmp.eq.f32.partialorder %v1445_v24, 8.507059e+37  ;;  %vm1499_vm12 = vmor %vm1497_vm11, %vm1498_vm9  ;;  %v1517_v46 = vand.u32 2147483648, %v1350_v22  ;;  %4976 = vmatpush.xpose.msk.msra.mxu3 %vm1221_vm1, %v6656_v11  ;;  %v7978_v10 = vld [vmem:[#allocation36_spill] sm:$0xff] }
 0x2f1   : > { %v1439_v44 = vmul.f32 %v5272_v33, %v1438_v42  ;;  %v1494_v39 = vsub.f32 1.0, %v1493_v47  ;;  %v1598_v15 = vmul.f32 %v6457_v5, %v1491_v16  ;;  %v1515_v48 = vand.u32 2147483647, %v1350_v22  ;;  %v7979_v47 = vld [vmem:[#allocation34_spill] sm:$0xff] }
 0x2f2   : > { %vm1511_vm15 = vweird.f32 %v1350_v22  ;;  %v1518_v57 = vor.u32 1.1754944e-38, %v1517_v46 }
 0x2f3   : > { %v1495_v50 = vmul.f32 %v5274_v31, %v1494_v39  ;;  %v1440_v32 = vadd.f32 %v5272_v33, %v1439_v44  ;;  %4963 = vmatmul.msk.f32.vlgmr.msra.gmra.mxu0 %vm1221_vm1, %v1598_v15  ;;  %vm1516_vm3 = vcmp.eq.f32.partialorder %v1515_v48, 8.507059e+37  ;;  %v7980_v15 = vld [vmem:[#allocation35_spill] sm:$0xff] }
 0x2f4   : > { %2386 = vrot.lane.b32.xlu2 %v6281_v27, %s5755_s4  ;;  %4978 = vmatpush.xpose.msk.msra.mxu0 %vm788_vm0, %v6398_v0 }
 0x2f5   : > { %v1496_v25 = vadd.f32 %v5274_v31, %v1495_v50  ;;  %2414 = vrot.lane.b32.xlu1 %v6289_v29, %s5755_s4  ;;  %v1444_v4 = vsel %vm1443_vm8, %v5272_v33, %v1440_v32 }
 0x2f6   : > { %v5276_v5 = vpop.eup %5275  ;;  %v1449_v6 = vsel %vm1446_vm10, %v1448_v53, %v1444_v4 }
 0x2f7   : > { %v1507_v17 = vmul.f32 %v5276_v5, %v1350_v22  ;;  %v1353_v27 = vpop.xlane.xlu1 %1352  ;;  %v1595_v20 = vmul.f32 %v6461_v40, %v1449_v6  ;;  %v1500_v29 = vsel %vm1499_vm12, %v5274_v31, %v1496_v25  ;;  %vm1512_vm14 = vweird.f32 %v5276_v5 }
 0x2f8   : > { %5277 = vrcp.f32 %v1353_v27  ;;  %3032 = vrot.lane.b32.xlu0 %v6509_v56, %s5756_s15  ;;  %v1505_v40 = vsel %vm1502_vm13, %v1504_v55, %v1500_v29  ;;  %vm1513_vm2 = vmor %vm1511_vm15, %vm1512_vm14  ;;  %v1531_v52 = vand.u32 2147483648, %v1353_v27  ;;  %v1529_v18 = vand.u32 2147483647, %v1353_v27 }
 0x2f9   : > { %v1508_v0 = vsub.f32 1.0, %v1507_v17  ;;  %4957 = vmatmul.msk.f32.vlgmr.msrb.gmra.mxu1 %vm1221_vm1, %v1595_v20  ;;  %v1599_v23 = vmul.f32 %v6468_v62, %v1505_v40  ;;  %vm1525_vm5 = vweird.f32 %v1353_v27 }
 0x2fa   : > { %4972 = vmatpush.xpose.msk.msrb.mxu1 %vm1221_vm1, %v6585_v8  ;;  %v1532_v33 = vor.u32 1.1754944e-38, %v1531_v52  ;;  %vm1530_vm7 = vcmp.eq.f32.partialorder %v1529_v18, 8.507059e+37 }
 0x2fb   : > { %v1509_v37 = vmul.f32 %v5276_v5, %v1508_v0 }
 0x2fc   : > { %2897 = vrot.lane.b32.xlu2 %v6453_v60, %s5756_s15 }
 0x2fd   : > { %v1510_v26 = vadd.f32 %v5276_v5, %v1509_v37  ;;  %2444 = vrot.lane.b32.xlu1 %v6295_v30, %s5755_s4  ;;  %v7981_v37 = vld [vmem:[#allocation37_spill] sm:$0xff] }
 0x2fe   : > { %v5278_v56 = vpop.eup %5277 }
 0x2ff   : > { %v1514_v43 = vsel %vm1513_vm2, %v5276_v5, %v1510_v26  ;;  %v1521_v13 = vmul.f32 %v5278_v56, %v1353_v27  ;;  %v1356_v2 = vpop.xlane.xlu0 %1355  ;;  %vm1526_vm4 = vweird.f32 %v5278_v56 }
 0x300   : > { %5279 = vrcp.f32 %v1356_v2  ;;  %v1519_v60 = vsel %vm1516_vm3, %v1518_v57, %v1514_v43  ;;  %vm1527_vm6 = vmor %vm1525_vm5, %vm1526_vm4  ;;  %v1543_v63 = vand.u32 2147483647, %v1356_v2  ;;  %vm1539_vm9 = vweird.f32 %v1356_v2 }
 0x301   : > { %v1522_v9 = vsub.f32 1.0, %v1521_v13  ;;  %4965 = vmatmul.msk.f32.vlgmr.msra.gmra.mxu1 %vm1221_vm1, %v1599_v23  ;;  %v1600_v19 = vmul.f32 %v6475_v45, %v1519_v60 }
 0x302   : > { %4980 = vmatpush.xpose.msk.msra.mxu1 %vm788_vm0, %v6440_v58  ;;  %vm1544_vm11 = vcmp.eq.f32.partialorder %v1543_v63, 8.507059e+37 }
 0x303   : > { %v1523_v30 = vmul.f32 %v5278_v56, %v1522_v9  ;;  %4967 = vmatmul.msk.f32.vlgmr.msra.gmra.mxu2 %vm1221_vm1, %v1600_v19  ;;  %v7983_v9 = vld [vmem:[#allocation38_spill] sm:$0xff] }
 0x304   : > { %2951 = vrot.lane.b32.xlu2 %v6473_v35, %s5756_s15  ;;  %4982 = vmatpush.xpose.msk.msra.mxu2 %vm788_vm0, %v6400_v1 }
 0x305   : > { %v1524_v62 = vadd.f32 %v5278_v56, %v1523_v30  ;;  %2924 = vrot.lane.b32.xlu1 %v6464_v41, %s5756_s15  ;;  %v1545_v41 = vand.u32 2147483648, %v1356_v2 }
 0x306   : > { %v5280_v58 = vpop.eup %5279 }
 0x307   : > { %v1528_v45 = vsel %vm1527_vm6, %v5278_v56, %v1524_v62  ;;  %v1535_v7 = vmul.f32 %v5280_v58, %v1356_v2  ;;  %v1359_v51 = vpop.xlane.xlu0 %1358  ;;  %vm1540_vm8 = vweird.f32 %v5280_v58  ;;  %v1546_v24 = vor.u32 1.1754944e-38, %v1545_v41 }
 0x308   : > { %5281 = vrcp.f32 %v1359_v51  ;;  %v1533_v31 = vsel %vm1530_vm7, %v1532_v33, %v1528_v45  ;;  %vm1541_vm10 = vmor %vm1539_vm9, %vm1540_vm8  ;;  %v1559_v53 = vand.u32 2147483648, %v1359_v51  ;;  %v1557_v25 = vand.u32 2147483647, %v1359_v51 }
 0x309   : > { %v1536_v35 = vsub.f32 1.0, %v1535_v7  ;;  %v1601_v1 = vmul.f32 %v6484_v36, %v1533_v31  ;;  %vm1553_vm13 = vweird.f32 %v1359_v51 }
 0x30a   : > { %v1560_v6 = vor.u32 1.1754944e-38, %v1559_v53  ;;  %vm1558_vm15 = vcmp.eq.f32.partialorder %v1557_v25, 8.507059e+37 }
 0x30b   : > { %v1537_v14 = vmul.f32 %v5280_v58, %v1536_v35  ;;  %4969 = vmatmul.msk.f32.vlgmr.msrb.gmra.mxu3 %vm1221_vm1, %v1601_v1  ;;  %v7985_v1 = vld [vmem:[#allocation33_spill] sm:$0xff] }
 0x30c   : > { %3005 = vrot.lane.b32.xlu2 %v7978_v10, %s5756_s15 }
 0x30d   : > { %v1538_v42 = vadd.f32 %v5280_v58, %v1537_v14  ;;  %2978 = vrot.lane.b32.xlu1 %v7979_v47, %s5756_s15 }
 0x30e   : > { %v5282_v22 = vpop.eup %5281 }
 0x30f   : > { %v1542_v28 = vsel %vm1541_vm10, %v5280_v58, %v1538_v42  ;;  %v1549_v44 = vmul.f32 %v5282_v22, %v1359_v51  ;;  %v1362_v36 = vpop.xlane.xlu2 %1361  ;;  %vm1554_vm12 = vweird.f32 %v5282_v22  ;;  %v7984_v51 = vld [vmem:[#allocation39_spill] sm:$0xff] }
 0x310   : > { %5283 = vrcp.f32 %v1362_v36  ;;  %v1547_v16 = vsel %vm1544_vm11, %v1546_v24, %v1542_v28  ;;  %vm1555_vm14 = vmor %vm1553_vm13, %vm1554_vm12  ;;  %v1573_v0 = vand.u32 2147483648, %v1362_v36  ;;  %v1571_v48 = vand.u32 2147483647, %v1362_v36 }
 0x311   : > { %v1550_v39 = vsub.f32 1.0, %v1549_v44  ;;  %v1602_v50 = vmul.f32 %v7980_v15, %v1547_v16  ;;  %vm1567_vm3 = vweird.f32 %v1362_v36 }
 0x312   : > { %v1574_v56 = vor.u32 1.1754944e-38, %v1573_v0  ;;  %vm1572_vm5 = vcmp.eq.f32.partialorder %v1571_v48, 8.507059e+37 }
 0x313   : > { %v1551_v32 = vmul.f32 %v5282_v22, %v1550_v39  ;;  %4971 = vmatmul.msk.f32.vlgmr.msrb.gmra.mxu0 %vm1221_vm1, %v1602_v50 }
 0x314   : > { %3059 = vrot.lane.b32.xlu2 %v6517_v61, %s5756_s15 }
 0x315   : > { %v1552_v4 = vadd.f32 %v5282_v22, %v1551_v32  ;;  %3086 = vrot.lane.b32.xlu1 %v6522_v49, %s5756_s15  ;;  %v7982_v49 = vld [vmem:[#allocation32_spill] sm:$0xff] }
 0x316   : > { %v5284_v5 = vpop.eup %5283 }
 0x317   : > { %v1556_v34 = vsel %vm1555_vm14, %v5282_v22, %v1552_v4  ;;  %v1563_v12 = vmul.f32 %v5284_v5, %v1362_v36  ;;  %v2051_v17 = vpop.permute.xlu2 %2050  ;;  %v1365_v27 = vpop.xlane.xlu1 %1364  ;;  %vm1568_vm2 = vweird.f32 %v5284_v5 }
 0x318   : > { %5285 = vrcp.f32 %v1365_v27  ;;  %v1561_v29 = vsel %vm1558_vm15, %v1560_v6, %v1556_v34  ;;  %vm1569_vm4 = vmor %vm1567_vm3, %vm1568_vm2  ;;  %v1587_v19 = vand.u32 2147483648, %v1365_v27  ;;  %v1585_v18 = vand.u32 2147483647, %v1365_v27 }
 0x319   : > { %v1564_v20 = vsub.f32 1.0, %v1563_v12  ;;  %v1603_v61 = vmul.f32 %v7981_v37, %v1561_v29  ;;  %vm1581_vm7 = vweird.f32 %v1365_v27 }
 0x31a   : > { %v2107_v55 = vpop.permute.xlu0 %2106  ;;  %v1588_v58 = vor.u32 1.1754944e-38, %v1587_v19  ;;  %vm1586_vm9 = vcmp.eq.f32.partialorder %v1585_v18, 8.507059e+37 }
 0x31b   : > { %v1565_v46 = vmul.f32 %v5284_v5, %v1564_v20  ;;  %4973 = vmatmul.msk.f32.vlgmr.msrb.gmra.mxu1 %vm1221_vm1, %v1603_v61  ;;  %4979 = vmatmul.msk.f32.vlgmr.msra.gmra.mxu0 %vm788_vm0, %v7982_v49 }
 0x31d   : > { %v1566_v40 = vadd.f32 %v5284_v5, %v1565_v46 }
 0x31e   : > { %v5286_v26 = vpop.eup %5285 }
 0x31f   : > { %v1570_v43 = vsel %vm1569_vm4, %v5284_v5, %v1566_v40  ;;  %v1577_v57 = vmul.f32 %v5286_v26, %v1365_v27  ;;  %v2137_v13 = vpop.permute.xlu2 %2136  ;;  %vm1582_vm6 = vweird.f32 %v5286_v26 }
 0x320   : > { %4986 = vmatpush.xpose.msk.msrb.mxu0 %vm788_vm0, %v2137_v13  ;;  %v1575_v2 = vsel %vm1572_vm5, %v1574_v56, %v1570_v43  ;;  %vm1583_vm8 = vmor %vm1581_vm7, %vm1582_vm6 }
 0x321   : > { %v1578_v23 = vsub.f32 1.0, %v1577_v57  ;;  %v1604_v60 = vmul.f32 %v7983_v9, %v1575_v2 }
 0x322   : > { %v2193_v30 = vpop.permute.xlu0 %2192 }
 0x323   : > { %v1579_v52 = vmul.f32 %v5286_v26, %v1578_v23  ;;  %4975 = vmatmul.msk.f32.vlgmr.msrb.gmra.mxu2 %vm1221_vm1, %v1604_v60  ;;  %4981 = vmatmul.msk.f32.vlgmr.msra.gmra.mxu1 %vm788_vm0, %v2051_v17 }
 0x324   : > { %4990 = vmatpush.xpose.msk.msrb.mxu2 %vm788_vm0, %v2193_v30 }
 0x325   : > { %v1580_v62 = vadd.f32 %v5286_v26, %v1579_v52 }
 0x327   : > { %v1584_v45 = vsel %vm1583_vm8, %v5286_v26, %v1580_v62  ;;  %v2191_v33 = vpop.permute.xlu2 %2190 }
 0x328   : > { %v1589_v7 = vsel %vm1586_vm9, %v1588_v58, %v1584_v45 }
 0x329   : > { %v1605_v35 = vmul.f32 %v7984_v51, %v1589_v7 }
 0x32a   : > { %v2163_v31 = vpop.permute.xlu0 %2162 }
 0x32b   : > { %4977 = vmatmul.msk.f32.vlgmr.msra.gmra.mxu3 %vm1221_vm1, %v1605_v35  ;;  %4983 = vmatmul.msk.f32.vlgmr.msra.gmra.mxu2 %vm788_vm0, %v7985_v1 }
 0x32f   : > { %v2221_v14 = vpop.permute.xlu2 %2220  ;;  %v2109_v41 = vpop.permute.xlu1 %2108 }
 0x330   : > { %4984 = vmatpush.xpose.msk.msrb.mxu3 %vm788_vm0, %v2109_v41 }
 0x332   : > { %v2305_v63 = vpop.permute.xlu0 %2304 }
 0x333   : > { %4985 = vmatmul.msk.f32.vlgmr.msrb.gmra.mxu3 %vm788_vm0, %v2107_v55  ;;  %4991 = vmatmul.msk.f32.vlgmr.msrb.gmra.mxu2 %vm788_vm0, %v2191_v33 }
 0x334   : > { %4992 = vmatpush.xpose.msk.msra.mxu3 %vm788_vm0, %v2221_v14  ;;  %4998 = vmatpush.xpose.msk.msra.mxu2 %vm788_vm0, %v2305_v63 }
 0x336   : > { %v6729_v56 = vpop.f32.mrf.mxu3 }
 0x337   : > { %v2249_v10 = vpop.permute.xlu2 %2248  ;;  %v2135_v42 = vpop.permute.xlu1 %2134 }
 0x338   : > { %4994 = vmatpush.xpose.msk.msra.mxu0 %vm788_vm0, %v2249_v10 }
 0x339   : > { %4987 = vmatmul.msk.f32.vlgmr.msrb.gmra.mxu0 %vm788_vm0, %v2135_v42 }
 0x33a   : > { %v2277_v47 = vpop.permute.xlu0 %2276 }
 0x33e   : > { %v6737_v23 = vpop.f32.mrf.mxu3 }
 0x33f   : > { %v2247_v22 = vpop.permute.xlu2 %2246  ;;  %v2165_v28 = vpop.permute.xlu1 %2164 }
 0x340   : > { %4988 = vmatpush.xpose.msk.msrb.mxu1 %vm788_vm0, %v2165_v28 }
 0x341   : > { %4995 = vmatmul.msk.f32.vlgmr.msra.gmra.mxu0 %vm788_vm0, %v2247_v22 }
 0x342   : > { %v2333_v24 = vpop.permute.xlu0 %2332 }
 0x343   : > { %5000 = vmatpush.xpose.msk.msrb.mxu3 %vm788_vm0, %v2333_v24  ;;  %4989 = vmatmul.msk.f32.vlgmr.msrb.gmra.mxu1 %vm788_vm0, %v2163_v31 }
 0x344   : > { %4996 = vmatpush.xpose.msk.msra.mxu1 %vm788_vm0, %v2277_v47 }
 0x346   : > { %v6741_v60 = vpop.f32.mrf.mxu3 }
 0x347   : > { %v2331_v44 = vpop.permute.xlu2 %2330  ;;  %v2219_v36 = vpop.permute.xlu1 %2218 }
 0x348   : > { %4993 = vmatmul.msk.f32.vlgmr.msra.gmra.mxu3 %vm788_vm0, %v2219_v36 }
 0x34a   : > { %v2359_v39 = vpop.permute.xlu0 %2358 }
 0x34e   : > { %v6747_v18 = vpop.f32.mrf.mxu3 }
 0x34f   : > { %v2417_v16 = vpop.permute.xlu2 %2416  ;;  %v2303_v15 = vpop.permute.xlu1 %2302 }
 0x350   : > { %5006 = vmatpush.xpose.msk.msrb.mxu2 %vm788_vm0, %v2417_v16  ;;  %5001 = vmatmul.msk.f32.vlgmr.msrb.gmra.mxu3 %vm788_vm0, %v2331_v44  ;;  %v6716_v37 = vpop.f32.mrf.mxu0 }
 0x351   : > { %4999 = vmatmul.msk.f32.vlgmr.msra.gmra.mxu2 %vm788_vm0, %v2303_v15 }
 0x352   : > { %v2389_v50 = vpop.permute.xlu0 %2388 }
 0x353   : > { %5004 = vmatpush.xpose.msk.msrb.mxu1 %vm788_vm0, %v2389_v50 }
 0x357   : > { %v2387_v32 = vpop.permute.xlu2 %2386  ;;  %v2275_v53 = vpop.permute.xlu1 %2274 }
 0x358   : > { %4997 = vmatmul.msk.f32.vlgmr.msra.gmra.mxu1 %vm788_vm0, %v2275_v53 }
 0x35a   : > { %v2443_v25 = vpop.permute.xlu0 %2442 }
 0x35f   : > { %v2898_v4 = vpop.permute.xlu2 %2897  ;;  %v2361_v5 = vpop.permute.xlu1 %2360 }
 0x360   : > { %5012 = vmatpush.xpose.msk.msra.mxu1 %vm1221_vm1, %v2898_v4  ;;  %5002 = vmatpush.xpose.msk.msrb.mxu0 %vm788_vm0, %v2361_v5 }
 0x361   : > { %5005 = vmatmul.msk.f32.vlgmr.msrb.gmra.mxu1 %vm788_vm0, %v2387_v32 }
 0x362   : > { %v2871_v34 = vpop.permute.xlu0 %2870 }
 0x363   : > { %5003 = vmatmul.msk.f32.vlgmr.msrb.gmra.mxu0 %vm788_vm0, %v2359_v39 }
 0x364   : > { %5010 = vmatpush.xpose.msk.msra.mxu0 %vm1221_vm1, %v2871_v34 }
 0x366   : > { %v6743_v19 = vpop.f32.mrf.mxu2 }
 0x367   : > { %v2952_v6 = vpop.permute.xlu2 %2951  ;;  %v2415_v12 = vpop.permute.xlu1 %2414 }
 0x368   : > { %5007 = vmatmul.msk.f32.vlgmr.msrb.gmra.mxu2 %vm788_vm0, %v2415_v12 }
 0x36a   : > { %v3033_v0 = vpop.permute.xlu0 %3032 }
 0x36e   : > { %v6753_v45 = vpop.f32.mrf.mxu3 }
 0x36f   : > { %v3006_v17 = vpop.permute.xlu2 %3005  ;;  %v2445_v27 = vpop.permute.xlu1 %2444 }
 0x370   : > { %5020 = vmatpush.xpose.msk.msrb.mxu1 %vm1221_vm1, %v3006_v17  ;;  %5008 = vmatpush.xpose.msk.msra.mxu3 %vm788_vm0, %v2445_v27  ;;  %v6721_v46 = vpop.f32.mrf.mxu0 }
 0x373   : > { %5009 = vmatmul.msk.f32.vlgmr.msra.gmra.mxu3 %vm788_vm0, %v2443_v25 }
 0x374   : > { %5016 = vmatpush.xpose.msk.msrb.mxu3 %vm1221_vm1, %v2952_v6 }
 0x376   : > { %v6719_v61 = vpop.f32.mrf.mxu1 }
 0x377   : > { %v3060_v20 = vpop.permute.xlu2 %3059  ;;  %v2925_v29 = vpop.permute.xlu1 %2924 }
 0x378   : > { %5024 = vmatpush.xpose.msk.msra.mxu3 %vm1221_vm1, %v3060_v20  ;;  %5014 = vmatpush.xpose.msk.msra.mxu2 %vm1221_vm1, %v2925_v29 }
 0x37c   : > { %5022 = vmatpush.xpose.msk.msrb.mxu2 %vm1221_vm1, %v3033_v0 }
 0x37e   : > { %v6723_v48 = vpop.f32.mrf.mxu1 }
 0x37f   : > { %v2979_v55 = vpop.permute.xlu1 %2978 }
 0x380   : > { %5018 = vmatpush.xpose.msk.msrb.mxu0 %vm1221_vm1, %v2979_v55 }
 0x386   : > { %v6751_v58 = vpop.f32.mrf.mxu2 }
 0x38e   : > { %v6761_v1 = vpop.f32.mrf.mxu3 }
 0x390   : > { %v6725_v49 = vpop.f32.mrf.mxu0 }
 0x398   : > { %v6727_v40 = vpop.f32.mrf.mxu1  ;;  %v2047_v26 = vpop.f32.mrf.mxu0 }
 0x399   : > { %v6731_v43 = vmul.f32 0.17677669, %v2047_v26 }
 0x39b   : > { %v2486_v57 = vsel %vm1221_vm1, %v6731_v43, -inf }
 0x39c   : > { %2487 = vmax.xlane.f32.xlu2 %v2486_v57 }
 0x3a0   : > { %v2075_v13 = vpop.f32.mrf.mxu1 }
 0x3a1   : > { %v6735_v2 = vmul.f32 0.17677669, %v2075_v13 }
 0x3a3   : > { %v2489_v9 = vsel %vm1221_vm1, %v6735_v2, -inf }
 0x3a4   : > { %2490 = vmax.xlane.f32.xlu1 %v2489_v9 }
 0x3a6   : > { %v6757_v51 = vpop.f32.mrf.mxu2 }
 0x3ae   : > { %v2103_v63 = vpop.f32.mrf.mxu2  ;;  %v6767_v10 = vpop.f32.mrf.mxu3 }
 0x3af   : > { %v6769_v42 = vmul.f32 0.17677669, %v2103_v63 }
 0x3b1   : > { %v2492_v47 = vsel %vm1221_vm1, %v6769_v42, -inf }
 0x3b6   : > { %v2159_v30 = vpop.f32.mrf.mxu0  ;;  %v2131_v44 = vpop.f32.mrf.mxu3 }
 0x3b7   : > { %v6745_v52 = vmul.f32 0.17677669, %v2159_v30  ;;  %v2215_v36 = vpop.f32.mrf.mxu2  ;;  %v6777_v39 = vmul.f32 0.17677669, %v2131_v44 }
 0x3b8   : > { %v6789_v34 = vmul.f32 0.17677669, %v2215_v36 }
 0x3b9   : > { %v2498_v62 = vsel %vm1221_vm1, %v6745_v52, -inf  ;;  %v2495_v32 = vsel %vm1221_vm1, %v6777_v39, -inf }
 0x3ba   : > { %2499 = vmax.xlane.f32.xlu1 %v2498_v62  ;;  %v2504_v17 = vsel %vm1221_vm1, %v6789_v34, -inf }
 0x3be   : > { %v2271_v31 = vpop.f32.mrf.mxu0 }
 0x3bf   : > { %v6763_v14 = vmul.f32 0.17677669, %v2271_v31 }
 0x3c0   : > { %v2187_v33 = vpop.f32.mrf.mxu1 }
 0x3c1   : > { %v6755_v7 = vmul.f32 0.17677669, %v2187_v33  ;;  %v2510_v41 = vsel %vm1221_vm1, %v6763_v14, -inf }
 0x3c3   : > { %v2501_v35 = vsel %vm1221_vm1, %v6755_v7, -inf }
 0x3c4   : > { %2502 = vmax.xlane.f32.xlu0 %v2501_v35  ;;  %v6813_v35 = vpop.permute.xlu1 %3086 }
 0x3cb   : > { %v2243_v6 = vpop.f32.mrf.mxu3 }
 0x3cc   : > { %2511 = vmax.xlane.f32.xlu0 %v2510_v41  ;;  %v6791_v12 = vmul.f32 0.17677669, %v2243_v6 }
 0x3ce   : > { %v2507_v20 = vsel %vm1221_vm1, %v6791_v12, -inf }
 0x3d3   : > { %v2355_v0 = vpop.f32.mrf.mxu3 }
 0x3d4   : > { %2493 = vmax.xlane.f32.xlu0 %v2492_v47  ;;  %v2327_v4 = vpop.f32.mrf.mxu2  ;;  %v6805_v9 = vmul.f32 0.17677669, %v2355_v0 }
 0x3d5   : > { %v2299_v22 = vpop.f32.mrf.mxu1  ;;  %v6801_v26 = vmul.f32 0.17677669, %v2327_v4 }
 0x3d6   : > { %v6773_v28 = vmul.f32 0.17677669, %v2299_v22  ;;  %v2519_v33 = vsel %vm1221_vm1, %v6805_v9, -inf }
 0x3d7   : > { %v2516_v57 = vsel %vm1221_vm1, %v6801_v26, -inf }
 0x3d8   : > { %v2513_v24 = vsel %vm1221_vm1, %v6773_v28, -inf }
 0x3d9   : > { %2514 = vmax.xlane.f32.xlu2 %v2513_v24 }
 0x3de   : > { %v2411_v16 = vpop.f32.mrf.mxu1 }
 0x3df   : > { %v6779_v15 = vmul.f32 0.17677669, %v2411_v16 }
 0x3e0   : > { %v2383_v50 = vpop.f32.mrf.mxu0 }
 0x3e1   : > { %v2525_v53 = vsel %vm1221_vm1, %v6779_v15, -inf  ;;  %v6785_v25 = vmul.f32 0.17677669, %v2383_v50  ;;  %2496 = vmax.xlane.f32.xlu2 %v2495_v32 }
 0x3e2   : > { %2526 = vmax.xlane.f32.xlu0 %v2525_v53 }
 0x3e3   : > { %v2522_v5 = vsel %vm1221_vm1, %v6785_v25, -inf }
 0x3e4   : > { %2523 = vmax.xlane.f32.xlu1 %v2522_v5 }
 0x3e9   : > { %2505 = vmax.xlane.f32.xlu2 %v2504_v17 }
 0x3eb   : > { %v2439_v27 = vpop.f32.mrf.mxu2 }
 0x3ec   : > { %v6797_v29 = vmul.f32 0.17677669, %v2439_v27  ;;  %2508 = vmax.xlane.f32.xlu1 %v2507_v20 }
 0x3ee   : > { %v2528_v55 = vsel %vm1221_vm1, %v6797_v29, -inf }
 0x3ef   : > { %2529 = vmax.xlane.f32.xlu0 %v2528_v55 }
 0x3f4   : > { %2517 = vmax.xlane.f32.xlu1 %v2516_v57 }
 0x3f6   : > { %v2467_v13 = vpop.f32.mrf.mxu3 }
 0x3f7   : > { %v6807_v30 = vmul.f32 0.17677669, %v2467_v13 }
 0x3f9   : > { %v2531_v62 = vsel %vm1221_vm1, %v6807_v30, -inf }
 0x3fa   : > { %2532 = vmax.xlane.f32.xlu0 %v2531_v62 }
 0x3fc   : > { %2520 = vmax.xlane.f32.xlu1 %v2519_v33 }
 0x40f   : > { %v2488_v31 = vpop.xlane.xlu2 %2487 }
 0x410   : > { %v2534_v41 = vsub.f32 %v6731_v43, %v2488_v31 }
 0x412   : > { %v2550_v63 = vmul.f32 1.442695, %v2534_v41 }
 0x414   : > { %5287 = vpow2.f32 %v2550_v63 }
 0x417   : > { %v2491_v47 = vpop.xlane.xlu1 %2490 }
 0x418   : > { %v2535_v22 = vsub.f32 %v6735_v2, %v2491_v47 }
 0x41a   : > { %v6817_v24 = vpop.eup %5287  ;;  %v2552_v44 = vmul.f32 1.442695, %v2535_v22 }
 0x41b   : > { %v2582_v36 = vsel %vm1221_vm1, %v6817_v24, 0.0 }
 0x41c   : > { %5289 = vpow2.f32 %v2552_v44  ;;  %2583 = vadd.xlane.f32.xlu0 %v2582_v36 }
 0x422   : > { %v6821_v16 = vpop.eup %5289 }
 0x423   : > { %v2585_v50 = vsel %vm1221_vm1, %v6821_v16, 0.0 }
 0x424   : > { %2586 = vadd.xlane.f32.xlu2 %v2585_v50 }
 0x42d   : > { %v2500_v43 = vpop.xlane.xlu1 %2499 }
 0x42e   : > { %v2538_v32 = vsub.f32 %v6745_v52, %v2500_v43 }
 0x430   : > { %v2558_v53 = vmul.f32 1.442695, %v2538_v32 }
 0x432   : > { %5291 = vpow2.f32 %v2558_v53 }
 0x437   : > { %v2503_v4 = vpop.xlane.xlu0 %2502 }
 0x438   : > { %v6826_v2 = vpop.eup %5291  ;;  %v2539_v5 = vsub.f32 %v6755_v7, %v2503_v4 }
 0x439   : > { %v2594_v6 = vsel %vm1221_vm1, %v6826_v2, 0.0 }
 0x43a   : > { %2595 = vadd.xlane.f32.xlu0 %v2594_v6  ;;  %v2560_v17 = vmul.f32 1.442695, %v2539_v5 }
 0x43c   : > { %5293 = vpow2.f32 %v2560_v17 }
 0x43f   : > { %v2512_v27 = vpop.xlane.xlu0 %2511 }
 0x440   : > { %v2542_v20 = vsub.f32 %v6763_v14, %v2512_v27 }
 0x442   : > { %v6832_v0 = vpop.eup %5293  ;;  %v2566_v55 = vmul.f32 1.442695, %v2542_v20 }
 0x443   : > { %v2597_v52 = vsel %vm1221_vm1, %v6832_v0, 0.0 }
 0x444   : > { %5295 = vpow2.f32 %v2566_v55  ;;  %2598 = vadd.xlane.f32.xlu2 %v2597_v52 }
 0x447   : > { %v2494_v57 = vpop.xlane.xlu0 %2493 }
 0x448   : > { %v2536_v7 = vsub.f32 %v6769_v42, %v2494_v57 }
 0x44a   : > { %v6837_v13 = vpop.eup %5295  ;;  %v2554_v62 = vmul.f32 1.442695, %v2536_v7 }
 0x44b   : > { %v2606_v33 = vsel %vm1221_vm1, %v6837_v13, 0.0 }
 0x44c   : > { %5297 = vpow2.f32 %v2554_v62  ;;  %v2515_v31 = vpop.xlane.xlu2 %2514  ;;  %2607 = vadd.xlane.f32.xlu1 %v2606_v33 }
 0x44d   : > { %v2543_v14 = vsub.f32 %v6773_v28, %v2515_v31 }
 0x44f   : > { %v2568_v41 = vmul.f32 1.442695, %v2543_v14 }
 0x451   : > { %5299 = vpow2.f32 %v2568_v41 }
 0x452   : > { %v6842_v63 = vpop.eup %5297 }
 0x453   : > { %v2588_v47 = vsel %vm1221_vm1, %v6842_v63, 0.0 }
 0x454   : > { %v2497_v22 = vpop.xlane.xlu2 %2496  ;;  %2589 = vadd.xlane.f32.xlu1 %v2588_v47 }
 0x455   : > { %v2537_v42 = vsub.f32 %v6777_v39, %v2497_v22 }
 0x457   : > { %v6847_v44 = vpop.eup %5299  ;;  %v2556_v36 = vmul.f32 1.442695, %v2537_v42  ;;  %v2524_v50 = vpop.xlane.xlu1 %2523 }
 0x458   : > { %v2609_v43 = vsel %vm1221_vm1, %v6847_v44, 0.0 }
 0x459   : > { %5301 = vpow2.f32 %v2556_v36  ;;  %2610 = vadd.xlane.f32.xlu0 %v2609_v43 }
 0x45c   : > { %v2506_v28 = vpop.xlane.xlu2 %2505 }
 0x45d   : > { %v2540_v32 = vsub.f32 %v6789_v34, %v2506_v28 }
 0x45f   : > { %v6852_v53 = vpop.eup %5301  ;;  %v2562_v4 = vmul.f32 1.442695, %v2540_v32  ;;  %v2509_v5 = vpop.xlane.xlu1 %2508 }
 0x460   : > { %v2541_v6 = vsub.f32 %v6791_v12, %v2509_v5  ;;  %v2591_v39 = vsel %vm1221_vm1, %v6852_v53, 0.0  ;;  %v2527_v12 = vpop.xlane.xlu0 %2526 }
 0x461   : > { %5303 = vpow2.f32 %v2562_v4  ;;  %2592 = vadd.xlane.f32.xlu2 %v2591_v39  ;;  %v2547_v7 = vsub.f32 %v6779_v15, %v2527_v12 }
 0x462   : > { %v2564_v17 = vmul.f32 1.442695, %v2541_v6 }
 0x463   : > { %v2576_v33 = vmul.f32 1.442695, %v2547_v7 }
 0x464   : > { %5305 = vpow2.f32 %v2564_v17 }
 0x465   : > { %5307 = vpow2.f32 %v2576_v33 }
 0x467   : > { %v6857_v27 = vpop.eup %5303  ;;  %v2518_v57 = vpop.xlane.xlu1 %2517 }
 0x468   : > { %v2600_v20 = vsel %vm1221_vm1, %v6857_v27, 0.0  ;;  %v6869_v52 = vpop.xlane.xlu0 %2529  ;;  %v2544_v5 = vsub.f32 %v6801_v26, %v2518_v57 }
 0x469   : > { %2601 = vadd.xlane.f32.xlu0 %v2600_v20  ;;  %v2548_v33 = vsub.f32 %v6797_v29, %v6869_v52 }
 0x46a   : > { %v6861_v34 = vpop.eup %5305  ;;  %v2570_v20 = vmul.f32 1.442695, %v2544_v5 }
 0x46b   : > { %v2603_v55 = vsel %vm1221_vm1, %v6861_v34, 0.0  ;;  %v6875_v47 = vpop.eup %5307  ;;  %v2578_v52 = vmul.f32 1.442695, %v2548_v33 }
 0x46c   : > { %2604 = vadd.xlane.f32.xlu2 %v2603_v55 }
 0x46d   : > { %3167 = vrot.lane.b32.xlu1 %v6562_v3, %s5756_s15 }
 0x46f   : > { %v2521_v31 = vpop.xlane.xlu1 %2520 }
 0x470   : > { %v2533_v62 = vpop.xlane.xlu0 %2532  ;;  %v2545_v14 = vsub.f32 %v6805_v9, %v2521_v31 }
 0x471   : > { %v2549_v22 = vsub.f32 %v6807_v30, %v2533_v62 }
 0x472   : > { %v2572_v3 = vmul.f32 1.442695, %v2545_v14 }
 0x473   : > { %v2580_v9 = vmul.f32 1.442695, %v2549_v22 }
 0x47d   : > { %3113 = vrot.lane.b32.xlu0 %v6534_v59, %s5756_s15  ;;  %v2546_v59 = vsub.f32 %v6785_v25, %v2524_v50 }
 0x47f   : > { %v2574_v43 = vmul.f32 1.442695, %v2546_v59 }
 0x484   : > { %3140 = vrot.lane.b32.xlu2 %v6548_v38, %s5756_s15  ;;  %v2621_v38 = vsel %vm1221_vm1, %v6875_v47, 0.0 }
 0x48f   : > { %v2584_v41 = vpop.xlane.xlu0 %2583 }
 0x490   : > { %5309 = vrcp.f32 %v2584_v41  ;;  %v2641_v32 = vand.u32 2147483648, %v2584_v41  ;;  %v2639_v30 = vand.u32 2147483647, %v2584_v41  ;;  %vm2635_vm10 = vweird.f32 %v2584_v41 }
 0x491   : > { %5311 = vpow2.f32 %v2572_v3 }
 0x492   : > { %v2642_v39 = vor.u32 1.1754944e-38, %v2641_v32  ;;  %vm2640_vm12 = vcmp.eq.f32.partialorder %v2639_v30, 8.507059e+37 }
 0x496   : > { %v5310_v42 = vpop.eup %5309 }
 0x497   : > { %v2631_v15 = vmul.f32 %v5310_v42, %v2584_v41  ;;  %v2587_v36 = vpop.xlane.xlu2 %2586  ;;  %2622 = vadd.xlane.f32.xlu1 %v2621_v38  ;;  %v6881_v4 = vpop.eup %5311  ;;  %vm2636_vm0 = vweird.f32 %v5310_v42 }
 0x498   : > { %5313 = vrcp.f32 %v2587_v36  ;;  %vm2637_vm11 = vmor %vm2635_vm10, %vm2636_vm0  ;;  %v2615_v17 = vsel %vm1221_vm1, %v6881_v4, 0.0  ;;  %v2655_v31 = vand.u32 2147483648, %v2587_v36  ;;  %v2653_v3 = vand.u32 2147483647, %v2587_v36 }
 0x499   : > { %v2632_v28 = vsub.f32 1.0, %v2631_v15  ;;  %5315 = vpow2.f32 %v2574_v43  ;;  %vm2649_vm14 = vweird.f32 %v2587_v36 }
 0x49a   : > { %5317 = vpow2.f32 %v2580_v9  ;;  %vm2654_vm2 = vcmp.eq.f32.partialorder %v2653_v3, 8.507059e+37 }
 0x49b   : > { %v2633_v25 = vmul.f32 %v5310_v42, %v2632_v28  ;;  %5319 = vpow2.f32 %v2570_v20 }
 0x49c   : > { %5321 = vpow2.f32 %v2578_v52 }
 0x49d   : > { %v2634_v50 = vadd.f32 %v5310_v42, %v2633_v25 }
 0x49e   : > { %v5314_v6 = vpop.eup %5313 }
 0x49f   : > { %v2638_v55 = vsel %vm2637_vm11, %v5310_v42, %v2634_v50  ;;  %v2645_v12 = vmul.f32 %v5314_v6, %v2587_v36  ;;  %2616 = vadd.xlane.f32.xlu1 %v2615_v17  ;;  %v6887_v62 = vpop.eup %5315  ;;  %vm2650_vm13 = vweird.f32 %v5314_v6 }
 0x4a0   : > { %v2643_v7 = vsel %vm2640_vm12, %v2642_v39, %v2638_v55  ;;  %v6891_v14 = vpop.eup %5317  ;;  %vm2651_vm15 = vmor %vm2649_vm14, %vm2650_vm13  ;;  %v2618_v22 = vsel %vm1221_vm1, %v6887_v62, 0.0 }
 0x4a1   : > { %v2646_v26 = vsub.f32 1.0, %v2645_v12  ;;  %v2854_v57 = vmul.f32 %v6817_v24, %v2643_v7  ;;  %v2656_v24 = vor.u32 1.1754944e-38, %v2655_v31  ;;  %v2627_v29 = vsel %vm1221_vm1, %v6891_v14, 0.0  ;;  %v6900_v15 = vpop.eup %5319 }
 0x4a2   : > { %v2612_v43 = vsel %vm1221_vm1, %v6900_v15, 0.0  ;;  %v6906_v9 = vpop.eup %5321 }
 0x4a3   : > { %v2647_v41 = vmul.f32 %v5314_v6, %v2646_v26  ;;  %5011 = vmatmul.msk.f32.vlgmr.msra.gmra.mxu0 %vm1221_vm1, %v2854_v57  ;;  %v2624_v5 = vsel %vm1221_vm1, %v6906_v9, 0.0 }
 0x4a4   : > { %5026 = vmatpush.xpose.msk.msra.mxu0 %vm1221_vm1, %v6813_v35 }
 0x4a5   : > { %v2648_v59 = vadd.f32 %v5314_v6, %v2647_v41 }
 0x4a7   : > { %v2652_v42 = vsel %vm2651_vm15, %v5314_v6, %v2648_v59  ;;  %2619 = vadd.xlane.f32.xlu0 %v2618_v22  ;;  %2628 = vadd.xlane.f32.xlu1 %v2627_v29 }
 0x4a8   : > { %v2657_v38 = vsel %vm2654_vm2, %v2656_v24, %v2652_v42 }
 0x4a9   : > { %v2855_v35 = vmul.f32 %v6821_v16, %v2657_v38 }
 0x4ab   : > { %5013 = vmatmul.msk.f32.vlgmr.msra.gmra.mxu1 %vm1221_vm1, %v2855_v35 }
 0x4ad   : > { %v2596_v36 = vpop.xlane.xlu0 %2595  ;;  %2613 = vadd.xlane.f32.xlu2 %v2612_v43 }
 0x4ae   : > { %5323 = vrcp.f32 %v2596_v36  ;;  %v2697_v30 = vand.u32 2147483648, %v2596_v36  ;;  %v2695_v6 = vand.u32 2147483647, %v2596_v36  ;;  %vm2691_vm4 = vweird.f32 %v2596_v36 }
 0x4b0   : > { %v2698_v17 = vor.u32 1.1754944e-38, %v2697_v30  ;;  %vm2696_vm6 = vcmp.eq.f32.partialorder %v2695_v6, 8.507059e+37 }
 0x4b4   : > { %v5324_v28 = vpop.eup %5323 }
 0x4b5   : > { %v2687_v32 = vmul.f32 %v5324_v28, %v2596_v36  ;;  %2625 = vadd.xlane.f32.xlu2 %v2624_v5  ;;  %vm2692_vm3 = vweird.f32 %v5324_v28 }
 0x4b6   : > { %vm2693_vm5 = vmor %vm2691_vm4, %vm2692_vm3 }
 0x4b7   : > { %v2688_v25 = vsub.f32 1.0, %v2687_v32  ;;  %v2599_v16 = vpop.xlane.xlu2 %2598 }
 0x4b8   : > { %5325 = vrcp.f32 %v2599_v16  ;;  %v2711_v31 = vand.u32 2147483648, %v2599_v16  ;;  %v2709_v3 = vand.u32 2147483647, %v2599_v16  ;;  %vm2705_vm8 = vweird.f32 %v2599_v16 }
 0x4b9   : > { %v2689_v50 = vmul.f32 %v5324_v28, %v2688_v25 }
 0x4ba   : > { %vm2710_vm0 = vcmp.eq.f32.partialorder %v2709_v3, 8.507059e+37 }
 0x4bb   : > { %v2690_v39 = vadd.f32 %v5324_v28, %v2689_v50  ;;  %3194 = vrot.lane.b32.xlu0 %v6574_v54, %s5756_s15 }
 0x4bd   : > { %v2694_v20 = vsel %vm2693_vm5, %v5324_v28, %v2690_v39 }
 0x4be   : > { %v2699_v55 = vsel %vm2696_vm6, %v2698_v17, %v2694_v20  ;;  %v5326_v12 = vpop.eup %5325 }
 0x4bf   : > { %v2858_v7 = vmul.f32 %v6826_v2, %v2699_v55  ;;  %v2701_v26 = vmul.f32 %v5326_v12, %v2599_v16  ;;  %v2608_v57 = vpop.xlane.xlu1 %2607  ;;  %vm2706_vm7 = vweird.f32 %v5326_v12  ;;  %v2712_v2 = vor.u32 1.1754944e-38, %v2711_v31 }
 0x4c0   : > { %5327 = vrcp.f32 %v2608_v57  ;;  %3275 = vrot.lane.b32.xlu1 %v6656_v11, %s5756_s15  ;;  %vm2707_vm9 = vmor %vm2705_vm8, %vm2706_vm7  ;;  %v2753_v38 = vand.u32 2147483648, %v2608_v57  ;;  %v2751_v36 = vand.u32 2147483647, %v2608_v57  ;;  %vm2747_vm11 = vweird.f32 %v2608_v57 }
 0x4c1   : > { %5019 = vmatmul.msk.f32.vlgmr.msrb.gmra.mxu0 %vm1221_vm1, %v2858_v7  ;;  %v2702_v33 = vsub.f32 1.0, %v2701_v26 }
 0x4c2   : > { %v2754_v28 = vor.u32 1.1754944e-38, %v2753_v38  ;;  %vm2752_vm13 = vcmp.eq.f32.partialorder %v2751_v36, 8.507059e+37 }
 0x4c3   : > { %v2703_v41 = vmul.f32 %v5326_v12, %v2702_v33  ;;  %3248 = vrot.lane.b32.xlu0 %v6594_v21, %s5756_s15 }
 0x4c5   : > { %v2704_v54 = vadd.f32 %v5326_v12, %v2703_v41 }
 0x4c6   : > { %v5328_v59 = vpop.eup %5327 }
 0x4c7   : > { %v2708_v24 = vsel %vm2707_vm9, %v5326_v12, %v2704_v54  ;;  %v2743_v22 = vmul.f32 %v5328_v59, %v2608_v57  ;;  %v2590_v29 = vpop.xlane.xlu1 %2589  ;;  %vm2748_vm10 = vweird.f32 %v5328_v59 }
 0x4c8   : > { %v2713_v11 = vsel %vm2710_vm0, %v2712_v2, %v2708_v24  ;;  %5329 = vrcp.f32 %v2590_v29  ;;  %vm2749_vm12 = vmor %vm2747_vm11, %vm2748_vm10  ;;  %v2669_v50 = vand.u32 2147483648, %v2590_v29  ;;  %v2667_v39 = vand.u32 2147483647, %v2590_v29 }
 0x4c9   : > { %v2859_v52 = vmul.f32 %v6832_v0, %v2713_v11  ;;  %v2744_v42 = vsub.f32 1.0, %v2743_v22  ;;  %vm2663_vm15 = vweird.f32 %v2590_v29 }
 0x4ca   : > { %v2670_v20 = vor.u32 1.1754944e-38, %v2669_v50  ;;  %vm2668_vm3 = vcmp.eq.f32.partialorder %v2667_v39, 8.507059e+37 }
 0x4cb   : > { %v2745_v35 = vmul.f32 %v5328_v59, %v2744_v42  ;;  %5021 = vmatmul.msk.f32.vlgmr.msrb.gmra.mxu1 %vm1221_vm1, %v2859_v52 }
 0x4cc   : > { %v6922_v32 = vpop.xlane.xlu0 %2610 }
 0x4cd   : > { %v2746_v21 = vadd.f32 %v5328_v59, %v2745_v35  ;;  %3221 = vrot.lane.b32.xlu2 %v6585_v8, %s5756_s15  ;;  %5331 = vrcp.f32 %v6922_v32  ;;  %vm2761_vm9 = vweird.f32 %v6922_v32 }
 0x4ce   : > { %v5330_v43 = vpop.eup %5329 }
 0x4cf   : > { %v2750_v5 = vsel %vm2749_vm12, %v5328_v59, %v2746_v21  ;;  %v2659_v0 = vmul.f32 %v5330_v43, %v2590_v29  ;;  %vm2664_vm14 = vweird.f32 %v5330_v43 }
 0x4d0   : > { %v2755_v25 = vsel %vm2752_vm13, %v2754_v28, %v2750_v5  ;;  %vm2665_vm2 = vmor %vm2663_vm15, %vm2664_vm14 }
 0x4d1   : > { %v2862_v30 = vmul.f32 %v6837_v13, %v2755_v25  ;;  %v2660_v16 = vsub.f32 1.0, %v2659_v0  ;;  %v2767_v25 = vand.u32 2147483648, %v6922_v32 }
 0x4d3   : > { %v2661_v6 = vmul.f32 %v5330_v43, %v2660_v16  ;;  %5027 = vmatmul.msk.f32.vlgmr.msra.gmra.mxu0 %vm1221_vm1, %v2862_v30  ;;  %v6927_v55 = vpop.eup %5331 }
 0x4d4   : > { %v2593_v8 = vpop.xlane.xlu2 %2592  ;;  %v2757_v26 = vmul.f32 %v6927_v55, %v6922_v32  ;;  %vm2762_vm8 = vweird.f32 %v6927_v55 }
 0x4d5   : > { %v2662_v17 = vadd.f32 %v5330_v43, %v2661_v6  ;;  %5333 = vrcp.f32 %v2593_v8  ;;  %v2683_v54 = vand.u32 2147483648, %v2593_v8  ;;  %v2681_v24 = vand.u32 2147483647, %v2593_v8  ;;  %vm6941_vm10 = vmor %vm2761_vm9, %vm2762_vm8 }
 0x4d6   : > { %v2758_v41 = vsub.f32 1.0, %v2757_v26  ;;  %vm2677_vm5 = vweird.f32 %v2593_v8  ;;  %v2768_v26 = vor.u32 1.1754944e-38, %v2767_v25 }
 0x4d7   : > { %v2666_v12 = vsel %vm2665_vm2, %v5330_v43, %v2662_v17  ;;  %v2684_v11 = vor.u32 1.1754944e-38, %v2683_v54  ;;  %vm2682_vm7 = vcmp.eq.f32.partialorder %v2681_v24, 8.507059e+37 }
 0x4d8   : > { %v2671_v13 = vsel %vm2668_vm3, %v2670_v20, %v2666_v12  ;;  %v2759_v22 = vmul.f32 %v6927_v55, %v2758_v41 }
 0x4d9   : > { %v2856_v7 = vmul.f32 %v6842_v63, %v2671_v13 }
 0x4da   : > { %v2760_v36 = vadd.f32 %v6927_v55, %v2759_v22 }
 0x4db   : > { %v5334_v57 = vpop.eup %5333  ;;  %5015 = vmatmul.msk.f32.vlgmr.msra.gmra.mxu2 %vm1221_vm1, %v2856_v7 }
 0x4dc   : > { %v2673_v33 = vmul.f32 %v5334_v57, %v2593_v8  ;;  %v2602_v31 = vpop.xlane.xlu0 %2601  ;;  %vm2678_vm4 = vweird.f32 %v5334_v57  ;;  %v2764_v8 = vsel %vm6941_vm10, %v6927_v55, %v2760_v36 }
 0x4dd   : > { %5335 = vrcp.f32 %v2602_v31  ;;  %vm2679_vm6 = vmor %vm2677_vm5, %vm2678_vm4  ;;  %v2725_v28 = vand.u32 2147483648, %v2602_v31  ;;  %v2723_v16 = vand.u32 2147483647, %v2602_v31  ;;  %vm2719_vm11 = vweird.f32 %v2602_v31 }
 0x4de   : > { %v2674_v3 = vsub.f32 1.0, %v2673_v33 }
 0x4df   : > { %v2605_v59 = vpop.xlane.xlu2 %2604  ;;  %v3168_v50 = vpop.permute.xlu1 %3167  ;;  %v2726_v12 = vor.u32 1.1754944e-38, %v2725_v28  ;;  %vm2724_vm14 = vcmp.eq.f32.partialorder %v2723_v16, 8.507059e+37 }
 0x4e0   : > { %v2675_v2 = vmul.f32 %v5334_v57, %v2674_v3  ;;  %5337 = vrcp.f32 %v2605_v59  ;;  %v2739_v20 = vand.u32 2147483648, %v2605_v59  ;;  %v2737_v7 = vand.u32 2147483647, %v2605_v59 }
 0x4e1   : > { %vm2733_vm2 = vweird.f32 %v2605_v59 }
 0x4e2   : > { %v2676_v63 = vadd.f32 %v5334_v57, %v2675_v2  ;;  %v2740_v55 = vor.u32 1.1754944e-38, %v2739_v20  ;;  %vm2738_vm4 = vcmp.eq.f32.partialorder %v2737_v7, 8.507059e+37 }
 0x4e3   : > { %v5336_v29 = vpop.eup %5335 }
 0x4e4   : > { %v2680_v52 = vsel %vm2679_vm6, %v5334_v57, %v2676_v63  ;;  %v2715_v42 = vmul.f32 %v5336_v29, %v2602_v31  ;;  %vm2720_vm0 = vweird.f32 %v5336_v29 }
 0x4e5   : > { %v2685_v38 = vsel %vm2682_vm7, %v2684_v11, %v2680_v52  ;;  %vm2721_vm12 = vmor %vm2719_vm11, %vm2720_vm0 }
 0x4e6   : > { %v5338_v35 = vpop.eup %5337  ;;  %v2857_v21 = vmul.f32 %v6852_v53, %v2685_v38  ;;  %v2716_v43 = vsub.f32 1.0, %v2715_v42  ;;  %v2765_v53 = vand.u32 2147483647, %v6922_v32 }
 0x4e7   : > { %v2729_v5 = vmul.f32 %v5338_v35, %v2605_v59  ;;  %v3141_v0 = vpop.permute.xlu2 %3140  ;;  %vm2734_vm13 = vweird.f32 %v5338_v35 }
 0x4e8   : > { %v2717_v30 = vmul.f32 %v5336_v29, %v2716_v43  ;;  %5017 = vmatmul.msk.f32.vlgmr.msrb.gmra.mxu3 %vm1221_vm1, %v2857_v21  ;;  %5030 = vmatpush.xpose.msk.msra.mxu2 %vm1221_vm1, %v3141_v0  ;;  %vm2766_vm15 = vcmp.eq.f32.partialorder %v2765_v53, 8.507059e+37  ;;  %vm2735_vm3 = vmor %vm2733_vm2, %vm2734_vm13 }
 0x4e9   : > { %v2730_v39 = vsub.f32 1.0, %v2729_v5  ;;  %5032 = vmatpush.xpose.msk.msrb.mxu3 %vm1221_vm1, %v3168_v50  ;;  %v2769_v41 = vsel %vm2766_vm15, %v2768_v26, %v2764_v8 }
 0x4ea   : > { %v2718_v17 = vadd.f32 %v5336_v29, %v2717_v30  ;;  %v2863_v24 = vmul.f32 %v6847_v44, %v2769_v41 }
 0x4eb   : > { %v2731_v13 = vmul.f32 %v5338_v35, %v2730_v39 }
 0x4ec   : > { %v2722_v57 = vsel %vm2721_vm12, %v5336_v29, %v2718_v17 }
 0x4ed   : > { %v2727_v32 = vsel %vm2724_vm14, %v2726_v12, %v2722_v57  ;;  %v2732_v33 = vadd.f32 %v5338_v35, %v2731_v13 }
 0x4ee   : > { %v2860_v3 = vmul.f32 %v6857_v27, %v2727_v32 }
 0x4ef   : > { %v2736_v54 = vsel %vm2735_vm3, %v5338_v35, %v2732_v33  ;;  %v3114_v31 = vpop.permute.xlu0 %3113 }
 0x4f0   : > { %v2741_v2 = vsel %vm2738_vm4, %v2740_v55, %v2736_v54  ;;  %5023 = vmatmul.msk.f32.vlgmr.msrb.gmra.mxu2 %vm1221_vm1, %v2860_v3  ;;  %5028 = vmatpush.xpose.msk.msra.mxu1 %vm1221_vm1, %v3114_v31 }
 0x4f1   : > { %v2861_v22 = vmul.f32 %v6861_v34, %v2741_v2 }
 0x4f3   : > { %5025 = vmatmul.msk.f32.vlgmr.msra.gmra.mxu3 %vm1221_vm1, %v2861_v22  ;;  %5029 = vmatmul.msk.f32.vlgmr.msra.gmra.mxu1 %vm1221_vm1, %v2863_v24 }
 0x50a   : > { %v6957_v59 = vpop.xlane.xlu1 %2622 }
 0x50b   : > { %5339 = vrcp.f32 %v6957_v59  ;;  %vm2817_vm0 = vweird.f32 %v6957_v59  ;;  %v2821_v32 = vand.u32 2147483647, %v6957_v59  ;;  %v2823_v3 = vand.u32 2147483648, %v6957_v59 }
 0x511   : > { %v6960_v63 = vpop.eup %5339 }
 0x512   : > { %v2617_v27 = vpop.xlane.xlu1 %2616  ;;  %v2813_v29 = vmul.f32 %v6960_v63, %v6957_v59  ;;  %vm2818_vm9 = vweird.f32 %v6960_v63 }
 0x513   : > { %5341 = vrcp.f32 %v2617_v27  ;;  %v2795_v35 = vand.u32 2147483648, %v2617_v27  ;;  %v2793_v21 = vand.u32 2147483647, %v2617_v27  ;;  %vm2789_vm6 = vweird.f32 %v2617_v27  ;;  %vm6982_vm10 = vmor %vm2817_vm0, %vm2818_vm9 }
 0x514   : > { %v2814_v42 = vsub.f32 1.0, %v2813_v29 }
 0x515   : > { %v2796_v30 = vor.u32 1.1754944e-38, %v2795_v35  ;;  %vm2794_vm8 = vcmp.eq.f32.partialorder %v2793_v21, 8.507059e+37 }
 0x516   : > { %v2815_v43 = vmul.f32 %v6960_v63, %v2814_v42 }
 0x518   : > { %v2816_v8 = vadd.f32 %v6960_v63, %v2815_v43 }
 0x519   : > { %v5342_v11 = vpop.eup %5341 }
 0x51a   : > { %v2785_v52 = vmul.f32 %v5342_v11, %v2617_v27  ;;  %v6964_v44 = vpop.xlane.xlu1 %2628  ;;  %v2620_v34 = vpop.xlane.xlu0 %2619  ;;  %vm2790_vm5 = vweird.f32 %v5342_v11 }
 0x51b   : > { %5343 = vrcp.f32 %v6964_v44  ;;  %vm2791_vm7 = vmor %vm2789_vm6, %vm2790_vm5  ;;  %v2809_v7 = vand.u32 2147483648, %v2620_v34  ;;  %v2807_v41 = vand.u32 2147483647, %v2620_v34  ;;  %vm2845_vm12 = vweird.f32 %v6964_v44 }
 0x51c   : > { %v2786_v38 = vsub.f32 1.0, %v2785_v52  ;;  %5345 = vrcp.f32 %v2620_v34  ;;  %v2849_v2 = vand.u32 2147483647, %v6964_v44  ;;  %vm2803_vm13 = vweird.f32 %v2620_v34 }
 0x51d   : > { %v2810_v59 = vor.u32 1.1754944e-38, %v2809_v7  ;;  %vm2808_vm2 = vcmp.eq.f32.partialorder %v2807_v41, 8.507059e+37  ;;  %vm2822_vm5 = vcmp.eq.f32.partialorder %v2821_v32, 8.507059e+37 }
 0x51e   : > { %v2787_v36 = vmul.f32 %v5342_v11, %v2786_v38  ;;  %v2824_v38 = vor.u32 1.1754944e-38, %v2823_v3  ;;  %v3383_v3 = vld [vmem:[%s6020_s6 + $0x8] sm:$0xff] }
 0x520   : > { %v2788_v28 = vadd.f32 %v5342_v11, %v2787_v36  ;;  %v6968_v5 = vpop.xlane.xlu2 %2613  ;;  %v2894_v0 = vpop.f32.mrf.mxu0 }
 0x521   : > { %v6970_v25 = vpop.eup %5343  ;;  %5347 = vrcp.f32 %v6968_v5  ;;  %3318 = vrot.lane.b32.xlu0 %v2894_v0, %s5757_s23  ;;  %v2779_v42 = vand.u32 2147483647, %v6968_v5  ;;  %vm2775_vm6 = vweird.f32 %v6968_v5 }
 0x522   : > { %v5346_v16 = vpop.eup %5345  ;;  %v2792_v50 = vsel %vm2791_vm7, %v5342_v11, %v2788_v28  ;;  %v2841_v6 = vmul.f32 %v6970_v25, %v6964_v44  ;;  %vm2846_vm14 = vweird.f32 %v6970_v25  ;;  %v2781_v11 = vand.u32 2147483648, %v6968_v5 }
 0x523   : > { %v2797_v53 = vsel %vm2794_vm8, %v2796_v30, %v2792_v50  ;;  %v2799_v39 = vmul.f32 %v5346_v16, %v2620_v34  ;;  %vm2804_vm11 = vweird.f32 %v5346_v16  ;;  %vm7006_vm4 = vmor %vm2845_vm12, %vm2846_vm14  ;;  %vm2850_vm8 = vcmp.eq.f32.partialorder %v2849_v2, 8.507059e+37 }
 0x524   : > { %v2865_v17 = vmul.f32 %v6881_v4, %v2797_v53  ;;  %v2842_v20 = vsub.f32 1.0, %v2841_v6  ;;  %v2820_v4 = vsel %vm6982_vm10, %v6960_v63, %v2816_v8  ;;  %vm2805_vm15 = vmor %vm2803_vm13, %vm2804_vm11  ;;  %v2851_v63 = vand.u32 2147483648, %v6964_v44 }
 0x525   : > { %v2800_v12 = vsub.f32 1.0, %v2799_v39  ;;  %v2825_v0 = vsel %vm2822_vm5, %v2824_v38, %v2820_v4  ;;  %vm2780_vm9 = vcmp.eq.f32.partialorder %v2779_v42, 8.507059e+37  ;;  %vm3384_vm13 = vcmask 130048  }
 0x526   : > { %v2843_v13 = vmul.f32 %v6970_v25, %v2842_v20  ;;  %5033 = vmatmul.msk.f32.vlgmr.msrb.gmra.mxu3 %vm1221_vm1, %v2865_v17  ;;  %v2852_v30 = vor.u32 1.1754944e-38, %v2851_v63 }
 0x527   : > { %v5348_v26 = vpop.eup %5347  ;;  %v2801_v33 = vmul.f32 %v5346_v16, %v2800_v12 }
 0x528   : > { %v2771_v55 = vmul.f32 %v5348_v26, %v6968_v5  ;;  %v2921_v54 = vpop.f32.mrf.mxu1  ;;  %v6993_v31 = vpop.xlane.xlu2 %2625  ;;  %v2844_v22 = vadd.f32 %v6970_v25, %v2843_v13  ;;  %vm2776_vm3 = vweird.f32 %v5348_v26  ;;  %v2867_v5 = vmul.f32 %v6875_v47, %v2825_v0 }
 0x529   : > { %v2802_v24 = vadd.f32 %v5346_v16, %v2801_v33  ;;  %5349 = vrcp.f32 %v6993_v31  ;;  %3320 = vrot.lane.b32.xlu0 %v2921_v54, %s5757_s23  ;;  %vm2777_vm7 = vmor %vm2775_vm6, %vm2776_vm3  ;;  %v2837_v20 = vand.u32 2147483648, %v6993_v31  ;;  %v2835_v7 = vand.u32 2147483647, %v6993_v31 }
 0x52a   : > { %v2772_v27 = vsub.f32 1.0, %v2771_v55  ;;  %v2848_v21 = vsel %vm7006_vm4, %v6970_v25, %v2844_v22  ;;  %vm2831_vm10 = vweird.f32 %v6993_v31 }
 0x52b   : > { %v2806_v29 = vsel %vm2805_vm15, %v5346_v16, %v2802_v24  ;;  %v2782_v16 = vor.u32 1.1754944e-38, %v2781_v11  ;;  %v2853_v39 = vsel %vm2850_vm8, %v2852_v30, %v2848_v21  ;;  %vm2836_vm12 = vcmp.eq.f32.partialorder %v2835_v7, 8.507059e+37 }
 0x52c   : > { %v2811_v52 = vsel %vm2808_vm2, %v2810_v59, %v2806_v29  ;;  %v2773_v34 = vmul.f32 %v5348_v26, %v2772_v27  ;;  %v2869_v12 = vmul.f32 %v6891_v14, %v2853_v39 }
 0x52d   : > { %v3195_v36 = vpop.permute.xlu0 %3194  ;;  %v2866_v44 = vmul.f32 %v6887_v62, %v2811_v52 }
 0x52e   : > { %v2774_v43 = vadd.f32 %v5348_v26, %v2773_v34  ;;  %5034 = vmatpush.xpose.msk.msrb.mxu0 %vm1221_vm1, %v3195_v36 }
 0x52f   : > { %v5350_v28 = vpop.eup %5349 }
 0x530   : > { %v2778_v50 = vsel %vm2777_vm7, %v5348_v26, %v2774_v43  ;;  %v2827_v6 = vmul.f32 %v5350_v28, %v6993_v31  ;;  %v3222_v53 = vpop.permute.xlu2 %3221  ;;  %vm2832_vm0 = vweird.f32 %v5350_v28  ;;  %v3382_v31 = vld [vmem:[%s6020_s6] sm:$0xff] }
 0x531   : > { %v2783_v25 = vsel %vm2780_vm9, %v2782_v16, %v2778_v50  ;;  %5035 = vmatmul.msk.f32.vlgmr.msrb.gmra.mxu0 %vm1221_vm1, %v2866_v44  ;;  %5036 = vmatpush.xpose.msk.msrb.mxu1 %vm1221_vm1, %v3222_v53  ;;  %vm2833_vm11 = vmor %vm2831_vm10, %vm2832_vm0 }
 0x532   : > { %v2864_v8 = vmul.f32 %v6900_v15, %v2783_v25  ;;  %v2828_v17 = vsub.f32 1.0, %v2827_v6  ;;  %v3276_v62 = vpop.permute.xlu1 %3275  ;;  %v2838_v15 = vor.u32 1.1754944e-38, %v2837_v20  ;;  %3447 = vmatpush.msra.mxu0 %v3383_v3 }
 0x533   : > { %5040 = vmatpush.xpose.msk.msra.mxu3 %vm1221_vm1, %v3276_v62 }
 0x534   : > { %v2829_v13 = vmul.f32 %v5350_v28, %v2828_v17  ;;  %5031 = vmatmul.msk.f32.vlgmr.msra.gmra.mxu2 %vm1221_vm1, %v2864_v8  ;;  %5037 = vmatmul.msk.f32.vlgmr.msrb.gmra.mxu1 %vm1221_vm1, %v2867_v5 }
 0x535   : > { %v3249_v26 = vpop.permute.xlu0 %3248  ;;  %5068 = vmatpush.msra.mxu1 %v3383_v3  ;;  %3448 = vmatpush.msra.mxu0 %v3382_v31 }
 0x536   : > { %v2830_v47 = vadd.f32 %v5350_v28, %v2829_v13  ;;  %5038 = vmatpush.xpose.msk.msrb.mxu2 %vm1221_vm1, %v3249_v26  ;;  %5041 = vmatmul.msk.f32.vlgmr.msra.gmra.mxu3 %vm1221_vm1, %v2869_v12 }
 0x537   : > { %5070 = vmatpush.msrb.mxu3 %v3383_v3  ;;  %5071 = vmatpush.msra.mxu1 %v3382_v31 }
 0x538   : > { %v2834_v14 = vsel %vm2833_vm11, %v5350_v28, %v2830_v47 }
 0x539   : > { %v2839_v57 = vsel %vm2836_vm12, %v2838_v15, %v2834_v14  ;;  %5073 = vmatpush.msrb.mxu3 %v3382_v31  ;;  %v5419_v15 = vld [vmem:[%s6036_s19 + $0x10] sm:$0xff] }
 0x53a   : > { %v2868_v32 = vmul.f32 %v6906_v9, %v2839_v57  ;;  %5069 = vmatpush.msra.mxu2 %v3383_v3  ;;  %v5420_v57 = vld [vmem:[%s6036_s19 + $0x20] sm:$0xff] }
 0x53c   : > { %5039 = vmatmul.msk.f32.vlgmr.msrb.gmra.mxu2 %vm1221_vm1, %v2868_v32 }
 0x53d   : > { %5072 = vmatpush.msra.mxu2 %v3382_v31 }
 0x53e   : > { %v3002_v33 = vpop.f32.mrf.mxu0 }
 0x548   : > { %v3029_v41 = vpop.f32.mrf.mxu1 }
 0x549   : > { %3328 = vrot.lane.b32.xlu1 %v3029_v41, %s5757_s23  ;;  %v5421_v41 = vld [vmem:[%s6036_s19 + $0x28] sm:$0xff] }
 0x550   : > { %v3110_v4 = vpop.f32.mrf.mxu0 }
 0x551   : > { %3334 = vrot.lane.b32.xlu1 %v3110_v4, %s5757_s23 }
 0x55e   : > { %v2948_v55 = vpop.f32.mrf.mxu2 }
 0x55f   : > { %3322 = vrot.lane.b32.xlu2 %v2948_v55, %s5757_s23  ;;  %v5422_v55 = vld [vmem:[%s6036_s19 + $0x18] sm:$0xff] }
 0x567   : > { %3326 = vrot.lane.b32.xlu2 %v3002_v33, %s5757_s23 }
 0x56b   : > { %v2975_v9 = vpop.f32.mrf.mxu3 }
 0x56c   : > { %3324 = vrot.lane.b32.xlu0 %v2975_v9, %s5757_s23 }
 0x570   : > { %v3137_v24 = vpop.f32.mrf.mxu1 }
 0x573   : > { %v3056_v54 = vpop.f32.mrf.mxu2 }
 0x574   : > { %3330 = vrot.lane.b32.xlu0 %v3056_v54, %s5757_s23 }
 0x576   : > { %v3083_v2 = vpop.f32.mrf.mxu3 }
 0x577   : > { %3332 = vrot.lane.b32.xlu2 %v3083_v2, %s5757_s23 }
 0x57c   : > { %3336 = vrot.lane.b32.xlu0 %v3137_v24, %s5757_s23  ;;  %v3925_v24 = vld [vmem:[%s6022_s14 + $0xf0] sm:$0xff] }
 0x57d   : > { %3932 = vmatpush.msrb.mxu1 %v3925_v24 }
 0x593   : > { %v3319_v22 = vpop.permute.xlu0 %3318 }
 0x594   : > { %v3366_v59 = vsel %vm1221_vm1, %v6729_v56, %v3319_v22  ;;  %v3926_v22 = vld [vmem:[%s6022_s14 + $0xf8] sm:$0xff] }
 0x595   : > { %5042 = vmatmul.msk.f32.vlgmr.msra.gmra.mxu0 %vm3384_vm13, %v3366_v59  ;;  %v5423_v59 = vld [vmem:[%s6036_s19 + $0x30] sm:$0xff]  ;;  %3997 = vmatpush.msrb.mxu2 %v3926_v22 }
 0x59b   : > { %v3321_v27 = vpop.permute.xlu0 %3320 }
 0x59c   : > { %v3367_v63 = vsel %vm1221_vm1, %v6737_v23, %v3321_v27 }
 0x59d   : > { %5043 = vmatmul.msk.f32.gmra.mxu0 %vm3384_vm13, %v3367_v63 }
 0x5a9   : > { %v3191_v29 = vpop.f32.mrf.mxu3 }
 0x5aa   : > { %3340 = vrot.lane.b32.xlu1 %v3191_v29, %s5757_s23  ;;  %v5758_v29 = vmov 128.0  }
 0x5ab   : > { %5351 = vrcp.f32 %v5758_v29 }
 0x5ae   : > { %v3218_v11 = vpop.f32.mrf.mxu0 }
 0x5af   : > { %3342 = vrot.lane.b32.xlu0 %v3218_v11, %s5757_s23  ;;  %v3923_v11 = vld [vmem:[%s6022_s14 + $0xe0] sm:$0xff] }
 0x5b0   : > { %3933 = vmatpush.msrb.mxu1 %v3923_v11 }
 0x5b1   : > { %v3245_v23 = vpop.f32.mrf.mxu1 }
 0x5b7   : > { %v3164_v52 = vpop.f32.mrf.mxu2 }
 0x5b8   : > { %3338 = vrot.lane.b32.xlu2 %v3164_v52, %s5757_s23  ;;  %v3924_v52 = vld [vmem:[%s6022_s14 + $0xe8] sm:$0xff] }
 0x5b9   : > { %v3323_v34 = vpop.permute.xlu2 %3322  ;;  %v3299_v42 = vpop.f32.mrf.mxu3  ;;  %3998 = vmatpush.msrb.mxu2 %v3924_v52 }
 0x5ba   : > { %v3368_v56 = vsel %vm1221_vm1, %v6741_v60, %v3323_v34  ;;  %3348 = vrot.lane.b32.xlu0 %v3299_v42, %s5757_s23  ;;  %v5424_v34 = vld [vmem:[%s6036_s19 + $0x38] sm:$0xff] }
 0x5bb   : > { %5044 = vmatmul.msk.f32.gmra.mxu0 %vm3384_vm13, %v3368_v56  ;;  %v3329_v21 = vpop.permute.xlu1 %3328  ;;  %v3921_v56 = vld [vmem:[%s6022_s14 + $0xd0] sm:$0xff] }
 0x5bc   : > { %v3371_v60 = vsel %vm1221_vm1, %v6719_v61, %v3329_v21  ;;  %3934 = vmatpush.msrb.mxu1 %v3921_v56  ;;  %v5352_v21 = vpop.eup %5351 }
 0x5bf   : > { %v3272_v38 = vpop.f32.mrf.mxu2 }
 0x5c0   : > { %3344 = vrot.lane.b32.xlu2 %v3245_v23, %s5757_s23  ;;  %3346 = vrot.lane.b32.xlu1 %v3272_v38, %s5757_s23  ;;  %v3922_v23 = vld [vmem:[%s6022_s14 + $0xd8] sm:$0xff] }
 0x5c1   : > { %v3327_v35 = vpop.permute.xlu2 %3326  ;;  %3999 = vmatpush.msrb.mxu2 %v3922_v23 }
 0x5c2   : > { %v3370_v36 = vsel %vm1221_vm1, %v6716_v37, %v3327_v35  ;;  %v3919_v35 = vld [vmem:[%s6022_s14 + $0xc0] sm:$0xff] }
 0x5c3   : > { %5046 = vmatmul.msk.f32.vlgmr.msra.gmra.mxu1 %vm3384_vm13, %v3370_v36  ;;  %v3920_v36 = vld [vmem:[%s6022_s14 + $0xc8] sm:$0xff] }
 0x5c4   : > { %3935 = vmatpush.msrb.mxu1 %v3919_v35  ;;  %4000 = vmatpush.msrb.mxu2 %v3920_v36 }
 0x5cb   : > { %5047 = vmatmul.msk.f32.gmra.mxu1 %vm3384_vm13, %v3371_v60  ;;  %v3917_v60 = vld [vmem:[%s6022_s14 + $0xb0] sm:$0xff] }
 0x5cc   : > { %3936 = vmatpush.msrb.mxu1 %v3917_v60 }
 0x5d1   : > { %v3333_v37 = vpop.permute.xlu2 %3332 }
 0x5d2   : > { %v3373_v61 = vsel %vm1221_vm1, %v6753_v45, %v3333_v37  ;;  %v5417_v45 = vld [vmem:[%s6036_s19] sm:$0xff] }
 0x5d3   : > { %v5425_v37 = vld [vmem:[%s6036_s19 + $0x40] sm:$0xff] }
 0x5de   : > { %v3325_v43 = vpop.permute.xlu0 %3324 }
 0x5df   : > { %v3369_v28 = vsel %vm1221_vm1, %v6747_v18, %v3325_v43  ;;  %v3335_v18 = vpop.permute.xlu1 %3334  ;;  %v3918_v43 = vld [vmem:[%s6022_s14 + $0xb8] sm:$0xff] }
 0x5e0   : > { %5045 = vmatmul.msk.f32.gmra.mxu0 %vm3384_vm13, %v3369_v28  ;;  %v3374_v50 = vsel %vm1221_vm1, %v6721_v46, %v3335_v18  ;;  %v5418_v46 = vld [vmem:[%s6036_s19 + $0x8] sm:$0xff]  ;;  %4001 = vmatpush.msrb.mxu2 %v3918_v43 }
 0x5e1   : > { %v3913_v18 = vld [vmem:[%s6022_s14 + $0x90] sm:$0xff] }
 0x5e6   : > { %v3331_v0 = vpop.permute.xlu0 %3330 }
 0x5e7   : > { %v3372_v30 = vsel %vm1221_vm1, %v6743_v19, %v3331_v0  ;;  %v3915_v0 = vld [vmem:[%s6022_s14 + $0xa0] sm:$0xff] }
 0x5e8   : > { %5048 = vmatmul.msk.f32.gmra.mxu1 %vm3384_vm13, %v3372_v30  ;;  %v3916_v30 = vld [vmem:[%s6022_s14 + $0xa8] sm:$0xff] }
 0x5e9   : > { %3937 = vmatpush.msrb.mxu1 %v3915_v0  ;;  %4002 = vmatpush.msrb.mxu2 %v3916_v30 }
 0x5eb   : > { %3938 = vmatpush.msrb.mxu1 %v3913_v18 }
 0x5ee   : > { %v3337_v44 = vpop.permute.xlu0 %3336 }
 0x5ef   : > { %v3375_v16 = vsel %vm1221_vm1, %v6723_v48, %v3337_v44 }
 0x5f0   : > { %5049 = vmatmul.msk.f32.gmra.mxu1 %vm3384_vm13, %v3373_v61  ;;  %5051 = vmatmul.msk.f32.vlgmr.msra.gmra.mxu2 %vm3384_vm13, %v3375_v16  ;;  %v3531_v16 = vmul.f32 128.0, %v5352_v21 }
 0x5f8   : > { %5050 = vmatmul.msk.f32.gmra.mxu1 %vm3384_vm13, %v3374_v50  ;;  %v3914_v50 = vld [vmem:[%s6022_s14 + $0x98] sm:$0xff] }
 0x5f9   : > { %4003 = vmatpush.msrb.mxu2 %v3914_v50  ;;  %v7202_v50 = vld [vmem:[%s6030_s26 + $0x3] ss:$0 sm:$0xff] }
 0x612   : > { %v3339_v19 = vpop.permute.xlu2 %3338  ;;  %v3450_v6 = vpop.f32.mrf.mxu0 }
 0x613   : > { %v3376_v53 = vsel %vm1221_vm1, %v6751_v58, %v3339_v19  ;;  %v7081_v39 = vadd.f32 %v5417_v45, %v3450_v6  ;;  %v3912_v45 = vld [vmem:[%s6022_s14 + $0x88] sm:$0xff] }
 0x614   : > { %5052 = vmatmul.msk.f32.gmra.mxu2 %vm3384_vm13, %v3376_v53  ;;  %v3911_v53 = vld [vmem:[%s6022_s14 + $0x80] sm:$0xff] }
 0x615   : > { %3498 = vadd.xlane.f32.xlu2 %v7081_v39  ;;  %v3553_v48 = vmul.f32 %v7081_v39, %v7081_v39  ;;  %3939 = vmatpush.msrb.mxu1 %v3911_v53 }
 0x616   : > { %4004 = vmatpush.msrb.mxu2 %v3912_v45  ;;  %v5428_v45 = vld [vmem:[%s6036_s19 + $0x58] sm:$0xff] }
 0x617   : > { %3569 = vadd.xlane.f32.xlu1 %v3553_v48  ;;  %v3532_v48 = vsub.f32 1.0, %v3531_v16 }
 0x61a   : > { %v3453_v25 = vpop.f32.mrf.mxu0  ;;  %v3345_v12 = vpop.permute.xlu2 %3344 }
 0x61b   : > { %v7088_v5 = vadd.f32 %v5418_v46, %v3453_v25  ;;  %v3909_v25 = vld [vmem:[%s6022_s14 + $0x70] sm:$0xff]  ;;  %v3910_v46 = vld [vmem:[%s6022_s14 + $0x78] sm:$0xff] }
 0x61c   : > { %v3341_v8 = vpop.permute.xlu1 %3340  ;;  %3940 = vmatpush.msrb.mxu1 %v3909_v25  ;;  %4005 = vmatpush.msrb.mxu2 %v3910_v46  ;;  %v7208_v46 = vld [vmem:[%s6030_s26 + $0x4] ss:$0 sm:$0xff] }
 0x61d   : > { %v3377_v17 = vsel %vm1221_vm1, %v6761_v1, %v3341_v8  ;;  %3500 = vadd.xlane.f32.xlu0 %v7088_v5  ;;  %v3554_v58 = vmul.f32 %v7088_v5, %v7088_v5  ;;  %v3379_v1 = vsel %vm1221_vm1, %v6727_v40, %v3345_v12  ;;  %v5426_v8 = vld [vmem:[%s6036_s19 + $0x48] sm:$0xff] }
 0x61e   : > { %5053 = vmatmul.msk.f32.gmra.mxu2 %vm3384_vm13, %v3377_v17  ;;  %v3905_v12 = vld [vmem:[%s6022_s14 + $0x50] sm:$0xff] }
 0x61f   : > { %3571 = vadd.xlane.f32.xlu2 %v3554_v58  ;;  %v3907_v58 = vld [vmem:[%s6022_s14 + $0x60] sm:$0xff] }
 0x620   : > { %3941 = vmatpush.msrb.mxu1 %v3907_v58 }
 0x621   : > { %v3343_v62 = vpop.permute.xlu0 %3342 }
 0x622   : > { %v3378_v20 = vsel %vm1221_vm1, %v6725_v49, %v3343_v62  ;;  %v3908_v62 = vld [vmem:[%s6022_s14 + $0x68] sm:$0xff]  ;;  %3942 = vmatpush.msrb.mxu1 %v3905_v12 }
 0x623   : > { %4006 = vmatpush.msrb.mxu2 %v3908_v62 }
 0x626   : > { %5054 = vmatmul.msk.f32.gmra.mxu2 %vm3384_vm13, %v3378_v20  ;;  %v3533_v20 = vmul.f32 %v5352_v21, %v3532_v48 }
 0x62c   : > { %v3349_v26 = vpop.permute.xlu0 %3348 }
 0x62d   : > { %v3381_v14 = vsel %vm1221_vm1, %v6767_v10, %v3349_v26  ;;  %v3904_v26 = vld [vmem:[%s6022_s14 + $0x48] sm:$0xff] }
 0x62e   : > { %5055 = vmatmul.msk.f32.gmra.mxu2 %vm3384_vm13, %v3379_v1  ;;  %v3906_v1 = vld [vmem:[%s6022_s14 + $0x58] sm:$0xff] }
 0x62f   : > { %4007 = vmatpush.msrb.mxu2 %v3906_v1 }
 0x631   : > { %4008 = vmatpush.msrb.mxu2 %v3904_v26 }
 0x632   : > { %v3347_v13 = vpop.permute.xlu1 %3346 }
 0x633   : > { %v3380_v7 = vsel %vm1221_vm1, %v6757_v51, %v3347_v13  ;;  %vm3535_vm1 = vweird.f32 %v5352_v21 }
 0x634   : > { %5056 = vmatmul.msk.f32.vlgmr.msrb.gmra.mxu3 %vm3384_vm13, %v3380_v7  ;;  %v3903_v7 = vld [vmem:[%s6022_s14 + $0x40] sm:$0xff] }
 0x635   : > { %3943 = vmatpush.msrb.mxu1 %v3903_v7  ;;  %v5429_v7 = vld [vmem:[%s6036_s19 + $0x60] sm:$0xff] }
 0x638   : > { %v3456_v47 = vpop.f32.mrf.mxu0 }
 0x639   : > { %v7106_v49 = vadd.f32 %v5419_v15, %v3456_v47  ;;  %v3534_v47 = vadd.f32 %v5352_v21, %v3533_v20  ;;  %v3901_v15 = vld [vmem:[%s6022_s14 + $0x30] sm:$0xff] }
 0x63a   : > { %3944 = vmatpush.msrb.mxu1 %v3901_v15 }
 0x63b   : > { %3502 = vadd.xlane.f32.xlu1 %v7106_v49  ;;  %v3555_v40 = vmul.f32 %v7106_v49, %v7106_v49 }
 0x63c   : > { %5057 = vmatmul.msk.f32.gmra.mxu3 %vm3384_vm13, %v3381_v14  ;;  %v3902_v14 = vld [vmem:[%s6022_s14 + $0x38] sm:$0xff] }
 0x63d   : > { %3573 = vadd.xlane.f32.xlu2 %v3555_v40  ;;  %4009 = vmatpush.msrb.mxu2 %v3902_v14  ;;  %v3899_v40 = vld [vmem:[%s6022_s14 + $0x20] sm:$0xff] }
 0x63e   : > { %3945 = vmatpush.msrb.mxu1 %v3899_v40 }
 0x640   : > { %v3462_v51 = vpop.f32.mrf.mxu1 }
 0x641   : > { %v7115_v32 = vadd.f32 %v5420_v57, %v3462_v51  ;;  %v3900_v51 = vld [vmem:[%s6022_s14 + $0x28] sm:$0xff]  ;;  %v7184_v57 = vsel %vm3535_vm1, %v5352_v21, %v3534_v47  ;;  %v5427_v21 = vld [vmem:[%s6036_s19 + $0x50] sm:$0xff] }
 0x642   : > { %4010 = vmatpush.msrb.mxu2 %v3900_v51 }
 0x643   : > { %v3557_v2 = vmul.f32 %v7115_v32, %v7115_v32 }
 0x645   : > { %3506 = vadd.xlane.f32.xlu2 %v7115_v32 }
 0x648   : > { %v3465_v33 = vpop.f32.mrf.mxu1 }
 0x649   : > { %v7119_v10 = vadd.f32 %v5421_v41, %v3465_v33  ;;  %v3897_v33 = vld [vmem:[%s6022_s14 + $0x10] sm:$0xff]  ;;  %v3898_v41 = vld [vmem:[%s6022_s14 + $0x18] sm:$0xff] }
 0x64a   : > { %3946 = vmatpush.msrb.mxu1 %v3897_v33  ;;  %4011 = vmatpush.msrb.mxu2 %v3898_v41 }
 0x64b   : > { %v3558_v4 = vmul.f32 %v7119_v10, %v7119_v10 }
 0x64d   : > { %3579 = vadd.xlane.f32.xlu2 %v3558_v4 }
 0x65d   : > { %v3459_v3 = vpop.f32.mrf.mxu0 }
 0x65e   : > { %v7124_v9 = vadd.f32 %v5422_v55, %v3459_v3  ;;  %v3895_v3 = vld [vmem:[%s6022_s14] sm:$0xff]  ;;  %v3896_v55 = vld [vmem:[%s6022_s14 + $0x8] sm:$0xff] }
 0x65f   : > { %3947 = vmatpush.msrb.mxu1 %v3895_v3  ;;  %4012 = vmatpush.msrb.mxu2 %v3896_v55 }
 0x660   : > { %3504 = vadd.xlane.f32.xlu0 %v7124_v9  ;;  %v3556_v54 = vmul.f32 %v7124_v9, %v7124_v9 }
 0x662   : > { %3575 = vadd.xlane.f32.xlu1 %v3556_v54 }
 0x665   : > { %v3468_v31 = vpop.f32.mrf.mxu1 }
 0x666   : > { %v7135_v27 = vadd.f32 %v5423_v59, %v3468_v31 }
 0x668   : > { %3577 = vadd.xlane.f32.xlu0 %v3557_v2  ;;  %v3559_v38 = vmul.f32 %v7135_v27, %v7135_v27 }
 0x66a   : > { %3508 = vadd.xlane.f32.xlu1 %v7119_v10 }
 0x66d   : > { %v3471_v63 = vpop.f32.mrf.mxu1 }
 0x66e   : > { %v7140_v42 = vadd.f32 %v5424_v34, %v3471_v63 }
 0x670   : > { %3512 = vadd.xlane.f32.xlu2 %v7140_v42  ;;  %3510 = vadd.xlane.f32.xlu0 %v7135_v27  ;;  %v3560_v61 = vmul.f32 %v7140_v42, %v7140_v42 }
 0x672   : > { %3581 = vadd.xlane.f32.xlu1 %v3559_v38 }
 0x673   : > { %v3477_v6 = vpop.f32.mrf.mxu2 }
 0x674   : > { %v7169_v17 = vadd.f32 %v5426_v8, %v3477_v6 }
 0x675   : > { %v3474_v28 = vpop.f32.mrf.mxu1 }
 0x676   : > { %v7155_v44 = vadd.f32 %v5425_v37, %v3474_v28  ;;  %v3562_v13 = vmul.f32 %v7169_v17, %v7169_v17 }
 0x678   : > { %3583 = vadd.xlane.f32.xlu0 %v3560_v61  ;;  %v3561_v19 = vmul.f32 %v7155_v44, %v7155_v44 }
 0x67a   : > { %3585 = vadd.xlane.f32.xlu2 %v3561_v19  ;;  %3514 = vadd.xlane.f32.xlu1 %v7155_v44 }
 0x680   : > { %3516 = vadd.xlane.f32.xlu0 %v7169_v17 }
 0x682   : > { %3587 = vadd.xlane.f32.xlu1 %v3562_v13 }
 0x688   : > { %v3499_v4 = vpop.xlane.xlu2 %3498 }
 0x689   : > { %v3537_v54 = vmul.f32 %v7184_v57, %v3499_v4 }
 0x68a   : > { %v3570_v31 = vpop.xlane.xlu1 %3569 }
 0x68b   : > { %v3617_v2 = vmul.f32 %v3537_v54, %v3537_v54  ;;  %v3601_v24 = vmul.f32 %v3570_v31, %v7184_v57  ;;  %v3649_v18 = vsub.f32 %v7081_v39, %v3537_v54  ;;  %v5430_v54 = vld [vmem:[%s6036_s19 + $0x68] sm:$0xff] }
 0x68d   : > { %v3633_v22 = vsub.f32 %v3601_v24, %v3617_v2 }
 0x68f   : > { %v3665_v59 = vadd.f32 1e-05, %v3633_v22 }
 0x690   : > { %v3501_v63 = vpop.xlane.xlu0 %3500 }
 0x691   : > { %5353 = vrsqrt.f32 %v3665_v59  ;;  %v3538_v29 = vmul.f32 %v7184_v57, %v3501_v63  ;;  %vm3687_vm15 = vweird.f32 %v3665_v59  ;;  %v5431_v63 = vld [vmem:[%s6036_s19 + $0x70] sm:$0xff] }
 0x692   : > { %v3572_v11 = vpop.xlane.xlu2 %3571 }
 0x693   : > { %v3618_v52 = vmul.f32 %v3538_v29, %v3538_v29  ;;  %v3602_v34 = vmul.f32 %v3572_v11, %v7184_v57  ;;  %v3650_v1 = vsub.f32 %v7088_v5, %v3538_v29 }
 0x695   : > { %v3634_v56 = vsub.f32 %v3602_v34, %v3618_v52 }
 0x697   : > { %v5354_v23 = vpop.eup %5353  ;;  %v3666_v38 = vadd.f32 1e-05, %v3634_v56  ;;  %v3480_v35 = vpop.f32.mrf.mxu2 }
 0x698   : > { %v3682_v36 = vmul.f32 %v5354_v23, %v3665_v59  ;;  %v7195_v60 = vadd.f32 %v5427_v21, %v3480_v35  ;;  %vm3688_vm14 = vweird.f32 %v5354_v23 }
 0x699   : > { %5355 = vrsqrt.f32 %v3666_v38  ;;  %vm3689_vm2 = vmor %vm3687_vm15, %vm3688_vm14  ;;  %vm3697_vm4 = vweird.f32 %v3666_v38 }
 0x69a   : > { %v3683_v43 = vmul.f32 %v5354_v23, %v3682_v36  ;;  %3518 = vadd.xlane.f32.xlu2 %v7195_v60  ;;  %v3563_v28 = vmul.f32 %v7195_v60, %v7195_v60 }
 0x69c   : > { %v3684_v0 = vmul.f32 0.5, %v3683_v43  ;;  %3589 = vadd.xlane.f32.xlu0 %v3563_v28 }
 0x69e   : > { %v3685_v30 = vsub.f32 1.5, %v3684_v0 }
 0x69f   : > { %v5356_v37 = vpop.eup %5355 }
 0x6a0   : > { %v3686_v61 = vmul.f32 %v5354_v23, %v3685_v30  ;;  %v3692_v16 = vmul.f32 %v5356_v37, %v3666_v38  ;;  %vm3698_vm3 = vweird.f32 %v5356_v37  ;;  %v5432_v38 = vld [vmem:[%s6036_s19 + $0x78] sm:$0xff] }
 0x6a1   : > { %v3483_v19 = vpop.f32.mrf.mxu2  ;;  %vm3699_vm5 = vmor %vm3697_vm4, %vm3698_vm3 }
 0x6a2   : > { %v3690_v6 = vsel %vm3689_vm2, %v5354_v23, %v3686_v61  ;;  %v3693_v53 = vmul.f32 %v5356_v37, %v3692_v16  ;;  %v7205_v48 = vadd.f32 %v5428_v45, %v3483_v19 }
 0x6a3   : > { %v3841_v25 = vmul.f32 %v3690_v6, %v3649_v18 }
 0x6a4   : > { %v3694_v8 = vmul.f32 0.5, %v3693_v53  ;;  %3520 = vadd.xlane.f32.xlu1 %v7205_v48  ;;  %v3564_v58 = vmul.f32 %v7205_v48, %v7205_v48 }
 0x6a5   : > { %v3860_v39 = vmul.f32 %v7202_v50, %v3841_v25 }
 0x6a6   : > { %v3695_v62 = vsub.f32 1.5, %v3694_v8  ;;  %3591 = vadd.xlane.f32.xlu2 %v3564_v58 }
 0x6a7   : > { %v7215_v20 = vadd.f32 %v7208_v46, %v3860_v39 }
 0x6a8   : > { %v3696_v12 = vmul.f32 %v5356_v37, %v3695_v62 }
 0x6a9   : > { %v3486_v13 = vpop.f32.mrf.mxu2  ;;  %3948 = vmatmul.f32.vlgmr.msrb.gmra.mxu1 %v7215_v20  ;;  %4013 = vmatmul.f32.vlgmr.msrb.gmra.mxu2 %v7215_v20 }
 0x6aa   : > { %v7221_v26 = vadd.f32 %v5429_v7, %v3486_v13  ;;  %v3700_v47 = vsel %vm3699_vm5, %v5356_v37, %v3696_v12 }
 0x6ab   : > { %v3842_v15 = vmul.f32 %v3700_v47, %v3650_v1 }
 0x6ac   : > { %3522 = vadd.xlane.f32.xlu0 %v7221_v26  ;;  %v3565_v14 = vmul.f32 %v7221_v26, %v7221_v26 }
 0x6ad   : > { %v3861_v40 = vmul.f32 %v7202_v50, %v3842_v15 }
 0x6ae   : > { %v3503_v5 = vpop.xlane.xlu1 %3502  ;;  %3593 = vadd.xlane.f32.xlu1 %v3565_v14 }
 0x6af   : > { %v3539_v51 = vmul.f32 %v7184_v57, %v3503_v5  ;;  %v7229_v33 = vadd.f32 %v7208_v46, %v3861_v40 }
 0x6b0   : > { %v3574_v41 = vpop.xlane.xlu2 %3573 }
 0x6b1   : > { %v3619_v4 = vmul.f32 %v3539_v51, %v3539_v51  ;;  %v3603_v3 = vmul.f32 %v3574_v41, %v7184_v57  ;;  %v3489_v55 = vpop.f32.mrf.mxu2  ;;  %3951 = vmatmul.f32.gmra.mxu1 %v7229_v33  ;;  %4016 = vmatmul.f32.gmra.mxu2 %v7229_v33  ;;  %v3651_v0 = vsub.f32 %v7106_v49, %v3539_v51 }
 0x6b2   : > { %v7235_v31 = vadd.f32 %v5430_v54, %v3489_v55 }
 0x6b3   : > { %v3635_v2 = vsub.f32 %v3603_v3, %v3619_v4 }
 0x6b4   : > { %3524 = vadd.xlane.f32.xlu2 %v7235_v31  ;;  %v3566_v24 = vmul.f32 %v7235_v31, %v7235_v31 }
 0x6b5   : > { %v3667_v22 = vadd.f32 1e-05, %v3635_v2 }
 0x6b6   : > { %3595 = vadd.xlane.f32.xlu0 %v3566_v24 }
 0x6b7   : > { %5357 = vrsqrt.f32 %v3667_v22  ;;  %v3492_v59 = vpop.f32.mrf.mxu3  ;;  %vm3707_vm7 = vweird.f32 %v3667_v22 }
 0x6b8   : > { %v7241_v29 = vadd.f32 %v5431_v63, %v3492_v59  ;;  %v3507_v18 = vpop.xlane.xlu2 %3506 }
 0x6b9   : > { %v7266_v25 = vmul.f32 %v7184_v57, %v3507_v18 }
 0x6ba   : > { %3526 = vadd.xlane.f32.xlu1 %v7241_v29  ;;  %v3567_v11 = vmul.f32 %v7241_v29, %v7241_v29 }
 0x6bb   : > { %v3621_v62 = vmul.f32 %v7266_v25, %v7266_v25 }
 0x6bc   : > { %3597 = vadd.xlane.f32.xlu2 %v3567_v11 }
 0x6bd   : > { %v5358_v52 = vpop.eup %5357 }
 0x6be   : > { %v3702_v34 = vmul.f32 %v5358_v52, %v3667_v22  ;;  %vm3708_vm6 = vweird.f32 %v5358_v52 }
 0x6bf   : > { %v3495_v56 = vpop.f32.mrf.mxu3  ;;  %vm3709_vm8 = vmor %vm3707_vm7, %vm3708_vm6 }
 0x6c0   : > { %v3703_v23 = vmul.f32 %v5358_v52, %v3702_v34  ;;  %v7247_v35 = vadd.f32 %v5432_v38, %v3495_v56  ;;  %v3580_v1 = vpop.xlane.xlu2 %3579 }
 0x6c1   : > { %v3606_v15 = vmul.f32 %v3580_v1, %v7184_v57 }
 0x6c2   : > { %v3704_v36 = vmul.f32 0.5, %v3703_v23  ;;  %3528 = vadd.xlane.f32.xlu0 %v7247_v35  ;;  %v3568_v21 = vmul.f32 %v7247_v35, %v7247_v35 }
 0x6c4   : > { %v3705_v43 = vsub.f32 1.5, %v3704_v36  ;;  %3599 = vadd.xlane.f32.xlu1 %v3568_v21 }
 0x6c6   : > { %v3706_v28 = vmul.f32 %v5358_v52, %v3705_v43 }
 0x6c8   : > { %v3710_v30 = vsel %vm3709_vm8, %v5358_v52, %v3706_v28 }
 0x6c9   : > { %v3843_v37 = vmul.f32 %v3710_v30, %v3651_v0 }
 0x6cb   : > { %v3862_v61 = vmul.f32 %v7202_v50, %v3843_v37 }
 0x6cd   : > { %v7255_v16 = vadd.f32 %v7208_v46, %v3862_v61 }
 0x6cf   : > { %3954 = vmatmul.f32.gmra.mxu1 %v7255_v16  ;;  %4019 = vmatmul.f32.gmra.mxu2 %v7255_v16 }
 0x6d3   : > { %v3505_v19 = vpop.xlane.xlu0 %3504 }
 0x6d4   : > { %v7260_v6 = vmul.f32 %v7184_v57, %v3505_v19 }
 0x6d5   : > { %v3576_v53 = vpop.xlane.xlu1 %3575 }
 0x6d6   : > { %v3620_v49 = vmul.f32 %v7260_v6, %v7260_v6  ;;  %v3604_v45 = vmul.f32 %v3576_v53, %v7184_v57  ;;  %v3652_v53 = vsub.f32 %v7124_v9, %v7260_v6 }
 0x6d8   : > { %v3636_v8 = vsub.f32 %v3604_v45, %v3620_v49 }
 0x6da   : > { %v3668_v58 = vadd.f32 1e-05, %v3636_v8  ;;  %v4109_v8 = vld [vmem:[%s6028_s11 + $0x78] sm:$0xff] }
 0x6db   : > { %v3578_v39 = vpop.xlane.xlu0 %3577  ;;  %4129 = vmatpush.msra.mxu3 %v4109_v8 }
 0x6dc   : > { %5359 = vrsqrt.f32 %v3668_v58  ;;  %v3605_v12 = vmul.f32 %v3578_v39, %v7184_v57  ;;  %vm3717_vm0 = vweird.f32 %v3668_v58 }
 0x6dd   : > { %v3509_v13 = vpop.xlane.xlu1 %3508 }
 0x6de   : > { %v3637_v7 = vsub.f32 %v3605_v12, %v3621_v62  ;;  %v7272_v47 = vmul.f32 %v7184_v57, %v3509_v13  ;;  %v4108_v13 = vld [vmem:[%s6028_s11 + $0x70] sm:$0xff] }
 0x6df   : > { %4130 = vmatpush.msra.mxu3 %v4108_v13 }
 0x6e0   : > { %v3669_v14 = vadd.f32 1e-05, %v3637_v7  ;;  %v3622_v40 = vmul.f32 %v7272_v47, %v7272_v47 }
 0x6e2   : > { %v5360_v5 = vpop.eup %5359  ;;  %5361 = vrsqrt.f32 %v3669_v14  ;;  %v3638_v51 = vsub.f32 %v3606_v15, %v3622_v40  ;;  %vm3727_vm12 = vweird.f32 %v3669_v14 }
 0x6e3   : > { %v3712_v41 = vmul.f32 %v5360_v5, %v3668_v58  ;;  %v3511_v4 = vpop.xlane.xlu0 %3510  ;;  %v3513_v2 = vpop.xlane.xlu2 %3512  ;;  %vm3718_vm9 = vweird.f32 %v5360_v5 }
 0x6e4   : > { %v7277_v3 = vadd.f32 1e-05, %v3638_v51  ;;  %v7280_v55 = vmul.f32 %v7184_v57, %v3511_v4  ;;  %v7287_v52 = vmul.f32 %v7184_v57, %v3513_v2  ;;  %vm3719_vm10 = vmor %vm3717_vm0, %vm3718_vm9 }
 0x6e5   : > { %v3713_v54 = vmul.f32 %v5360_v5, %v3712_v41  ;;  %v3582_v24 = vpop.xlane.xlu1 %3581  ;;  %v4107_v41 = vld [vmem:[%s6028_s11 + $0x68] sm:$0xff] }
 0x6e6   : > { %5363 = vrsqrt.f32 %v7277_v3  ;;  %v3623_v59 = vmul.f32 %v7280_v55, %v7280_v55  ;;  %v3607_v63 = vmul.f32 %v3582_v24, %v7184_v57  ;;  %v3624_v0 = vmul.f32 %v7287_v52, %v7287_v52  ;;  %4131 = vmatpush.msra.mxu3 %v4107_v41  ;;  %v4101_v41 = vld [vmem:[%s6028_s11 + $0x38] sm:$0xff] }
 0x6e7   : > { %v3714_v22 = vmul.f32 0.5, %v3713_v54  ;;  %v3653_v54 = vsub.f32 %v7115_v32, %v7266_v25  ;;  %vm3737_vm14 = vweird.f32 %v7277_v3 }
 0x6e8   : > { %v5362_v11 = vpop.eup %5361  ;;  %v3639_v23 = vsub.f32 %v3607_v63, %v3623_v59 }
 0x6e9   : > { %v3715_v34 = vsub.f32 1.5, %v3714_v22  ;;  %v3722_v56 = vmul.f32 %v5362_v11, %v3669_v14  ;;  %vm3728_vm11 = vweird.f32 %v5362_v11 }
 0x6ea   : > { %v7289_v21 = vadd.f32 1e-05, %v3639_v23  ;;  %vm7312_vm13 = vmor %vm3727_vm12, %vm3728_vm11 }
 0x6eb   : > { %v3716_v38 = vmul.f32 %v5360_v5, %v3715_v34  ;;  %v3723_v36 = vmul.f32 %v5362_v11, %v3722_v56  ;;  %v3584_v43 = vpop.xlane.xlu0 %3583  ;;  %v4106_v34 = vld [vmem:[%s6028_s11 + $0x60] sm:$0xff]  ;;  %v4125_v56 = vld [vmem:[%s6028_s11 + $0xf8] sm:$0xff] }
 0x6ec   : > { %v7291_v28 = vpop.eup %5363  ;;  %v3608_v30 = vmul.f32 %v3584_v43, %v7184_v57  ;;  %5365 = vrsqrt.f32 %v7289_v21  ;;  %4132 = vmatpush.msra.mxu3 %v4106_v34  ;;  %4194 = vmatpush.msrb.mxu0 %v4125_v56  ;;  %v4105_v43 = vld [vmem:[%s6028_s11 + $0x58] sm:$0xff]  ;;  %vm3747_vm3 = vweird.f32 %v7289_v21 }
 0x6ed   : > { %v3724_v37 = vmul.f32 0.5, %v3723_v36  ;;  %v3732_v61 = vmul.f32 %v7291_v28, %v7277_v3  ;;  %v3586_v18 = vpop.xlane.xlu2 %3585  ;;  %v3515_v19 = vpop.xlane.xlu1 %3514  ;;  %v3720_v62 = vsel %vm3719_vm10, %v5360_v5, %v3716_v38  ;;  %vm3738_vm1 = vweird.f32 %v7291_v28 }
 0x6ee   : > { %v3640_v49 = vsub.f32 %v3608_v30, %v3624_v0  ;;  %v7302_v45 = vmul.f32 %v7184_v57, %v3515_v19  ;;  %v3609_v1 = vmul.f32 %v3586_v18, %v7184_v57  ;;  %v3844_v6 = vmul.f32 %v3720_v62, %v3652_v53  ;;  %v4124_v0 = vld [vmem:[%s6028_s11 + $0xf0] sm:$0xff]  ;;  %4133 = vmatpush.msra.mxu3 %v4105_v43  ;;  %v4123_v19 = vld [vmem:[%s6028_s11 + $0xe8] sm:$0xff]  ;;  %vm7355_vm15 = vmor %vm3737_vm14, %vm3738_vm1 }
 0x6ef   : > { %v3725_v39 = vsub.f32 1.5, %v3724_v37  ;;  %v3733_v58 = vmul.f32 %v7291_v28, %v3732_v61  ;;  %4195 = vmatpush.msrb.mxu0 %v4124_v0  ;;  %v4104_v18 = vld [vmem:[%s6028_s11 + $0x50] sm:$0xff]  ;;  %v4103_v62 = vld [vmem:[%s6028_s11 + $0x48] sm:$0xff]  ;;  %v4117_v43 = vld [vmem:[%s6028_s11 + $0xb8] sm:$0xff] }
 0x6f0   : > { %v7306_v12 = vadd.f32 1e-05, %v3640_v49  ;;  %v3625_v9 = vmul.f32 %v7302_v45, %v7302_v45  ;;  %v3863_v51 = vmul.f32 %v7202_v50, %v3844_v6  ;;  %4134 = vmatpush.msra.mxu3 %v4104_v18  ;;  %v4115_v53 = vld [vmem:[%s6028_s11 + $0xa8] sm:$0xff] }
 0x6f1   : > { %v3726_v7 = vmul.f32 %v5362_v11, %v3725_v39  ;;  %v3734_v15 = vmul.f32 0.5, %v3733_v58  ;;  %4196 = vmatpush.msrb.mxu0 %v4123_v19  ;;  %v4096_v19 = vld [vmem:[%s6028_s11 + $0x10] sm:$0xff] }
 0x6f2   : > { %5367 = vrsqrt.f32 %v7306_v12  ;;  %v3641_v5 = vsub.f32 %v3609_v1, %v3625_v9  ;;  %v7319_v4 = vpop.eup %5365  ;;  %v7336_v32 = vadd.f32 %v7208_v46, %v3863_v51  ;;  %v4122_v1 = vld [vmem:[%s6028_s11 + $0xe0] sm:$0xff]  ;;  %v3654_v9 = vsub.f32 %v7119_v10, %v7272_v47  ;;  %4135 = vmatpush.msra.mxu3 %v4103_v62 }
 0x6f3   : > { %v3735_v14 = vsub.f32 1.5, %v3734_v15  ;;  %v3517_v2 = vpop.xlane.xlu0 %3516  ;;  %v3730_v24 = vsel %vm7312_vm13, %v5362_v11, %v3726_v7  ;;  %v3742_v22 = vmul.f32 %v7319_v4, %v7289_v21  ;;  %4197 = vmatpush.msrb.mxu0 %v4122_v1  ;;  %v4102_v15 = vld [vmem:[%s6028_s11 + $0x40] sm:$0xff]  ;;  %vm3748_vm2 = vweird.f32 %v7319_v4  ;;  %v4099_v21 = vld [vmem:[%s6028_s11 + $0x28] sm:$0xff] }
 0x6f4   : > { %v7327_v59 = vadd.f32 1e-05, %v3641_v5  ;;  %v7330_v63 = vmul.f32 %v7184_v57, %v3517_v2  ;;  %v3845_v11 = vmul.f32 %v3730_v24, %v3653_v54  ;;  %3957 = vmatmul.f32.gmra.mxu1 %v7336_v32  ;;  %4022 = vmatmul.f32.gmra.mxu2 %v7336_v32  ;;  %v4120_v54 = vld [vmem:[%s6028_s11 + $0xd0] sm:$0xff]  ;;  %v4119_v2 = vld [vmem:[%s6028_s11 + $0xc8] sm:$0xff]  ;;  %vm7391_vm4 = vmor %vm3747_vm3, %vm3748_vm2  ;;  %vm3757_vm6 = vweird.f32 %v7306_v12 }
 0x6f5   : > { %v3588_v25 = vpop.xlane.xlu1 %3587  ;;  %v3736_v23 = vmul.f32 %v7291_v28, %v3735_v14  ;;  %v3743_v38 = vmul.f32 %v7319_v4, %v3742_v22  ;;  %4136 = vmatpush.msra.mxu3 %v4102_v15  ;;  %v4100_v14 = vld [vmem:[%s6028_s11 + $0x30] sm:$0xff]  ;;  %v4114_v62 = vld [vmem:[%s6028_s11 + $0xa0] sm:$0xff]  ;;  %v3656_v1 = vsub.f32 %v7140_v42, %v7287_v52 }
 0x6f6   : > { %5369 = vrsqrt.f32 %v7327_v59  ;;  %v3626_v36 = vmul.f32 %v7330_v63, %v7330_v63  ;;  %v3610_v30 = vmul.f32 %v3588_v25, %v7184_v57  ;;  %v3864_v39 = vmul.f32 %v7202_v50, %v3845_v11  ;;  %v4118_v11 = vld [vmem:[%s6028_s11 + $0xc0] sm:$0xff]  ;;  %v4112_v42 = vld [vmem:[%s6028_s11 + $0x90] sm:$0xff] }
 0x6f7   : > { %v3744_v61 = vmul.f32 0.5, %v3743_v38  ;;  %v3740_v3 = vsel %vm7355_vm15, %v7291_v28, %v3736_v23  ;;  %v4121_v28 = vld [vmem:[%s6028_s11 + $0xd8] sm:$0xff]  ;;  %4137 = vmatpush.msra.mxu3 %v4101_v41  ;;  %v3655_v38 = vsub.f32 %v7135_v27, %v7280_v55  ;;  %v4116_v55 = vld [vmem:[%s6028_s11 + $0xb0] sm:$0xff]  ;;  %vm3767_vm9 = vweird.f32 %v7327_v59 }
 0x6f8   : > { %v7348_v37 = vpop.eup %5367  ;;  %v3642_v8 = vsub.f32 %v3610_v30, %v3626_v36  ;;  %v3846_v40 = vmul.f32 %v3740_v3, %v3654_v9  ;;  %v7378_v5 = vadd.f32 %v7208_v46, %v3864_v39  ;;  %4198 = vmatpush.msrb.mxu0 %v4121_v28  ;;  %v4098_v36 = vld [vmem:[%s6028_s11 + $0x20] sm:$0xff]  ;;  %v4097_v27 = vld [vmem:[%s6028_s11 + $0x18] sm:$0xff] }
 0x6f9   : > { %v3752_v49 = vmul.f32 %v7348_v37, %v7306_v12  ;;  %v3745_v58 = vsub.f32 1.5, %v3744_v61  ;;  %4138 = vmatpush.msra.mxu3 %v4100_v14  ;;  %vm3758_vm5 = vweird.f32 %v7348_v37  ;;  %v4095_v12 = vld [vmem:[%s6028_s11 + $0x8] sm:$0xff]  ;;  %v4094_v9 = vld [vmem:[%s6028_s11] sm:$0xff] }
 0x6fa   : > { %v7370_v13 = vadd.f32 1e-05, %v3642_v8  ;;  %4199 = vmatpush.msrb.mxu0 %v4120_v54  ;;  %v3865_v22 = vmul.f32 %v7202_v50, %v3846_v40  ;;  %vm7422_vm7 = vmor %vm3757_vm6, %vm3758_vm5  ;;  %v4111_v54 = vld [vmem:[%s6028_s11 + $0x88] sm:$0xff] }
 0x6fb   : > { %v3753_v6 = vmul.f32 %v7348_v37, %v3752_v49  ;;  %v3746_v10 = vmul.f32 %v7319_v4, %v3745_v58  ;;  %4139 = vmatpush.msra.mxu3 %v4099_v21 }
 0x6fc   : > { %v7372_v7 = vpop.eup %5369  ;;  %5371 = vrsqrt.f32 %v7370_v13  ;;  %3960 = vmatmul.f32.gmra.mxu1 %v7378_v5  ;;  %4025 = vmatmul.f32.gmra.mxu2 %v7378_v5  ;;  %v7409_v0 = vadd.f32 %v7208_v46, %v3865_v22  ;;  %vm3777_vm11 = vweird.f32 %v7370_v13 }
 0x6fd   : > { %v3754_v47 = vmul.f32 0.5, %v3753_v6  ;;  %v3762_v51 = vmul.f32 %v7372_v7, %v7327_v59  ;;  %v3750_v25 = vsel %vm7391_vm4, %v7319_v4, %v3746_v10  ;;  %4200 = vmatpush.msrb.mxu0 %v4119_v2  ;;  %4140 = vmatpush.msra.mxu3 %v4098_v36  ;;  %v4113_v6 = vld [vmem:[%s6028_s11 + $0x98] sm:$0xff]  ;;  %vm3768_vm8 = vweird.f32 %v7372_v7 }
 0x6fe   : > { %v3847_v4 = vmul.f32 %v3750_v25, %v3655_v38  ;;  %vm3769_vm0 = vmor %vm3767_vm9, %vm3768_vm8 }
 0x6ff   : > { %v3755_v34 = vsub.f32 1.5, %v3754_v47  ;;  %v3763_v56 = vmul.f32 %v7372_v7, %v3762_v51  ;;  %4201 = vmatpush.msrb.mxu0 %v4118_v11  ;;  %4141 = vmatpush.msra.mxu3 %v4097_v27 }
 0x700   : > { %v3866_v8 = vmul.f32 %v7202_v50, %v3847_v4 }
 0x701   : > { %v3756_v30 = vmul.f32 %v7348_v37, %v3755_v34  ;;  %v3764_v61 = vmul.f32 0.5, %v3763_v56  ;;  %4202 = vmatpush.msrb.mxu0 %v4117_v43  ;;  %4142 = vmatpush.msra.mxu3 %v4096_v19  ;;  %v4110_v34 = vld [vmem:[%s6028_s11 + $0x80] sm:$0xff]  ;;  %v3657_v56 = vsub.f32 %v7155_v44, %v7302_v45 }
 0x702   : > { %v7402_v23 = vpop.eup %5371  ;;  %v7438_v15 = vadd.f32 %v7208_v46, %v3866_v8  ;;  %v539_v8 = vld [vmem:[%s6030_s26] sm:$0x3] }
 0x703   : > { %v3772_v18 = vmul.f32 %v7402_v23, %v7370_v13  ;;  %4203 = vmatpush.msrb.mxu0 %v4116_v55  ;;  %v3765_v39 = vsub.f32 1.5, %v3764_v61  ;;  %v3760_v58 = vsel %vm7422_vm7, %v7348_v37, %v3756_v30  ;;  %4143 = vmatpush.msra.mxu3 %v4095_v12  ;;  %vm3778_vm10 = vweird.f32 %v7402_v23 }
 0x704   : > { %3963 = vmatmul.f32.gmra.mxu1 %v7409_v0  ;;  %4028 = vmatmul.f32.gmra.mxu2 %v7409_v0  ;;  %v3848_v40 = vmul.f32 %v3760_v58, %v3656_v1  ;;  %vm3779_vm12 = vmor %vm3777_vm11, %vm3778_vm10  ;;  %v3658_v30 = vsub.f32 %v7169_v17, %v7330_v63 }
 0x705   : > { %v3773_v3 = vmul.f32 %v7402_v23, %v3772_v18  ;;  %4204 = vmatpush.msrb.mxu0 %v4115_v53  ;;  %v3766_v37 = vmul.f32 %v7372_v7, %v3765_v39  ;;  %4144 = vmatpush.msra.mxu3 %v4094_v9 }
 0x706   : > { %v3867_v14 = vmul.f32 %v7202_v50, %v3848_v40 }
 0x707   : > { %4205 = vmatpush.msrb.mxu0 %v4114_v62  ;;  %v3774_v10 = vmul.f32 0.5, %v3773_v3  ;;  %v3770_v2 = vsel %vm3769_vm0, %v7372_v7, %v3766_v37  ;;  %v7489_v62 = vperm.slane %v539_v8, 0 }
 0x708   : > { %v3849_v25 = vmul.f32 %v3770_v2, %v3657_v56  ;;  %v7459_v21 = vadd.f32 %v7208_v46, %v3867_v14 }
 0x709   : > { %4206 = vmatpush.msrb.mxu0 %v4113_v6  ;;  %v3775_v24 = vsub.f32 1.5, %v3774_v10 }
 0x70a   : > { %v3868_v38 = vmul.f32 %v7202_v50, %v3849_v25 }
 0x70b   : > { %4207 = vmatpush.msrb.mxu0 %v4112_v42  ;;  %v3776_v11 = vmul.f32 %v7402_v23, %v3775_v24  ;;  %v7505_v24 = vperm.slane %v539_v8, 1 }
 0x70c   : > { %3966 = vmatmul.f32.gmra.mxu1 %v7438_v15  ;;  %4031 = vmatmul.f32.gmra.mxu2 %v7438_v15  ;;  %v7477_v27 = vadd.f32 %v7208_v46, %v3868_v38 }
 0x70d   : > { %v3519_v28 = vpop.xlane.xlu2 %3518  ;;  %4208 = vmatpush.msrb.mxu0 %v4111_v54  ;;  %v3780_v4 = vsel %vm3779_vm12, %v7402_v23, %v3776_v11 }
 0x70e   : > { %v7443_v47 = vmul.f32 %v7184_v57, %v3519_v28  ;;  %v3850_v55 = vmul.f32 %v3780_v4, %v3658_v30 }
 0x70f   : > { %v3590_v52 = vpop.xlane.xlu0 %3589  ;;  %4209 = vmatpush.msrb.mxu0 %v4110_v34 }
 0x710   : > { %v3627_v51 = vmul.f32 %v7443_v47, %v7443_v47  ;;  %v3611_v41 = vmul.f32 %v3590_v52, %v7184_v57  ;;  %v3869_v39 = vmul.f32 %v7202_v50, %v3850_v55  ;;  %v3659_v40 = vsub.f32 %v7195_v60, %v7443_v47 }
 0x712   : > { %v3643_v22 = vsub.f32 %v3611_v41, %v3627_v51  ;;  %v7492_v6 = vadd.f32 %v7208_v46, %v3869_v39 }
 0x714   : > { %v3675_v59 = vadd.f32 1e-05, %v3643_v22  ;;  %3969 = vmatmul.f32.gmra.mxu1 %v7459_v21  ;;  %4034 = vmatmul.f32.gmra.mxu2 %v7459_v21 }
 0x716   : > { %5373 = vrsqrt.f32 %v3675_v59  ;;  %vm3787_vm1 = vweird.f32 %v3675_v59 }
 0x717   : > { %v3521_v7 = vpop.xlane.xlu1 %3520 }
 0x718   : > { %v7467_v44 = vmul.f32 %v7184_v57, %v3521_v7 }
 0x719   : > { %v3592_v45 = vpop.xlane.xlu2 %3591 }
 0x71a   : > { %v3628_v36 = vmul.f32 %v7467_v44, %v7467_v44  ;;  %v3612_v43 = vmul.f32 %v3592_v45, %v7184_v57 }
 0x71c   : > { %v5374_v61 = vpop.eup %5373  ;;  %v3644_v13 = vsub.f32 %v3612_v43, %v3628_v36  ;;  %3972 = vmatmul.f32.gmra.mxu1 %v7477_v27  ;;  %4037 = vmatmul.f32.gmra.mxu2 %v7477_v27 }
 0x71d   : > { %v3782_v18 = vmul.f32 %v5374_v61, %v3675_v59  ;;  %vm3788_vm13 = vweird.f32 %v5374_v61 }
 0x71e   : > { %v3676_v19 = vadd.f32 1e-05, %v3644_v13  ;;  %vm3789_vm14 = vmor %vm3787_vm1, %vm3788_vm13 }
 0x71f   : > { %v3783_v53 = vmul.f32 %v5374_v61, %v3782_v18  ;;  %v3523_v49 = vpop.xlane.xlu0 %3522 }
 0x720   : > { %5375 = vrsqrt.f32 %v3676_v19  ;;  %v7482_v23 = vmul.f32 %v7184_v57, %v3523_v49  ;;  %vm3797_vm2 = vweird.f32 %v3676_v19  ;;  %v3660_v49 = vsub.f32 %v7205_v48, %v7467_v44 }
 0x721   : > { %v3784_v17 = vmul.f32 0.5, %v3783_v53  ;;  %v3594_v63 = vpop.xlane.xlu1 %3593 }
 0x722   : > { %v3629_v3 = vmul.f32 %v7482_v23, %v7482_v23  ;;  %v3613_v58 = vmul.f32 %v3594_v63, %v7184_v57 }
 0x723   : > { %v3785_v12 = vsub.f32 1.5, %v3784_v17 }
 0x724   : > { %v3645_v1 = vsub.f32 %v3613_v58, %v3629_v3  ;;  %3975 = vmatmul.f32.gmra.mxu1 %v7492_v6  ;;  %4040 = vmatmul.f32.gmra.mxu2 %v7492_v6 }
 0x725   : > { %v3786_v9 = vmul.f32 %v5374_v61, %v3785_v12 }
 0x726   : > { %v5376_v28 = vpop.eup %5375  ;;  %v7496_v37 = vadd.f32 1e-05, %v3645_v1  ;;  %v3949_v10 = vpop.f32.mrf.mxu1 }
 0x727   : > { %v3792_v42 = vmul.f32 %v5376_v28, %v3676_v19  ;;  %v3950_v52 = vadd.f32 %v3949_v10, %v7489_v62  ;;  %v3525_v51 = vpop.xlane.xlu2 %3524  ;;  %v3790_v41 = vsel %vm3789_vm14, %v5374_v61, %v3786_v9  ;;  %vm3798_vm15 = vweird.f32 %v5376_v28 }
 0x728   : > { %5377 = vrsqrt.f32 %v7496_v37  ;;  %v7503_v54 = vmul.f32 %v7184_v57, %v3525_v51  ;;  %v3851_v14 = vmul.f32 %v3790_v41, %v3659_v40  ;;  %vm3799_vm3 = vmor %vm3797_vm2, %vm3798_vm15  ;;  %vm3807_vm5 = vweird.f32 %v7496_v37 }
 0x729   : > { %v3793_v60 = vmul.f32 %v5376_v28, %v3792_v42  ;;  %v4062_v47 = vmax.f32 %v3950_v52, 0.0  ;;  %v3596_v2 = vpop.xlane.xlu0 %3595 }
 0x72a   : > { %v3630_v22 = vmul.f32 %v7503_v54, %v7503_v54  ;;  %v3614_v34 = vmul.f32 %v3596_v2, %v7184_v57  ;;  %v3870_v56 = vmul.f32 %v7202_v50, %v3851_v14 }
 0x72b   : > { %v3794_v59 = vmul.f32 0.5, %v3793_v60  ;;  %4145 = vmatmul.f32.vlgmr.msra.gmra.mxu3 %v4062_v47  ;;  %v3661_v47 = vsub.f32 %v7221_v26, %v7482_v23 }
 0x72c   : > { %v3646_v25 = vsub.f32 %v3614_v34, %v3630_v22  ;;  %v4014_v11 = vpop.f32.mrf.mxu2  ;;  %v7512_v7 = vadd.f32 %v7208_v46, %v3870_v56 }
 0x72d   : > { %v3795_v45 = vsub.f32 1.5, %v3794_v59  ;;  %v4015_v38 = vadd.f32 %v4014_v11, %v7505_v24  ;;  %v3527_v36 = vpop.xlane.xlu1 %3526 }
 0x72e   : > { %v5378_v43 = vpop.eup %5377  ;;  %v7515_v4 = vadd.f32 1e-05, %v3646_v25  ;;  %v7518_v30 = vmul.f32 %v7184_v57, %v3527_v36  ;;  %v3952_v61 = vpop.f32.mrf.mxu1  ;;  %3978 = vmatmul.f32.gmra.mxu1 %v7512_v7  ;;  %4043 = vmatmul.f32.gmra.mxu2 %v7512_v7 }
 0x72f   : > { %v3796_v13 = vmul.f32 %v5376_v28, %v3795_v45  ;;  %v3802_v18 = vmul.f32 %v5378_v43, %v7496_v37  ;;  %v4063_v55 = vmax.f32 %v4015_v38, 0.0  ;;  %v3598_v53 = vpop.xlane.xlu2 %3597  ;;  %v3953_v19 = vadd.f32 %v3952_v61, %v7489_v62 }
 0x730   : > { %5379 = vrsqrt.f32 %v7515_v4  ;;  %v3631_v8 = vmul.f32 %v7518_v30, %v7518_v30  ;;  %v3615_v63 = vmul.f32 %v3598_v53, %v7184_v57  ;;  %vm3808_vm4 = vweird.f32 %v5378_v43 }
 0x731   : > { %v3803_v17 = vmul.f32 %v5378_v43, %v3802_v18  ;;  %4210 = vmatmul.f32.vlgmr.msrb.gmra.mxu0 %v4063_v55  ;;  %v3800_v39 = vsel %vm3799_vm3, %v5376_v28, %v3796_v13  ;;  %v4064_v12 = vmax.f32 %v3953_v19, 0.0  ;;  %vm3809_vm6 = vmor %vm3807_vm5, %vm3808_vm4  ;;  %vm3817_vm8 = vweird.f32 %v7515_v4 }
 0x732   : > { %v3852_v3 = vmul.f32 %v3800_v39, %v3660_v49  ;;  %v3647_v1 = vsub.f32 %v3615_v63, %v3631_v8 }
 0x733   : > { %v3804_v58 = vmul.f32 0.5, %v3803_v17  ;;  %4148 = vmatmul.f32.gmra.mxu3 %v4064_v12 }
 0x734   : > { %v4017_v9 = vpop.f32.mrf.mxu2  ;;  %v3871_v48 = vmul.f32 %v7202_v50, %v3852_v3  ;;  %v3679_v40 = vadd.f32 1e-05, %v3647_v1 }
 0x735   : > { %v3805_v44 = vsub.f32 1.5, %v3804_v58  ;;  %v4018_v10 = vadd.f32 %v4017_v9, %v7505_v24  ;;  %v3529_v42 = vpop.xlane.xlu0 %3528 }
 0x736   : > { %v5380_v52 = vpop.eup %5379  ;;  %v7534_v51 = vmul.f32 %v7184_v57, %v3529_v42  ;;  %v7537_v28 = vadd.f32 %v7208_v46, %v3871_v48  ;;  %5381 = vrsqrt.f32 %v3679_v40  ;;  %vm3827_vm10 = vweird.f32 %v3679_v40 }
 0x737   : > { %v3806_v41 = vmul.f32 %v5378_v43, %v3805_v44  ;;  %v3812_v14 = vmul.f32 %v5380_v52, %v7515_v4  ;;  %v3600_v60 = vpop.xlane.xlu1 %3599  ;;  %v4065_v2 = vmax.f32 %v4018_v10, 0.0  ;;  %vm3818_vm7 = vweird.f32 %v5380_v52 }
 0x738   : > { %v3632_v22 = vmul.f32 %v7534_v51, %v7534_v51  ;;  %3981 = vmatmul.f32.gmra.mxu1 %v7537_v28  ;;  %4046 = vmatmul.f32.gmra.mxu2 %v7537_v28  ;;  %v3616_v56 = vmul.f32 %v3600_v60, %v7184_v57  ;;  %vm3819_vm9 = vmor %vm3817_vm8, %vm3818_vm7 }
 0x739   : > { %v3813_v34 = vmul.f32 %v5380_v52, %v3812_v14  ;;  %v3810_v37 = vsel %vm3809_vm6, %v5378_v43, %v3806_v41  ;;  %4213 = vmatmul.f32.gmra.mxu0 %v4065_v2  ;;  %v3662_v43 = vsub.f32 %v7235_v31, %v7503_v54  ;;  %v3663_v31 = vsub.f32 %v7241_v29, %v7518_v30 }
 0x73a   : > { %v3853_v59 = vmul.f32 %v3810_v37, %v3661_v47  ;;  %v3648_v11 = vsub.f32 %v3616_v56, %v3632_v22  ;;  %v3664_v30 = vsub.f32 %v7247_v35, %v7534_v51 }
 0x73b   : > { %v3814_v25 = vmul.f32 0.5, %v3813_v34 }
 0x73c   : > { %v3872_v45 = vmul.f32 %v7202_v50, %v3853_v59  ;;  %v5382_v26 = vpop.eup %5381  ;;  %v3680_v38 = vadd.f32 1e-05, %v3648_v11 }
 0x73d   : > { %v3815_v23 = vsub.f32 1.5, %v3814_v25  ;;  %v3822_v36 = vmul.f32 %v5382_v26, %v3679_v40  ;;  %vm3828_vm0 = vweird.f32 %v5382_v26 }
 0x73e   : > { %v7550_v61 = vadd.f32 %v7208_v46, %v3872_v45  ;;  %5383 = vrsqrt.f32 %v3680_v38  ;;  %vm3829_vm11 = vmor %vm3827_vm10, %vm3828_vm0  ;;  %vm3837_vm13 = vweird.f32 %v3680_v38 }
 0x73f   : > { %v3816_v13 = vmul.f32 %v5380_v52, %v3815_v23  ;;  %v3823_v18 = vmul.f32 %v5382_v26, %v3822_v36 }
 0x740   : > { %3984 = vmatmul.f32.gmra.mxu1 %v7550_v61  ;;  %4049 = vmatmul.f32.gmra.mxu2 %v7550_v61 }
 0x741   : > { %v3820_v55 = vsel %vm3819_vm9, %v5380_v52, %v3816_v13  ;;  %v3824_v53 = vmul.f32 0.5, %v3823_v18 }
 0x742   : > { %v3854_v49 = vmul.f32 %v3820_v55, %v3662_v43 }
 0x743   : > { %v3825_v8 = vsub.f32 1.5, %v3824_v53 }
 0x744   : > { %v3873_v17 = vmul.f32 %v7202_v50, %v3854_v49  ;;  %v5384_v19 = vpop.eup %5383 }
 0x745   : > { %v3826_v63 = vmul.f32 %v5382_v26, %v3825_v8  ;;  %v3832_v4 = vmul.f32 %v5384_v19, %v3680_v38  ;;  %vm3838_vm12 = vweird.f32 %v5384_v19 }
 0x746   : > { %v7559_v39 = vadd.f32 %v7208_v46, %v3873_v17  ;;  %vm3839_vm1 = vmor %vm3837_vm13, %vm3838_vm12 }
 0x747   : > { %v3833_v54 = vmul.f32 %v5384_v19, %v3832_v4  ;;  %v3830_v3 = vsel %vm3829_vm11, %v5382_v26, %v3826_v63 }
 0x748   : > { %3987 = vmatmul.f32.gmra.mxu1 %v7559_v39  ;;  %4052 = vmatmul.f32.gmra.mxu2 %v7559_v39  ;;  %v3855_v58 = vmul.f32 %v3830_v3, %v3663_v31 }
 0x749   : > { %v3834_v12 = vmul.f32 0.5, %v3833_v54 }
 0x74a   : > { %v3874_v1 = vmul.f32 %v7202_v50, %v3855_v58 }
 0x74b   : > { %v3835_v9 = vsub.f32 1.5, %v3834_v12 }
 0x74c   : > { %v3955_v48 = vpop.f32.mrf.mxu1  ;;  %v7568_v29 = vadd.f32 %v7208_v46, %v3874_v1 }
 0x74d   : > { %v3956_v44 = vadd.f32 %v3955_v48, %v7489_v62  ;;  %v3836_v40 = vmul.f32 %v5384_v19, %v3835_v9 }
 0x74f   : > { %v4066_v10 = vmax.f32 %v3956_v44, 0.0  ;;  %v3840_v42 = vsel %vm3839_vm1, %v5384_v19, %v3836_v40 }
 0x750   : > { %3990 = vmatmul.f32.gmra.mxu1 %v7568_v29  ;;  %4055 = vmatmul.f32.gmra.mxu2 %v7568_v29  ;;  %v3856_v52 = vmul.f32 %v3840_v42, %v3664_v30 }
 0x751   : > { %4151 = vmatmul.f32.gmra.mxu3 %v4066_v10 }
 0x752   : > { %v4020_v41 = vpop.f32.mrf.mxu2  ;;  %v3875_v60 = vmul.f32 %v7202_v50, %v3856_v52 }
 0x753   : > { %v4021_v14 = vadd.f32 %v4020_v41, %v7505_v24  ;;  %v7596_v41 = vld [vmem:[%s6030_s26 + $0x2] ss:$0 sm:$0xff] }
 0x754   : > { %v7577_v2 = vadd.f32 %v7208_v46, %v3875_v60 }
 0x755   : > { %v4067_v47 = vmax.f32 %v4021_v14, 0.0 }
 0x757   : > { %4216 = vmatmul.f32.gmra.mxu0 %v4067_v47 }
 0x758   : > { %3993 = vmatmul.f32.gmra.mxu1 %v7577_v2  ;;  %4058 = vmatmul.f32.gmra.mxu2 %v7577_v2 }
 0x771   : > { %v3958_v35 = vpop.f32.mrf.mxu1 }
 0x772   : > { %v3959_v51 = vadd.f32 %v3958_v35, %v7489_v62 }
 0x774   : > { %v4068_v22 = vmax.f32 %v3959_v51, 0.0 }
 0x776   : > { %4154 = vmatmul.f32.gmra.mxu3 %v4068_v22 }
 0x777   : > { %v4023_v34 = vpop.f32.mrf.mxu2 }
 0x778   : > { %v4024_v56 = vadd.f32 %v4023_v34, %v7505_v24 }
 0x779   : > { %v3961_v37 = vpop.f32.mrf.mxu1 }
 0x77a   : > { %v4069_v59 = vmax.f32 %v4024_v56, 0.0  ;;  %v3962_v50 = vadd.f32 %v3961_v37, %v7489_v62 }
 0x77c   : > { %v4070_v25 = vmax.f32 %v3962_v50, 0.0  ;;  %4219 = vmatmul.f32.gmra.mxu0 %v4069_v59 }
 0x77e   : > { %4157 = vmatmul.f32.gmra.mxu3 %v4070_v25 }
 0x77f   : > { %v4026_v46 = vpop.f32.mrf.mxu2 }
 0x780   : > { %v4027_v11 = vadd.f32 %v4026_v46, %v7505_v24 }
 0x781   : > { %v3964_v45 = vpop.f32.mrf.mxu1 }
 0x782   : > { %v4071_v26 = vmax.f32 %v4027_v11, 0.0  ;;  %v3965_v23 = vadd.f32 %v3964_v45, %v7489_v62 }
 0x784   : > { %v4072_v38 = vmax.f32 %v3965_v23, 0.0  ;;  %4222 = vmatmul.f32.gmra.mxu0 %v4071_v26 }
 0x786   : > { %4160 = vmatmul.f32.gmra.mxu3 %v4072_v38 }
 0x787   : > { %v4029_v36 = vpop.f32.mrf.mxu2 }
 0x788   : > { %v4030_v13 = vadd.f32 %v4029_v36, %v7505_v24 }
 0x789   : > { %v3967_v43 = vpop.f32.mrf.mxu1 }
 0x78a   : > { %v4073_v18 = vmax.f32 %v4030_v13, 0.0  ;;  %v3968_v55 = vadd.f32 %v3967_v43, %v7489_v62 }
 0x78c   : > { %v4074_v53 = vmax.f32 %v3968_v55, 0.0  ;;  %4225 = vmatmul.f32.gmra.mxu0 %v4073_v18 }
 0x78e   : > { %4163 = vmatmul.f32.gmra.mxu3 %v4074_v53 }
 0x78f   : > { %v4032_v49 = vpop.f32.mrf.mxu2 }
 0x790   : > { %v4033_v8 = vadd.f32 %v4032_v49, %v7505_v24 }
 0x791   : > { %v3970_v17 = vpop.f32.mrf.mxu1 }
 0x792   : > { %v4075_v19 = vmax.f32 %v4033_v8, 0.0  ;;  %v3971_v63 = vadd.f32 %v3970_v17, %v7489_v62 }
 0x794   : > { %v4076_v4 = vmax.f32 %v3971_v63, 0.0  ;;  %4228 = vmatmul.f32.gmra.mxu0 %v4075_v19 }
 0x796   : > { %4166 = vmatmul.f32.gmra.mxu3 %v4076_v4 }
 0x797   : > { %v4035_v31 = vpop.f32.mrf.mxu2 }
 0x798   : > { %v4036_v54 = vadd.f32 %v4035_v31, %v7505_v24 }
 0x799   : > { %v3973_v3 = vpop.f32.mrf.mxu1 }
 0x79a   : > { %v4077_v58 = vmax.f32 %v4036_v54, 0.0  ;;  %v3974_v12 = vadd.f32 %v3973_v3, %v7489_v62 }
 0x79c   : > { %v4078_v1 = vmax.f32 %v3974_v12, 0.0  ;;  %4231 = vmatmul.f32.gmra.mxu0 %v4077_v58 }
 0x79e   : > { %4169 = vmatmul.f32.gmra.mxu3 %v4078_v1 }
 0x79f   : > { %v4038_v9 = vpop.f32.mrf.mxu2 }
 0x7a0   : > { %v4039_v48 = vadd.f32 %v4038_v9, %v7505_v24 }
 0x7a1   : > { %v3976_v44 = vpop.f32.mrf.mxu1 }
 0x7a2   : > { %v4079_v40 = vmax.f32 %v4039_v48, 0.0  ;;  %v3977_v30 = vadd.f32 %v3976_v44, %v7489_v62 }
 0x7a4   : > { %v4080_v10 = vmax.f32 %v3977_v30, 0.0  ;;  %4234 = vmatmul.f32.gmra.mxu0 %v4079_v40 }
 0x7a6   : > { %4172 = vmatmul.f32.gmra.mxu3 %v4080_v10 }
 0x7a7   : > { %v4041_v42 = vpop.f32.mrf.mxu2 }
 0x7a8   : > { %v4042_v52 = vadd.f32 %v4041_v42, %v7505_v24 }
 0x7aa   : > { %v4081_v60 = vmax.f32 %v4042_v52, 0.0 }
 0x7ab   : > { %v3979_v14 = vpop.f32.mrf.mxu1 }
 0x7ac   : > { %v3980_v47 = vadd.f32 %v3979_v14, %v7489_v62  ;;  %4237 = vmatmul.f32.gmra.mxu0 %v4081_v60 }
 0x7ae   : > { %v4146_v35 = vpop.f32.mrf.mxu3  ;;  %v4082_v51 = vmax.f32 %v3980_v47, 0.0  ;;  %v4211_v34 = vpop.f32.mrf.mxu0 }
 0x7af   : > { %v4147_v22 = vadd.f32 %v7596_v41, %v4146_v35 }
 0x7b0   : > { %4175 = vmatmul.f32.gmra.mxu3 %v4082_v51 }
 0x7b1   : > { %v4212_v56 = vadd.f32 %v4211_v34, %v4147_v22  ;;  %v4044_v37 = vpop.f32.mrf.mxu2 }
 0x7b2   : > { %v4045_v50 = vadd.f32 %v4044_v37, %v7505_v24 }
 0x7b3   : > { %v7601_v59 = vadd.f32 %v4212_v56, %v7215_v20 }
 0x7b4   : > { %v4083_v25 = vmax.f32 %v4045_v50, 0.0 }
 0x7b5   : > { %4275 = vadd.xlane.f32.xlu2 %v7601_v59  ;;  %v3982_v46 = vpop.f32.mrf.mxu1  ;;  %v4323_v11 = vmul.f32 %v7601_v59, %v7601_v59 }
 0x7b6   : > { %v3983_v45 = vadd.f32 %v3982_v46, %v7489_v62  ;;  %4240 = vmatmul.f32.gmra.mxu0 %v4083_v25  ;;  %v4149_v23 = vpop.f32.mrf.mxu3  ;;  %v4214_v36 = vpop.f32.mrf.mxu0 }
 0x7b7   : > { %4339 = vadd.xlane.f32.xlu0 %v4323_v11  ;;  %v4150_v38 = vadd.f32 %v7596_v41, %v4149_v23 }
 0x7b8   : > { %v4084_v26 = vmax.f32 %v3983_v45, 0.0 }
 0x7b9   : > { %v4215_v20 = vadd.f32 %v4214_v36, %v4150_v38 }
 0x7ba   : > { %4178 = vmatmul.f32.gmra.mxu3 %v4084_v26 }
 0x7bb   : > { %v4047_v13 = vpop.f32.mrf.mxu2  ;;  %v7611_v18 = vadd.f32 %v4215_v20, %v7229_v33 }
 0x7bc   : > { %v4048_v43 = vadd.f32 %v4047_v13, %v7505_v24 }
 0x7bd   : > { %v3985_v55 = vpop.f32.mrf.mxu1  ;;  %v4324_v8 = vmul.f32 %v7611_v18, %v7611_v18 }
 0x7be   : > { %v4085_v53 = vmax.f32 %v4048_v43, 0.0  ;;  %v3986_v49 = vadd.f32 %v3985_v55, %v7489_v62 }
 0x7bf   : > { %4277 = vadd.xlane.f32.xlu0 %v7611_v18  ;;  %4341 = vadd.xlane.f32.xlu1 %v4324_v8 }
 0x7c0   : > { %v4086_v17 = vmax.f32 %v3986_v49, 0.0  ;;  %4243 = vmatmul.f32.gmra.mxu0 %v4085_v53 }
 0x7c2   : > { %4181 = vmatmul.f32.gmra.mxu3 %v4086_v17 }
 0x7c3   : > { %v4050_v19 = vpop.f32.mrf.mxu2 }
 0x7c4   : > { %v4051_v63 = vadd.f32 %v4050_v19, %v7505_v24 }
 0x7c5   : > { %v3988_v4 = vpop.f32.mrf.mxu1 }
 0x7c6   : > { %v4087_v31 = vmax.f32 %v4051_v63, 0.0  ;;  %v3989_v33 = vadd.f32 %v3988_v4, %v7489_v62 }
 0x7c8   : > { %v4088_v54 = vmax.f32 %v3989_v33, 0.0  ;;  %4246 = vmatmul.f32.gmra.mxu0 %v4087_v31 }
 0x7ca   : > { %4184 = vmatmul.f32.gmra.mxu3 %v4088_v54 }
 0x7cb   : > { %v4053_v3 = vpop.f32.mrf.mxu2 }
 0x7cc   : > { %v4054_v58 = vadd.f32 %v4053_v3, %v7505_v24 }
 0x7cd   : > { %v3991_v12 = vpop.f32.mrf.mxu1 }
 0x7ce   : > { %v4089_v1 = vmax.f32 %v4054_v58, 0.0  ;;  %v3992_v9 = vadd.f32 %v3991_v12, %v7489_v62 }
 0x7d0   : > { %v4090_v48 = vmax.f32 %v3992_v9, 0.0  ;;  %4249 = vmatmul.f32.gmra.mxu0 %v4089_v1 }
 0x7d2   : > { %4187 = vmatmul.f32.gmra.mxu3 %v4090_v48 }
 0x7d3   : > { %v4056_v44 = vpop.f32.mrf.mxu2 }
 0x7d4   : > { %v4057_v40 = vadd.f32 %v4056_v44, %v7505_v24  ;;  %v4152_v30 = vpop.f32.mrf.mxu3  ;;  %v4217_v14 = vpop.f32.mrf.mxu0 }
 0x7d5   : > { %v4153_v10 = vadd.f32 %v7596_v41, %v4152_v30  ;;  %v3994_v42 = vpop.f32.mrf.mxu1 }
 0x7d6   : > { %v4091_v52 = vmax.f32 %v4057_v40, 0.0  ;;  %v3995_v60 = vadd.f32 %v3994_v42, %v7489_v62 }
 0x7d7   : > { %v4218_v47 = vadd.f32 %v4217_v14, %v4153_v10 }
 0x7d8   : > { %v4092_v35 = vmax.f32 %v3995_v60, 0.0  ;;  %4252 = vmatmul.f32.gmra.mxu0 %v4091_v52 }
 0x7d9   : > { %v7625_v51 = vadd.f32 %v4218_v47, %v7255_v16 }
 0x7da   : > { %4190 = vmatmul.f32.gmra.mxu3 %v4092_v35 }
 0x7db   : > { %4279 = vadd.xlane.f32.xlu1 %v7625_v51  ;;  %v4059_v22 = vpop.f32.mrf.mxu2  ;;  %v4325_v34 = vmul.f32 %v7625_v51, %v7625_v51 }
 0x7dc   : > { %v4060_v56 = vadd.f32 %v4059_v22, %v7505_v24 }
 0x7dd   : > { %4343 = vadd.xlane.f32.xlu2 %v4325_v34 }
 0x7de   : > { %v4093_v37 = vmax.f32 %v4060_v56, 0.0 }
 0x7e0   : > { %4255 = vmatmul.f32.gmra.mxu0 %v4093_v37 }
 0x7f9   : > { %v4155_v50 = vpop.f32.mrf.mxu3  ;;  %v4220_v62 = vpop.f32.mrf.mxu0 }
 0x7fa   : > { %v4156_v25 = vadd.f32 %v7596_v41, %v4155_v50 }
 0x7fc   : > { %v4221_v46 = vadd.f32 %v4220_v62, %v4156_v25 }
 0x7fe   : > { %v7633_v16 = vadd.f32 %v4221_v46, %v7336_v32 }
 0x800   : > { %4281 = vadd.xlane.f32.xlu2 %v7633_v16  ;;  %v4326_v11 = vmul.f32 %v7633_v16, %v7633_v16 }
 0x801   : > { %v4158_v45 = vpop.f32.mrf.mxu3  ;;  %v4223_v26 = vpop.f32.mrf.mxu0 }
 0x802   : > { %v4159_v24 = vadd.f32 %v7596_v41, %v4158_v45  ;;  %4345 = vadd.xlane.f32.xlu0 %v4326_v11 }
 0x804   : > { %v4224_v23 = vadd.f32 %v4223_v26, %v4159_v24 }
 0x806   : > { %v7640_v38 = vadd.f32 %v4224_v23, %v7378_v5 }
 0x808   : > { %v4327_v36 = vmul.f32 %v7640_v38, %v7640_v38 }
 0x809   : > { %v4161_v20 = vpop.f32.mrf.mxu3  ;;  %v4226_v32 = vpop.f32.mrf.mxu0 }
 0x80a   : > { %v4162_v13 = vadd.f32 %v7596_v41, %v4161_v20  ;;  %4283 = vadd.xlane.f32.xlu0 %v7640_v38  ;;  %4347 = vadd.xlane.f32.xlu1 %v4327_v36 }
 0x80c   : > { %v4227_v43 = vadd.f32 %v4226_v32, %v4162_v13 }
 0x80e   : > { %v7647_v55 = vadd.f32 %v4227_v43, %v7409_v0 }
 0x810   : > { %v4328_v53 = vmul.f32 %v7647_v55, %v7647_v55 }
 0x811   : > { %v4164_v49 = vpop.f32.mrf.mxu3  ;;  %v4229_v5 = vpop.f32.mrf.mxu0 }
 0x812   : > { %v4165_v8 = vadd.f32 %v7596_v41, %v4164_v49  ;;  %4349 = vadd.xlane.f32.xlu2 %v4328_v53  ;;  %4285 = vadd.xlane.f32.xlu1 %v7647_v55 }
 0x814   : > { %v4230_v17 = vadd.f32 %v4229_v5, %v4165_v8 }
 0x816   : > { %v7654_v19 = vadd.f32 %v4230_v17, %v7438_v15 }
 0x818   : > { %v4329_v63 = vmul.f32 %v7654_v19, %v7654_v19 }
 0x819   : > { %v4167_v4 = vpop.f32.mrf.mxu3  ;;  %v4232_v0 = vpop.f32.mrf.mxu0 }
 0x81a   : > { %v4168_v31 = vadd.f32 %v7596_v41, %v4167_v4  ;;  %4287 = vadd.xlane.f32.xlu2 %v7654_v19  ;;  %4351 = vadd.xlane.f32.xlu0 %v4329_v63  ;;  %v7694_v4 = vld [vmem:[%s6030_s26 + $0x5] ss:$0 sm:$0xff] }
 0x81c   : > { %v4233_v33 = vadd.f32 %v4232_v0, %v4168_v31 }
 0x81e   : > { %v7661_v54 = vadd.f32 %v4233_v33, %v7459_v21 }
 0x820   : > { %v4330_v3 = vmul.f32 %v7661_v54, %v7661_v54 }
 0x821   : > { %v4170_v58 = vpop.f32.mrf.mxu3  ;;  %v4235_v15 = vpop.f32.mrf.mxu0 }
 0x822   : > { %v4171_v12 = vadd.f32 %v7596_v41, %v4170_v58  ;;  %4289 = vadd.xlane.f32.xlu0 %v7661_v54  ;;  %4353 = vadd.xlane.f32.xlu1 %v4330_v3  ;;  %v7700_v3 = vld [vmem:[%s6030_s26 + $0x6] ss:$0 sm:$0xff] }
 0x824   : > { %v4236_v1 = vadd.f32 %v4235_v15, %v4171_v12 }
 0x826   : > { %v7668_v48 = vadd.f32 %v4236_v1, %v7477_v27 }
 0x828   : > { %v4276_v9 = vpop.xlane.xlu2 %4275  ;;  %v4331_v30 = vmul.f32 %v7668_v48, %v7668_v48 }
 0x829   : > { %v4307_v44 = vmul.f32 %v4276_v9, %v7184_v57  ;;  %v4173_v42 = vpop.f32.mrf.mxu3  ;;  %v4238_v14 = vpop.f32.mrf.mxu0 }
 0x82a   : > { %v4340_v40 = vpop.xlane.xlu0 %4339  ;;  %v4174_v52 = vadd.f32 %v7596_v41, %v4173_v42  ;;  %4355 = vadd.xlane.f32.xlu2 %v4331_v30  ;;  %4291 = vadd.xlane.f32.xlu1 %v7668_v48 }
 0x82b   : > { %v4387_v21 = vmul.f32 %v4307_v44, %v4307_v44  ;;  %v4371_v10 = vmul.f32 %v4340_v40, %v7184_v57  ;;  %v4419_v63 = vsub.f32 %v7601_v59, %v4307_v44 }
 0x82c   : > { %v4239_v47 = vadd.f32 %v4238_v14, %v4174_v52 }
 0x82d   : > { %v4403_v60 = vsub.f32 %v4371_v10, %v4387_v21 }
 0x82e   : > { %v7677_v35 = vadd.f32 %v4239_v47, %v7492_v6 }
 0x82f   : > { %v4435_v27 = vadd.f32 1e-05, %v4403_v60 }
 0x830   : > { %v4332_v34 = vmul.f32 %v7677_v35, %v7677_v35 }
 0x831   : > { %5385 = vrsqrt.f32 %v4435_v27  ;;  %vm4457_vm15 = vweird.f32 %v4435_v27 }
 0x832   : > { %v4278_v22 = vpop.xlane.xlu0 %4277  ;;  %v4342_v37 = vpop.xlane.xlu1 %4341  ;;  %4293 = vadd.xlane.f32.xlu2 %v7677_v35  ;;  %4357 = vadd.xlane.f32.xlu0 %v4332_v34 }
 0x833   : > { %v4308_v56 = vmul.f32 %v4278_v22, %v7184_v57  ;;  %v4176_v50 = vpop.f32.mrf.mxu3  ;;  %v4372_v62 = vmul.f32 %v4342_v37, %v7184_v57  ;;  %v4241_v46 = vpop.f32.mrf.mxu0 }
 0x834   : > { %v4177_v11 = vadd.f32 %v7596_v41, %v4176_v50 }
 0x835   : > { %v4388_v25 = vmul.f32 %v4308_v56, %v4308_v56  ;;  %v4420_v52 = vsub.f32 %v7611_v18, %v4308_v56 }
 0x836   : > { %v4242_v24 = vadd.f32 %v4241_v46, %v4177_v11 }
 0x837   : > { %v5386_v6 = vpop.eup %5385  ;;  %v4404_v45 = vsub.f32 %v4372_v62, %v4388_v25 }
 0x838   : > { %v4452_v26 = vmul.f32 %v5386_v6, %v4435_v27  ;;  %v7686_v20 = vadd.f32 %v4242_v24, %v7512_v7  ;;  %vm4458_vm14 = vweird.f32 %v5386_v6 }
 0x839   : > { %v4436_v23 = vadd.f32 1e-05, %v4404_v45  ;;  %vm4459_vm2 = vmor %vm4457_vm15, %vm4458_vm14 }
 0x83a   : > { %v4453_v36 = vmul.f32 %v5386_v6, %v4452_v26  ;;  %v4333_v13 = vmul.f32 %v7686_v20, %v7686_v20  ;;  %4295 = vadd.xlane.f32.xlu0 %v7686_v20 }
 0x83b   : > { %5387 = vrsqrt.f32 %v4436_v23  ;;  %vm4467_vm4 = vweird.f32 %v4436_v23 }
 0x83c   : > { %v4454_v32 = vmul.f32 0.5, %v4453_v36  ;;  %4359 = vadd.xlane.f32.xlu1 %v4333_v13 }
 0x83d   : > { %v4179_v43 = vpop.f32.mrf.mxu3  ;;  %v4244_v53 = vpop.f32.mrf.mxu0 }
 0x83e   : > { %v4455_v49 = vsub.f32 1.5, %v4454_v32  ;;  %v4180_v5 = vadd.f32 %v7596_v41, %v4179_v43 }
 0x840   : > { %v4456_v8 = vmul.f32 %v5386_v6, %v4455_v49  ;;  %v4245_v7 = vadd.f32 %v4244_v53, %v4180_v5 }
 0x841   : > { %v5388_v17 = vpop.eup %5387 }
 0x842   : > { %v4460_v0 = vsel %vm4459_vm2, %v5386_v6, %v4456_v8  ;;  %v4462_v31 = vmul.f32 %v5388_v17, %v4436_v23  ;;  %v7697_v33 = vadd.f32 %v4245_v7, %v7537_v28  ;;  %vm4468_vm3 = vweird.f32 %v5388_v17 }
 0x843   : > { %v4611_v58 = vmul.f32 %v4460_v0, %v4419_v63  ;;  %vm4469_vm5 = vmor %vm4467_vm4, %vm4468_vm3 }
 0x844   : > { %v4463_v15 = vmul.f32 %v5388_v17, %v4462_v31  ;;  %v4334_v12 = vmul.f32 %v7697_v33, %v7697_v33  ;;  %4297 = vadd.xlane.f32.xlu1 %v7697_v33 }
 0x845   : > { %v4630_v1 = vmul.f32 %v7694_v4, %v4611_v58  ;;  %v4182_v9 = vpop.f32.mrf.mxu3  ;;  %v4247_v59 = vpop.f32.mrf.mxu0 }
 0x846   : > { %v4464_v44 = vmul.f32 0.5, %v4463_v15  ;;  %v4183_v40 = vadd.f32 %v7596_v41, %v4182_v9  ;;  %4361 = vadd.xlane.f32.xlu2 %v4334_v12 }
 0x847   : > { %v4649_v28 = vadd.f32 %v7700_v3, %v4630_v1 }
 0x848   : > { %v4465_v21 = vsub.f32 1.5, %v4464_v44  ;;  %v4248_v30 = vadd.f32 %v4247_v59, %v4183_v40 }
 0x849   : > { %4665 = vst [vmem:[%s6036_s19] sm:$0xff] %v4649_v28 }
 0x84a   : > { %v4466_v10 = vmul.f32 %v5388_v17, %v4465_v21  ;;  %v7710_v42 = vadd.f32 %v4248_v30, %v7550_v61 }
 0x84c   : > { %v4470_v14 = vsel %vm4469_vm5, %v5388_v17, %v4466_v10  ;;  %v4335_v60 = vmul.f32 %v7710_v42, %v7710_v42 }
 0x84d   : > { %v4612_v47 = vmul.f32 %v4470_v14, %v4420_v52  ;;  %v4185_v27 = vpop.f32.mrf.mxu3  ;;  %v4250_v22 = vpop.f32.mrf.mxu0 }
 0x84e   : > { %v4186_v34 = vadd.f32 %v7596_v41, %v4185_v27  ;;  %v4280_v37 = vpop.xlane.xlu1 %4279  ;;  %4299 = vadd.xlane.f32.xlu2 %v7710_v42  ;;  %4363 = vadd.xlane.f32.xlu0 %v4335_v60 }
 0x84f   : > { %v4631_v61 = vmul.f32 %v7694_v4, %v4612_v47  ;;  %v4309_v50 = vmul.f32 %v4280_v37, %v7184_v57 }
 0x850   : > { %v4251_v18 = vadd.f32 %v4250_v22, %v4186_v34  ;;  %v4344_v56 = vpop.xlane.xlu2 %4343 }
 0x851   : > { %v4650_v62 = vadd.f32 %v7700_v3, %v4631_v61  ;;  %v4389_v25 = vmul.f32 %v4309_v50, %v4309_v50  ;;  %v4373_v46 = vmul.f32 %v4344_v56, %v7184_v57  ;;  %v4421_v31 = vsub.f32 %v7625_v51, %v4309_v50 }
 0x852   : > { %v7723_v6 = vadd.f32 %v4251_v18, %v7559_v39 }
 0x853   : > { %4666 = vst [vmem:[%s6036_s19 + $0x8] sm:$0xff] %v4650_v62  ;;  %v4405_v11 = vsub.f32 %v4373_v46, %v4389_v25 }
 0x854   : > { %v4336_v63 = vmul.f32 %v7723_v6, %v7723_v6 }
 0x855   : > { %v4437_v45 = vadd.f32 1e-05, %v4405_v11  ;;  %v4188_v26 = vpop.f32.mrf.mxu3  ;;  %v4253_v24 = vpop.f32.mrf.mxu0 }
 0x856   : > { %v4189_v23 = vadd.f32 %v7596_v41, %v4188_v26  ;;  %4301 = vadd.xlane.f32.xlu0 %v7723_v6 }
 0x857   : > { %5389 = vrsqrt.f32 %v4437_v45  ;;  %vm4477_vm7 = vweird.f32 %v4437_v45 }
 0x858   : > { %v4254_v36 = vadd.f32 %v4253_v24, %v4189_v23 }
 0x85a   : > { %v7728_v32 = vadd.f32 %v4254_v36, %v7568_v29 }
 0x85c   : > { %4303 = vadd.xlane.f32.xlu1 %v7728_v32  ;;  %v4337_v15 = vmul.f32 %v7728_v32, %v7728_v32 }
 0x85d   : > { %v5390_v13 = vpop.eup %5389  ;;  %v4191_v43 = vpop.f32.mrf.mxu3 }
 0x85e   : > { %v4472_v53 = vmul.f32 %v5390_v13, %v4437_v45  ;;  %v4192_v39 = vadd.f32 %v7596_v41, %v4191_v43  ;;  %v4256_v49 = vpop.f32.mrf.mxu0  ;;  %vm4478_vm6 = vweird.f32 %v5390_v13 }
 0x85f   : > { %vm4479_vm8 = vmor %vm4477_vm7, %vm4478_vm6 }
 0x860   : > { %v4473_v5 = vmul.f32 %v5390_v13, %v4472_v53  ;;  %v4257_v8 = vadd.f32 %v4256_v49, %v4192_v39 }
 0x862   : > { %v4474_v7 = vmul.f32 0.5, %v4473_v5  ;;  %v7733_v17 = vadd.f32 %v4257_v8, %v7577_v2 }
 0x864   : > { %v4475_v0 = vsub.f32 1.5, %v4474_v7  ;;  %4365 = vadd.xlane.f32.xlu1 %v4336_v63  ;;  %4305 = vadd.xlane.f32.xlu2 %v7733_v17  ;;  %v4338_v29 = vmul.f32 %v7733_v17, %v7733_v17 }
 0x866   : > { %v4476_v41 = vmul.f32 %v5390_v13, %v4475_v0  ;;  %4369 = vadd.xlane.f32.xlu0 %v4338_v29 }
 0x868   : > { %v4480_v2 = vsel %vm4479_vm8, %v5390_v13, %v4476_v41 }
 0x869   : > { %v4613_v58 = vmul.f32 %v4480_v2, %v4421_v31 }
 0x86b   : > { %v4632_v12 = vmul.f32 %v7694_v4, %v4613_v58 }
 0x86c   : > { %4367 = vadd.xlane.f32.xlu2 %v4337_v15 }
 0x86d   : > { %v4651_v1 = vadd.f32 %v7700_v3, %v4632_v12 }
 0x86f   : > { %4667 = vst [vmem:[%s6036_s19 + $0x10] sm:$0xff] %v4651_v1 }
 0x873   : > { %v4282_v9 = vpop.xlane.xlu2 %4281 }
 0x874   : > { %v4310_v59 = vmul.f32 %v4282_v9, %v7184_v57 }
 0x875   : > { %v4346_v44 = vpop.xlane.xlu0 %4345 }
 0x876   : > { %v4390_v40 = vmul.f32 %v4310_v59, %v4310_v59  ;;  %v4374_v28 = vmul.f32 %v4346_v44, %v7184_v57  ;;  %v4422_v24 = vsub.f32 %v7633_v16, %v4310_v59 }
 0x878   : > { %v4406_v51 = vsub.f32 %v4374_v28, %v4390_v40 }
 0x87a   : > { %v4438_v21 = vadd.f32 1e-05, %v4406_v51 }
 0x87c   : > { %5391 = vrsqrt.f32 %v4438_v21  ;;  %vm4487_vm0 = vweird.f32 %v4438_v21 }
 0x87d   : > { %v4348_v30 = vpop.xlane.xlu1 %4347  ;;  %v4284_v10 = vpop.xlane.xlu0 %4283 }
 0x87e   : > { %v4311_v52 = vmul.f32 %v4284_v10, %v7184_v57  ;;  %v4375_v14 = vmul.f32 %v4348_v30, %v7184_v57 }
 0x880   : > { %v4391_v60 = vmul.f32 %v4311_v52, %v4311_v52  ;;  %v4423_v9 = vsub.f32 %v7640_v38, %v4311_v52 }
 0x882   : > { %v5392_v47 = vpop.eup %5391  ;;  %v4407_v27 = vsub.f32 %v4375_v14, %v4391_v60 }
 0x883   : > { %v4482_v22 = vmul.f32 %v5392_v47, %v4438_v21  ;;  %vm4488_vm9 = vweird.f32 %v5392_v47 }
 0x884   : > { %v4439_v34 = vadd.f32 1e-05, %v4407_v27  ;;  %vm4489_vm10 = vmor %vm4487_vm0, %vm4488_vm9 }
 0x885   : > { %v4483_v37 = vmul.f32 %v5392_v47, %v4482_v22  ;;  %v4350_v61 = vpop.xlane.xlu2 %4349  ;;  %v4286_v50 = vpop.xlane.xlu1 %4285 }
 0x886   : > { %5393 = vrsqrt.f32 %v4439_v34  ;;  %v7751_v18 = vmul.f32 %v4286_v50, %v7184_v57  ;;  %v4376_v62 = vmul.f32 %v4350_v61, %v7184_v57  ;;  %vm4497_vm12 = vweird.f32 %v4439_v34 }
 0x887   : > { %v4484_v56 = vmul.f32 0.5, %v4483_v37 }
 0x888   : > { %v4392_v25 = vmul.f32 %v7751_v18, %v7751_v18  ;;  %v4424_v61 = vsub.f32 %v7647_v55, %v7751_v18 }
 0x889   : > { %v4485_v46 = vsub.f32 1.5, %v4484_v56 }
 0x88a   : > { %v4408_v11 = vsub.f32 %v4376_v62, %v4392_v25 }
 0x88b   : > { %v4486_v45 = vmul.f32 %v5392_v47, %v4485_v46 }
 0x88c   : > { %v5394_v26 = vpop.eup %5393  ;;  %v4440_v23 = vadd.f32 1e-05, %v4408_v11 }
 0x88d   : > { %v4490_v36 = vsel %vm4489_vm10, %v5392_v47, %v4486_v45  ;;  %v4492_v13 = vmul.f32 %v5394_v26, %v4439_v34  ;;  %v4288_v43 = vpop.xlane.xlu2 %4287  ;;  %v4352_v53 = vpop.xlane.xlu0 %4351  ;;  %vm4498_vm11 = vweird.f32 %v5394_v26 }
 0x88e   : > { %v4614_v39 = vmul.f32 %v4490_v36, %v4422_v24  ;;  %5395 = vrsqrt.f32 %v4440_v23  ;;  %v7758_v49 = vmul.f32 %v4288_v43, %v7184_v57  ;;  %v4377_v16 = vmul.f32 %v4352_v53, %v7184_v57  ;;  %vm4499_vm13 = vmor %vm4497_vm12, %vm4498_vm11 }
 0x88f   : > { %v4493_v5 = vmul.f32 %v5394_v26, %v4492_v13  ;;  %vm4507_vm14 = vweird.f32 %v4440_v23 }
 0x890   : > { %v4633_v8 = vmul.f32 %v7694_v4, %v4614_v39  ;;  %v4393_v7 = vmul.f32 %v7758_v49, %v7758_v49 }
 0x891   : > { %v4494_v63 = vmul.f32 0.5, %v4493_v5  ;;  %v4425_v5 = vsub.f32 %v7654_v19, %v7758_v49 }
 0x892   : > { %v4652_v0 = vadd.f32 %v7700_v3, %v4633_v8  ;;  %v4409_v29 = vsub.f32 %v4377_v16, %v4393_v7 }
 0x893   : > { %v4495_v41 = vsub.f32 1.5, %v4494_v63 }
 0x894   : > { %v5396_v31 = vpop.eup %5395  ;;  %4668 = vst [vmem:[%s6036_s19 + $0x18] sm:$0xff] %v4652_v0  ;;  %v4441_v2 = vadd.f32 1e-05, %v4409_v29 }
 0x895   : > { %v4496_v58 = vmul.f32 %v5394_v26, %v4495_v41  ;;  %v4502_v15 = vmul.f32 %v5396_v31, %v4440_v23  ;;  %v4354_v12 = vpop.xlane.xlu1 %4353  ;;  %v4290_v1 = vpop.xlane.xlu0 %4289  ;;  %vm4508_vm1 = vweird.f32 %v5396_v31 }
 0x896   : > { %5397 = vrsqrt.f32 %v4441_v2  ;;  %v7768_v59 = vmul.f32 %v4290_v1, %v7184_v57  ;;  %v4378_v51 = vmul.f32 %v4354_v12, %v7184_v57  ;;  %vm4509_vm15 = vmor %vm4507_vm14, %vm4508_vm1  ;;  %vm4517_vm3 = vweird.f32 %v4441_v2 }
 0x897   : > { %v4500_v44 = vsel %vm4499_vm13, %v5394_v26, %v4496_v58  ;;  %v4503_v40 = vmul.f32 %v5396_v31, %v4502_v15 }
 0x898   : > { %v4615_v28 = vmul.f32 %v4500_v44, %v4423_v9  ;;  %v4394_v21 = vmul.f32 %v7768_v59, %v7768_v59  ;;  %v4426_v44 = vsub.f32 %v7661_v54, %v7768_v59 }
 0x899   : > { %v4504_v30 = vmul.f32 0.5, %v4503_v40 }
 0x89a   : > { %v4634_v10 = vmul.f32 %v7694_v4, %v4615_v28  ;;  %v4410_v14 = vsub.f32 %v4378_v51, %v4394_v21 }
 0x89b   : > { %v4505_v60 = vsub.f32 1.5, %v4504_v30 }
 0x89c   : > { %v5398_v38 = vpop.eup %5397  ;;  %v4653_v52 = vadd.f32 %v7700_v3, %v4634_v10  ;;  %v4442_v47 = vadd.f32 1e-05, %v4410_v14 }
 0x89d   : > { %v4506_v27 = vmul.f32 %v5396_v31, %v4505_v60  ;;  %v4512_v22 = vmul.f32 %v5398_v38, %v4441_v2  ;;  %v4356_v34 = vpop.xlane.xlu2 %4355  ;;  %v4292_v37 = vpop.xlane.xlu1 %4291  ;;  %vm4518_vm2 = vweird.f32 %v5398_v38 }
 0x89e   : > { %4669 = vst [vmem:[%s6036_s19 + $0x20] sm:$0xff] %v4653_v52  ;;  %5399 = vrsqrt.f32 %v4442_v47  ;;  %v7779_v50 = vmul.f32 %v4292_v37, %v7184_v57  ;;  %v4379_v46 = vmul.f32 %v4356_v34, %v7184_v57  ;;  %vm4519_vm4 = vmor %vm4517_vm3, %vm4518_vm2  ;;  %vm4527_vm6 = vweird.f32 %v4442_v47 }
 0x89f   : > { %v4510_v56 = vsel %vm4509_vm15, %v5396_v31, %v4506_v27  ;;  %v4513_v62 = vmul.f32 %v5398_v38, %v4512_v22 }
 0x8a0   : > { %v4616_v25 = vmul.f32 %v4510_v56, %v4424_v61  ;;  %v4395_v11 = vmul.f32 %v7779_v50, %v7779_v50  ;;  %v4427_v37 = vsub.f32 %v7668_v48, %v7779_v50 }
 0x8a1   : > { %v4514_v45 = vmul.f32 0.5, %v4513_v62 }
 0x8a2   : > { %v4635_v26 = vmul.f32 %v7694_v4, %v4616_v25  ;;  %v4411_v24 = vsub.f32 %v4379_v46, %v4395_v11 }
 0x8a3   : > { %v4515_v23 = vsub.f32 1.5, %v4514_v45 }
 0x8a4   : > { %v5400_v55 = vpop.eup %5399  ;;  %v4654_v18 = vadd.f32 %v7700_v3, %v4635_v26  ;;  %v4443_v36 = vadd.f32 1e-05, %v4411_v24 }
 0x8a5   : > { %v4516_v13 = vmul.f32 %v5398_v38, %v4515_v23  ;;  %v4522_v43 = vmul.f32 %v5400_v55, %v4442_v47  ;;  %v4294_v53 = vpop.xlane.xlu2 %4293  ;;  %v4358_v39 = vpop.xlane.xlu0 %4357  ;;  %vm4528_vm5 = vweird.f32 %v5400_v55 }
 0x8a6   : > { %4670 = vst [vmem:[%s6036_s19 + $0x28] sm:$0xff] %v4654_v18  ;;  %5401 = vrsqrt.f32 %v4443_v36  ;;  %v7790_v8 = vmul.f32 %v4294_v53, %v7184_v57  ;;  %v4380_v29 = vmul.f32 %v4358_v39, %v7184_v57  ;;  %vm4529_vm7 = vmor %vm4527_vm6, %vm4528_vm5  ;;  %vm4537_vm9 = vweird.f32 %v4443_v36 }
 0x8a7   : > { %v4520_v7 = vsel %vm4519_vm4, %v5398_v38, %v4516_v13  ;;  %v4523_v16 = vmul.f32 %v5400_v55, %v4522_v43 }
 0x8a8   : > { %v4617_v63 = vmul.f32 %v4520_v7, %v4425_v5  ;;  %v4396_v0 = vmul.f32 %v7790_v8, %v7790_v8  ;;  %v4428_v53 = vsub.f32 %v7677_v35, %v7790_v8 }
 0x8a9   : > { %v4524_v41 = vmul.f32 0.5, %v4523_v16 }
 0x8aa   : > { %v4636_v31 = vmul.f32 %v7694_v4, %v4617_v63  ;;  %v4412_v2 = vsub.f32 %v4380_v29, %v4396_v0 }
 0x8ab   : > { %v4525_v58 = vsub.f32 1.5, %v4524_v41 }
 0x8ac   : > { %v5402_v19 = vpop.eup %5401  ;;  %v4655_v49 = vadd.f32 %v7700_v3, %v4636_v31  ;;  %v4444_v15 = vadd.f32 1e-05, %v4412_v2 }
 0x8ad   : > { %v4526_v12 = vmul.f32 %v5400_v55, %v4525_v58  ;;  %v4532_v1 = vmul.f32 %v5402_v19, %v4443_v36  ;;  %v4296_v9 = vpop.xlane.xlu0 %4295  ;;  %vm4538_vm8 = vweird.f32 %v5402_v19 }
 0x8ae   : > { %4671 = vst [vmem:[%s6036_s19 + $0x30] sm:$0xff] %v4655_v49  ;;  %5403 = vrsqrt.f32 %v4444_v15  ;;  %v7801_v40 = vmul.f32 %v4296_v9, %v7184_v57  ;;  %vm4539_vm0 = vmor %vm4537_vm9, %vm4538_vm8  ;;  %vm4547_vm11 = vweird.f32 %v4444_v15 }
 0x8af   : > { %v4360_v28 = vpop.xlane.xlu1 %4359  ;;  %v4530_v51 = vsel %vm4529_vm7, %v5400_v55, %v4526_v12  ;;  %v4533_v21 = vmul.f32 %v5402_v19, %v4532_v1 }
 0x8b0   : > { %v4381_v30 = vmul.f32 %v4360_v28, %v7184_v57  ;;  %v4618_v10 = vmul.f32 %v4530_v51, %v4426_v44  ;;  %v4397_v14 = vmul.f32 %v7801_v40, %v7801_v40 }
 0x8b1   : > { %v4534_v60 = vmul.f32 0.5, %v4533_v21 }
 0x8b2   : > { %v4637_v38 = vmul.f32 %v7694_v4, %v4618_v10  ;;  %v4413_v52 = vsub.f32 %v4381_v30, %v4397_v14 }
 0x8b3   : > { %v4535_v54 = vsub.f32 1.5, %v4534_v60 }
 0x8b4   : > { %v5404_v59 = vpop.eup %5403  ;;  %v4656_v47 = vadd.f32 %v7700_v3, %v4637_v38  ;;  %v4445_v27 = vadd.f32 1e-05, %v4413_v52 }
 0x8b5   : > { %v4536_v22 = vmul.f32 %v5402_v19, %v4535_v54  ;;  %v4542_v34 = vmul.f32 %v5404_v59, %v4444_v15  ;;  %vm4548_vm10 = vweird.f32 %v5404_v59  ;;  %v4429_v15 = vsub.f32 %v7686_v20, %v7801_v40 }
 0x8b6   : > { %4672 = vst [vmem:[%s6036_s19 + $0x38] sm:$0xff] %v4656_v47  ;;  %5405 = vrsqrt.f32 %v4445_v27  ;;  %vm4549_vm12 = vmor %vm4547_vm11, %vm4548_vm10  ;;  %vm4557_vm1 = vweird.f32 %v4445_v27 }
 0x8b7   : > { %v4298_v61 = vpop.xlane.xlu1 %4297  ;;  %v4540_v62 = vsel %vm4539_vm0, %v5402_v19, %v4536_v22  ;;  %v4543_v25 = vmul.f32 %v5404_v59, %v4542_v34 }
 0x8b8   : > { %v4318_v46 = vmul.f32 %v4298_v61, %v7184_v57  ;;  %v4619_v45 = vmul.f32 %v4540_v62, %v4427_v37 }
 0x8b9   : > { %v4362_v56 = vpop.xlane.xlu2 %4361  ;;  %v4544_v26 = vmul.f32 0.5, %v4543_v25 }
 0x8ba   : > { %v4382_v11 = vmul.f32 %v4362_v56, %v7184_v57  ;;  %v4398_v24 = vmul.f32 %v4318_v46, %v4318_v46  ;;  %v4638_v23 = vmul.f32 %v7694_v4, %v4619_v45  ;;  %v4430_v40 = vsub.f32 %v7697_v33, %v4318_v46 }
 0x8bb   : > { %v4545_v55 = vsub.f32 1.5, %v4544_v26 }
 0x8bc   : > { %v4414_v18 = vsub.f32 %v4382_v11, %v4398_v24  ;;  %v5406_v48 = vpop.eup %5405  ;;  %v4657_v50 = vadd.f32 %v7700_v3, %v4638_v23 }
 0x8bd   : > { %v4546_v36 = vmul.f32 %v5404_v59, %v4545_v55  ;;  %v4552_v13 = vmul.f32 %v5406_v48, %v4445_v27  ;;  %vm4558_vm13 = vweird.f32 %v5406_v48 }
 0x8be   : > { %v4446_v43 = vadd.f32 1e-05, %v4414_v18  ;;  %4673 = vst [vmem:[%s6036_s19 + $0x40] sm:$0xff] %v4657_v50  ;;  %vm4559_vm14 = vmor %vm4557_vm1, %vm4558_vm13 }
 0x8bf   : > { %v4550_v5 = vsel %vm4549_vm12, %v5404_v59, %v4546_v36  ;;  %v4553_v7 = vmul.f32 %v5406_v48, %v4552_v13 }
 0x8c0   : > { %5407 = vrsqrt.f32 %v4446_v43  ;;  %v4620_v63 = vmul.f32 %v4550_v5, %v4428_v53  ;;  %vm4567_vm2 = vweird.f32 %v4446_v43 }
 0x8c1   : > { %v4300_v39 = vpop.xlane.xlu2 %4299  ;;  %v4364_v16 = vpop.xlane.xlu0 %4363  ;;  %v4554_v29 = vmul.f32 0.5, %v4553_v7 }
 0x8c2   : > { %v4319_v0 = vmul.f32 %v4300_v39, %v7184_v57  ;;  %v4639_v41 = vmul.f32 %v7694_v4, %v4620_v63  ;;  %v4383_v2 = vmul.f32 %v4364_v16, %v7184_v57 }
 0x8c3   : > { %v4555_v58 = vsub.f32 1.5, %v4554_v29 }
 0x8c4   : > { %v4399_v31 = vmul.f32 %v4319_v0, %v4319_v0  ;;  %v4658_v35 = vadd.f32 %v7700_v3, %v4639_v41  ;;  %v4431_v23 = vsub.f32 %v7710_v42, %v4319_v0 }
 0x8c5   : > { %v4556_v49 = vmul.f32 %v5406_v48, %v4555_v58 }
 0x8c6   : > { %v4415_v8 = vsub.f32 %v4383_v2, %v4399_v31  ;;  %v5408_v19 = vpop.eup %5407  ;;  %4674 = vst [vmem:[%s6036_s19 + $0x48] sm:$0xff] %v4658_v35 }
 0x8c7   : > { %v4562_v12 = vmul.f32 %v5408_v19, %v4446_v43  ;;  %v4560_v9 = vsel %vm4559_vm14, %v5406_v48, %v4556_v49  ;;  %vm4568_vm15 = vweird.f32 %v5408_v19 }
 0x8c8   : > { %v4447_v1 = vadd.f32 1e-05, %v4415_v8  ;;  %v4621_v44 = vmul.f32 %v4560_v9, %v4429_v15  ;;  %vm4569_vm3 = vmor %vm4567_vm2, %vm4568_vm15 }
 0x8c9   : > { %v4563_v28 = vmul.f32 %v5408_v19, %v4562_v12  ;;  %v4302_v60 = vpop.xlane.xlu0 %4301 }
 0x8ca   : > { %5409 = vrsqrt.f32 %v4447_v1  ;;  %v4640_v51 = vmul.f32 %v7694_v4, %v4621_v44  ;;  %v4320_v59 = vmul.f32 %v4302_v60, %v7184_v57  ;;  %vm4577_vm5 = vweird.f32 %v4447_v1 }
 0x8cb   : > { %v4564_v21 = vmul.f32 0.5, %v4563_v28 }
 0x8cc   : > { %v4659_v30 = vadd.f32 %v7700_v3, %v4640_v51  ;;  %v4400_v37 = vmul.f32 %v4320_v59, %v4320_v59  ;;  %v4432_v12 = vsub.f32 %v7723_v6, %v4320_v59 }
 0x8cd   : > { %v4565_v10 = vsub.f32 1.5, %v4564_v21 }
 0x8ce   : > { %4675 = vst [vmem:[%s6036_s19 + $0x50] sm:$0xff] %v4659_v30 }
 0x8cf   : > { %v4304_v14 = vpop.xlane.xlu1 %4303  ;;  %v4566_v20 = vmul.f32 %v5408_v19, %v4565_v10 }
 0x8d0   : > { %v5410_v38 = vpop.eup %5409  ;;  %v4321_v48 = vmul.f32 %v4304_v14, %v7184_v57 }
 0x8d1   : > { %v4572_v52 = vmul.f32 %v5410_v38, %v4447_v1  ;;  %v4570_v54 = vsel %vm4569_vm3, %v5408_v19, %v4566_v20  ;;  %vm4578_vm4 = vweird.f32 %v5410_v38 }
 0x8d2   : > { %v4622_v47 = vmul.f32 %v4570_v54, %v4430_v40  ;;  %vm4579_vm6 = vmor %vm4577_vm5, %vm4578_vm4  ;;  %v4401_v5 = vmul.f32 %v4321_v48, %v4321_v48 }
 0x8d3   : > { %v4573_v27 = vmul.f32 %v5410_v38, %v4572_v52 }
 0x8d4   : > { %v4641_v22 = vmul.f32 %v7694_v4, %v4622_v47 }
 0x8d5   : > { %v4574_v34 = vmul.f32 0.5, %v4573_v27 }
 0x8d6   : > { %v4660_v62 = vadd.f32 %v7700_v3, %v4641_v22 }
 0x8d7   : > { %v4366_v61 = vpop.xlane.xlu1 %4365  ;;  %v4306_v56 = vpop.xlane.xlu2 %4305  ;;  %v4575_v25 = vsub.f32 1.5, %v4574_v34 }
 0x8d8   : > { %v4384_v33 = vmul.f32 %v4366_v61, %v7184_v57  ;;  %v4322_v46 = vmul.f32 %v4306_v56, %v7184_v57  ;;  %4676 = vst [vmem:[%s6036_s19 + $0x58] sm:$0xff] %v4660_v62 }
 0x8d9   : > { %v4370_v11 = vpop.xlane.xlu0 %4369  ;;  %v4576_v45 = vmul.f32 %v5410_v38, %v4575_v25 }
 0x8da   : > { %v4416_v26 = vsub.f32 %v4384_v33, %v4400_v37  ;;  %v4402_v24 = vmul.f32 %v4322_v46, %v4322_v46  ;;  %v4386_v55 = vmul.f32 %v4370_v11, %v7184_v57  ;;  %v4434_v21 = vsub.f32 %v7733_v17, %v4322_v46 }
 0x8db   : > { %v4580_v18 = vsel %vm4579_vm6, %v5410_v38, %v4576_v45  ;;  %v4433_v17 = vsub.f32 %v7728_v32, %v4321_v48 }
 0x8dc   : > { %v4448_v50 = vadd.f32 1e-05, %v4416_v26  ;;  %v4623_v36 = vmul.f32 %v4580_v18, %v4431_v23  ;;  %v4418_v13 = vsub.f32 %v4386_v55, %v4402_v24 }
 0x8de   : > { %5411 = vrsqrt.f32 %v4448_v50  ;;  %v4642_v43 = vmul.f32 %v7694_v4, %v4623_v36  ;;  %v4450_v53 = vadd.f32 1e-05, %v4418_v13  ;;  %vm4587_vm8 = vweird.f32 %v4448_v50 }
 0x8df   : > { %v4368_v39 = vpop.xlane.xlu2 %4367 }
 0x8e0   : > { %v4385_v7 = vmul.f32 %v4368_v39, %v7184_v57  ;;  %v4661_v42 = vadd.f32 %v7700_v3, %v4642_v43  ;;  %5413 = vrsqrt.f32 %v4450_v53  ;;  %vm4607_vm10 = vweird.f32 %v4450_v53 }
 0x8e2   : > { %v4417_v16 = vsub.f32 %v4385_v7, %v4401_v5  ;;  %4677 = vst [vmem:[%s6036_s19 + $0x60] sm:$0xff] %v4661_v42 }
 0x8e4   : > { %v5412_v63 = vpop.eup %5411  ;;  %v4449_v0 = vadd.f32 1e-05, %v4417_v16 }
 0x8e5   : > { %v4582_v29 = vmul.f32 %v5412_v63, %v4448_v50  ;;  %vm4588_vm7 = vweird.f32 %v5412_v63 }
 0x8e6   : > { %5415 = vrsqrt.f32 %v4449_v0  ;;  %v5414_v41 = vpop.eup %5413  ;;  %vm4589_vm9 = vmor %vm4587_vm8, %vm4588_vm7  ;;  %vm4597_vm13 = vweird.f32 %v4449_v0 }
 0x8e7   : > { %v4583_v31 = vmul.f32 %v5412_v63, %v4582_v29  ;;  %v4602_v2 = vmul.f32 %v5414_v41, %v4450_v53  ;;  %vm4608_vm0 = vweird.f32 %v5414_v41 }
 0x8e8   : > { %vm4609_vm11 = vmor %vm4607_vm10, %vm4608_vm0 }
 0x8e9   : > { %v4584_v58 = vmul.f32 0.5, %v4583_v31  ;;  %v4603_v35 = vmul.f32 %v5414_v41, %v4602_v2 }
 0x8eb   : > { %v4585_v8 = vsub.f32 1.5, %v4584_v58  ;;  %v4604_v49 = vmul.f32 0.5, %v4603_v35 }
 0x8ec   : > { %v5416_v19 = vpop.eup %5415 }
 0x8ed   : > { %v4586_v15 = vmul.f32 %v5412_v63, %v4585_v8  ;;  %v4592_v57 = vmul.f32 %v5416_v19, %v4449_v0  ;;  %v4605_v1 = vsub.f32 1.5, %v4604_v49  ;;  %vm4598_vm12 = vweird.f32 %v5416_v19 }
 0x8ee   : > { %vm4599_vm1 = vmor %vm4597_vm13, %vm4598_vm12 }
 0x8ef   : > { %v4590_v9 = vsel %vm4589_vm9, %v5412_v63, %v4586_v15  ;;  %v4593_v44 = vmul.f32 %v5416_v19, %v4592_v57  ;;  %v4606_v51 = vmul.f32 %v5414_v41, %v4605_v1 }
 0x8f0   : > { %v4624_v28 = vmul.f32 %v4590_v9, %v4432_v12 }
 0x8f1   : > { %v4594_v30 = vmul.f32 0.5, %v4593_v44  ;;  %v4610_v14 = vsel %vm4609_vm11, %v5414_v41, %v4606_v51 }
 0x8f2   : > { %v4643_v10 = vmul.f32 %v7694_v4, %v4624_v28  ;;  %v4626_v60 = vmul.f32 %v4610_v14, %v4434_v21 }
 0x8f3   : > { %v4595_v6 = vsub.f32 1.5, %v4594_v30 }
 0x8f4   : > { %v4662_v38 = vadd.f32 %v7700_v3, %v4643_v10  ;;  %v4645_v20 = vmul.f32 %v7694_v4, %v4626_v60 }
 0x8f5   : > { %v4596_v40 = vmul.f32 %v5416_v19, %v4595_v6 }
 0x8f6   : > { %4678 = vst [vmem:[%s6036_s19 + $0x68] sm:$0xff] %v4662_v38  ;;  %v4664_v52 = vadd.f32 %v7700_v3, %v4645_v20 }
 0x8f7   : > { %v4600_v54 = vsel %vm4599_vm1, %v5416_v19, %v4596_v40 }
 0x8f8   : > { %v4625_v59 = vmul.f32 %v4600_v54, %v4433_v17  ;;  %4680 = vst [vmem:[%s6036_s19 + $0x78] sm:$0xff] %v4664_v52 }
 0x8fa   : > { %v4644_v47 = vmul.f32 %v7694_v4, %v4625_v59 }
 0x8fc   : > { %v4663_v27 = vadd.f32 %v7700_v3, %v4644_v47 }
 0x8fe   : > { %4679 = vst [vmem:[%s6036_s19 + $0x70] sm:$0xff] %v4663_v27 }
 0x8ff   : > { %5640 = shalt.err (!%p5637_p0)
}
 0x900   : > { %s5759_s1 = smov 128  }
 0x901   : > { %5092 = dma.vmem_to_hbm [thread:$0]  (%p5959_p1), %s4695_s10, 2048, %s4697_s12, %s4682_s8, %s5759_s1, %s5759_s1, %s5757_s23  }
 0x902 PF: > { %s8002_s11 = sld [smem:[#allocation25_spill]] }
 0x903   : > { %s8003_s18 = sld [smem:[#allocation20_spill]] }
 0x908   : > { %p5118_p7 = scmp.ge.s32.totalorder %s8002_s11, 2 }
 0x909   : > { %s4711_s19 = sand.u32 1, %s8003_s18  }
 0x90a   : > { %p5114_p9 = pnand %p5118_p7, %p5966_p2  ;;  %s4712_s28 = scalar_lea.sflag [#allocation4], %s4711_s19 }
 0x90c   : > { %p5115_p3 = pneg %p5114_p9 }
 0x90e   : > { %5702 = dma.done.wait (%p5115_p3), %s4712_s28, 2048  }
 0x90f   : > { %5704 = vsyncadd (%p5115_p3), %s4712_s28, 4294965248  ;;  %s31_s7 = sadd.s32 1, %s8002_s11   ;;  %s8005_s4 = sld [smem:[#allocation19_spill]] }
 0x910   : > { %p28_p10 = scmp.ge.s32.totalorder %s31_s7, 6   ;;  %s8006_s23 = sld [smem:[#allocation29_spill]] }
 0x911   : > { %s8007_s13 = sld [smem:[#allocation21_spill]]  ;;  %s8012_s21 = smov %s5711_s22 }
 0x912   : > { %s8008_s26 = sld [smem:[#allocation30_spill]]  ;;  %s8014_s24 = smov %s5723_s25 }
 0x913   : > { %s8009_s28 = sld [smem:[#allocation24_spill]]  ;;  %s8016_s27 = smov %s5739_s29 }
 0x914   : > { %s8010_s15 = sld [smem:[#allocation26_spill]] }
 0x915   : > { %s8011_s30 = sld [smem:[#allocation28_spill]]  ;;  %s8013_s22 = smov %s8005_s4 }
 0x916   :  { %30 = sbr.rel (!%p28_p10) target bundleno = 21 (0x15), region = 154 }
 0x917   : > { %s8015_s25 = smov %s8007_s13 }
 0x91a   : > { %s8017_s29 = smov %s8010_s15 }
 0x91b   :  { %4718 = vsyncpa [#allocation3], 1 }
 0x91c   :  { %4720 = vsyncpa [#allocation3 + $0x1], 1 }
 0x91d   :  { %4721 = vsyncpa [#allocation6], 1 }
 0x91e   :  { %4723 = vsyncpa [#allocation6 + $0x1], 1 }
 0x91f   :  { %4724 = vsyncpa [#allocation9], 1 }
 0x920   :  { %4726 = vsyncpa [#allocation9 + $0x1], 1 }
 0x921   :  { %4727 = vsyncpa [#allocation12], 1 }
 0x922   :  { %4729 = vsyncpa [#allocation12 + $0x1], 1 }
 0x923   :  { %4730 = vsyncpa [#allocation4], 1 }
 0x924   :  { %4732 = vsyncpa [#allocation4 + $0x1], 1 }

</bundles_post_ra>
